<compile_context>
chip_gen: v7x
topology: tpu7x:2x2x1
jax: 0.10.0
libtpu: 0.0.40
codegen_flags: <defaults>
</compile_context>

<pallas_src>
import functools

import jax
import jax.numpy as jnp
from jax.experimental import pallas as pl
from jax.experimental.pallas import tpu as pltpu

BN_EPS = 1e-5


# --------------------------------------------------------------------------------------
# Kernel: 3 matmuls + 2 ReLUs on a (tile_b, *) batch tile. Weights are resident full blocks.
# --------------------------------------------------------------------------------------
def mlp_kernel(x_ref, w1_ref, b1_ref, w2_ref, b2_ref, w3_ref, b3_ref, o_ref):
    wdt = w1_ref.dtype  # bf16 weights, f32 accumulation

    x = x_ref[...]
    h = jnp.dot(x.astype(wdt), w1_ref[...], preferred_element_type=jnp.float32) + b1_ref[...]
    h = jnp.maximum(h, 0.0)

    h = jnp.dot(h.astype(wdt), w2_ref[...], preferred_element_type=jnp.float32) + b2_ref[...]
    h = jnp.maximum(h, 0.0)

    out = jnp.dot(h.astype(wdt), w3_ref[...], preferred_element_type=jnp.float32) + b3_ref[...]
    o_ref[...] = out.astype(o_ref.dtype)


# --------------------------------------------------------------------------------------
# Host-side parameter folding (BN -> following Linear), class-dim padding, dtype narrowing.
# --------------------------------------------------------------------------------------
def fold_params(params, *, c_pad=None, weight_dtype=jnp.bfloat16):
    (w1, b1, g1, be1, m1, v1,
     w2, b2, g2, be2, m2, v2,
     w3, b3) = params

    s1 = g1 * jax.lax.rsqrt(v1 + BN_EPS)          # (1, H1)
    t1 = be1 - m1 * s1
    s2 = g2 * jax.lax.rsqrt(v2 + BN_EPS)          # (1, H2)
    t2 = be2 - m2 * s2

    # (relu(x@W1+b1)*s1 + t1) @ W2 + b2  ==  relu(x@W1+b1) @ (s1^T * W2) + (t1@W2 + b2)
    w1f, b1f = w1, b1
    w2f = w2 * s1.reshape(-1, 1)
    b2f = b2 + t1 @ w2
    w3f = w3 * s2.reshape(-1, 1)
    b3f = b3 + t2 @ w3

    if c_pad is not None and c_pad > w3f.shape[1]:          # pad class dim to lane width
        pad = c_pad - w3f.shape[1]
        w3f = jnp.pad(w3f, ((0, 0), (0, pad)))
        b3f = jnp.pad(b3f, ((0, 0), (0, pad)))

    return (w1f.astype(weight_dtype), b1f.astype(jnp.float32),
            w2f.astype(weight_dtype), b2f.astype(jnp.float32),
            w3f.astype(weight_dtype), b3f.astype(jnp.float32))


# --------------------------------------------------------------------------------------
# Wrapper
# --------------------------------------------------------------------------------------
@functools.partial(jax.jit, static_argnames=("num_classes", "tile_b"))
def enhanced_mlp(x, folded, *, num_classes=10, tile_b=256):
    w1, b1, w2, b2, w3, b3 = folded
    B, K = x.shape
    assert K == w1.shape[0], "input feature dim must match w1"
    H1, H2 = w1.shape[1], w2.shape[1]
    C_pad = w3.shape[1]
    assert num_classes <= C_pad

    # Zero-pad batch only if B is not a multiple of the tile (sliced off afterwards).
    # No K padding: 784 as the full last dim of the x block is legal and avoids an extra
    # host-side HBM read+write of x that would roughly double input traffic.
    B_pad = -(-B // tile_b) * tile_b
    if B_pad != B:
        x = jnp.pad(x, ((0, B_pad - B), (0, 0)))

    grid = (B_pad // tile_b,)

    def const_spec(a):
        # Whole array, resident across the grid (constant index_map -> fetched once).
        return pl.BlockSpec(a.shape, lambda i: (0, 0))

    flops = 2 * B_pad * (K * H1 + H1 * H2 + H2 * C_pad)
    bytes_accessed = (B_pad * K * x.dtype.itemsize
                      + sum(int(p.size) * p.dtype.itemsize for p in folded)
                      + B_pad * C_pad * 4)

    out = pl.pallas_call(
        mlp_kernel,
        out_shape=jax.ShapeDtypeStruct((B_pad, C_pad), jnp.float32),
        grid_spec=pltpu.PrefetchScalarGridSpec(
            num_scalar_prefetch=0,
            grid=grid,
            in_specs=[pl.BlockSpec((tile_b, K), lambda i: (i, 0))]
                     + [const_spec(p) for p in folded],
            out_specs=pl.BlockSpec((tile_b, C_pad), lambda i: (i, 0)),
        ),
        compiler_params=pltpu.CompilerParams(
            dimension_semantics=("parallel",)),
        cost_estimate=pl.CostEstimate(
            flops=flops, transcendentals=0, bytes_accessed=bytes_accessed),
    )(x, *folded)

    return out[:B, :num_classes]


# --------------------------------------------------------------------------------------
# Deterministic synthetic parameters (shapes follow EnhancedMLP.__init__).
# --------------------------------------------------------------------------------------
def init_params(key, input_size=784, hidden_sizes=(512, 256), num_classes=10):
    sizes = [input_size, *hidden_sizes, num_classes]
    keys = jax.random.split(key, 16)
    ki = iter(range(16))

    def rnd(shape, scale=0.05):
        return (scale * jax.random.normal(keys[next(ki)], shape)).astype(jnp.float32)

    params = []
    for li in range(len(hidden_sizes)):
        fan_in, fan_out = sizes[li], sizes[li + 1]
        w = rnd((fan_in, fan_out))                 # Linear weight, stored (in, out)
        b = rnd((1, fan_out))                      # Linear bias
        gamma = 1.0 + rnd((1, fan_out))            # BN weight
        beta = rnd((1, fan_out))                   # BN bias
        mean = rnd((1, fan_out))                   # BN running_mean
        var = 0.5 + jnp.abs(rnd((1, fan_out)))     # BN running_var (> 0)
        params += [w, b, gamma, beta, mean, var]
    w = rnd((sizes[-2], sizes[-1]))                # final Linear
    b = rnd((1, sizes[-1]))
    params += [w, b]
    return tuple(params)


# --------------------------------------------------------------------------------------
# References
# --------------------------------------------------------------------------------------
def reference_mlp(x, params):
    """Original eval-mode module math in f32 (Linear->ReLU->BN->Dropout[id], x2, Linear)."""
    (w1, b1, g1, be1, m1, v1,
     w2, b2, g2, be2, m2, v2,
     w3, b3) = params
    h = jnp.maximum(x @ w1 + b1, 0.0)
    h = (h - m1) * (g1 / jnp.sqrt(v1 + BN_EPS)) + be1
    h = jnp.maximum(h @ w2 + b2, 0.0)
    h = (h - m2) * (g2 / jnp.sqrt(v2 + BN_EPS)) + be2
    return h @ w3 + b3


def folded_reference(x, folded, num_classes):
    """Same math (and same dtype casts) as the kernel, in plain JAX."""
    w1, b1, w2, b2, w3, b3 = folded
    wd = w1.dtype
    h = jnp.maximum(jnp.dot(x.astype(wd), w1, preferred_element_type=jnp.float32) + b1, 0.0)
    h = jnp.maximum(jnp.dot(h.astype(wd), w2, preferred_element_type=jnp.float32) + b2, 0.0)
    out = jnp.dot(h.astype(wd), w3, preferred_element_type=jnp.float32) + b3
    return out[:, :num_classes]


if __name__ == "__main__":
    key = jax.random.PRNGKey(0)
    k_x, k_p = jax.random.split(key)

    B, input_size = 256, 784
    hidden_sizes = (512, 256)
    num_classes = 10
    C_PAD = 128    # lane-dense output

    x = jax.random.normal(k_x, (B, input_size), dtype=jnp.float32)
    params = init_params(k_p, input_size, hidden_sizes, num_classes)

    ref_full = reference_mlp(x, params)

    # 1) Host-side sanity: BN folding (kept in f32, no padding) is exactly the module math.
    folded_f32 = fold_params(params, weight_dtype=jnp.float32)
    assert jnp.allclose(folded_reference(x, folded_f32, num_classes), ref_full,
                        atol=1e-4, rtol=1e-4), "BN folding mismatch"

    # 2) Kernel with bf16 weights, un-padded K, padded class dim, 256-row batch tile.
    folded = fold_params(params, c_pad=C_PAD, weight_dtype=jnp.bfloat16)
    out = enhanced_mlp(x, folded, num_classes=num_classes, tile_b=256)
    out = jax.block_until_ready(out)
    assert out.shape == (B, num_classes)

    # Tight check against the identical bf16-weight math.
    ref_bf16 = folded_reference(x, folded, num_classes)
    assert jnp.allclose(out, ref_bf16, atol=2e-3, rtol=2e-3), "mismatch vs folded bf16 reference"

    # Loose check against the original f32 module semantics (bf16 weight/activation
    # quantization at the MXU inputs only — intentional, eval-mode).
    assert jnp.allclose(out, ref_full, atol=1e-1, rtol=2e-2), "mismatch vs f32 module reference"

    print("KERNEL_OK")
</pallas_src>

<mosaic_0001>
module attributes {stable_mosaic.version = 11 : i64} {
  func.func @mlp_kernel(%arg0: i32, %arg1: memref<256x784xf32, #tpu.memory_space<vmem>>, %arg2: memref<784x512xbf16, #tpu.memory_space<vmem>>, %arg3: memref<1x512xf32, #tpu.memory_space<vmem>>, %arg4: memref<512x256xbf16, #tpu.memory_space<vmem>>, %arg5: memref<1x256xf32, #tpu.memory_space<vmem>>, %arg6: memref<256x128xbf16, #tpu.memory_space<vmem>>, %arg7: memref<1x128xf32, #tpu.memory_space<vmem>>, %arg8: memref<256x128xf32, #tpu.memory_space<vmem>>) attributes {dimension_semantics = [#tpu.dimension_semantics<parallel>], iteration_bounds = array<i64: 1>, scalar_prefetch = 0 : i64, scratch_operands = 0 : i64, tpu.core_type = #tpu.core_type<tc>, window_params = [{transform_indices = @transform_0, window_bounds = array<i64: 256, 784>}, {pipeline_mode = #tpu.pipeline_mode<synchronous>, transform_indices = @transform_1, window_bounds = array<i64: 784, 512>}, {pipeline_mode = #tpu.pipeline_mode<synchronous>, transform_indices = @transform_2, window_bounds = array<i64: 1, 512>}, {pipeline_mode = #tpu.pipeline_mode<synchronous>, transform_indices = @transform_3, window_bounds = array<i64: 512, 256>}, {pipeline_mode = #tpu.pipeline_mode<synchronous>, transform_indices = @transform_4, window_bounds = array<i64: 1, 256>}, {pipeline_mode = #tpu.pipeline_mode<synchronous>, transform_indices = @transform_5, window_bounds = array<i64: 256, 128>}, {pipeline_mode = #tpu.pipeline_mode<synchronous>, transform_indices = @transform_6, window_bounds = array<i64: 1, 128>}, {transform_indices = @transform_7, window_bounds = array<i64: 256, 128>}]} {
    %c0 = arith.constant 0 : index
    %c0_0 = arith.constant 0 : index
    %0 = vector.load %arg1[%c0, %c0_0] : memref<256x784xf32, #tpu.memory_space<vmem>>, vector<256x784xf32>
    %1 = arith.truncf %0 : vector<256x784xf32> to vector<256x784xbf16>
    %c0_1 = arith.constant 0 : index
    %c0_2 = arith.constant 0 : index
    %2 = vector.load %arg2[%c0_1, %c0_2] : memref<784x512xbf16, #tpu.memory_space<vmem>>, vector<784x512xbf16>
    %cst = arith.constant dense<0.000000e+00> : vector<256x512xf32>
    %3 = tpu.matmul %1, %2, %cst {dimension_numbers = #tpu.dot_dimension_numbers<[1], [0], [0], [1], [0, 0, 1, 1], [], []>} : vector<256x784xbf16>, vector<784x512xbf16>, vector<256x512xf32> -> vector<256x512xf32>
    %c0_3 = arith.constant 0 : index
    %c0_4 = arith.constant 0 : index
    %4 = vector.load %arg3[%c0_3, %c0_4] : memref<1x512xf32, #tpu.memory_space<vmem>>, vector<1x512xf32>
    %5 = vector.broadcast %4 : vector<1x512xf32> to vector<256x512xf32>
    %6 = arith.addf %3, %5 : vector<256x512xf32>
    %cst_5 = arith.constant 0.000000e+00 : f32
    %7 = vector.broadcast %cst_5 : f32 to vector<256x512xf32>
    %8 = arith.maximumf %6, %7 : vector<256x512xf32>
    %9 = arith.truncf %8 : vector<256x512xf32> to vector<256x512xbf16>
    %c0_6 = arith.constant 0 : index
    %c0_7 = arith.constant 0 : index
    %10 = vector.load %arg4[%c0_6, %c0_7] : memref<512x256xbf16, #tpu.memory_space<vmem>>, vector<512x256xbf16>
    %cst_8 = arith.constant dense<0.000000e+00> : vector<256x256xf32>
    %11 = tpu.matmul %9, %10, %cst_8 {dimension_numbers = #tpu.dot_dimension_numbers<[1], [0], [0], [1], [0, 0, 1, 1], [], []>} : vector<256x512xbf16>, vector<512x256xbf16>, vector<256x256xf32> -> vector<256x256xf32>
    %c0_9 = arith.constant 0 : index
    %c0_10 = arith.constant 0 : index
    %12 = vector.load %arg5[%c0_9, %c0_10] : memref<1x256xf32, #tpu.memory_space<vmem>>, vector<1x256xf32>
    %13 = vector.broadcast %12 : vector<1x256xf32> to vector<256x256xf32>
    %14 = arith.addf %11, %13 : vector<256x256xf32>
    %cst_11 = arith.constant 0.000000e+00 : f32
    %15 = vector.broadcast %cst_11 : f32 to vector<256x256xf32>
    %16 = arith.maximumf %14, %15 : vector<256x256xf32>
    %17 = arith.truncf %16 : vector<256x256xf32> to vector<256x256xbf16>
    %c0_12 = arith.constant 0 : index
    %c0_13 = arith.constant 0 : index
    %18 = vector.load %arg6[%c0_12, %c0_13] : memref<256x128xbf16, #tpu.memory_space<vmem>>, vector<256x128xbf16>
    %cst_14 = arith.constant dense<0.000000e+00> : vector<256x128xf32>
    %19 = tpu.matmul %17, %18, %cst_14 {dimension_numbers = #tpu.dot_dimension_numbers<[1], [0], [0], [1], [0, 0, 1, 1], [], []>} : vector<256x256xbf16>, vector<256x128xbf16>, vector<256x128xf32> -> vector<256x128xf32>
    %c0_15 = arith.constant 0 : index
    %c0_16 = arith.constant 0 : index
    %20 = vector.load %arg7[%c0_15, %c0_16] : memref<1x128xf32, #tpu.memory_space<vmem>>, vector<1x128xf32>
    %21 = vector.broadcast %20 : vector<1x128xf32> to vector<256x128xf32>
    %22 = arith.addf %19, %21 : vector<256x128xf32>
    %c0_17 = arith.constant 0 : index
    %c0_18 = arith.constant 0 : index
    %23 = vector.load %arg8[%c0_17, %c0_18] : memref<256x128xf32, #tpu.memory_space<vmem>>, vector<256x128xf32>
    tpu.vector_store %arg8[%c0_17, %c0_18], %22 {strides = array<i32>} : memref<256x128xf32, #tpu.memory_space<vmem>>, vector<256x128xf32>,
    return
  }
  func.func @transform_0(%arg0: i32) -> (i32, i32) {
    %c0_i32 = arith.constant 0 : i32
    %c0_i32_0 = arith.constant 0 : i32
    return %arg0, %c0_i32 : i32, i32
  }
  func.func @transform_1(%arg0: i32) -> (i32, i32) {
    %c0_i32 = arith.constant 0 : i32
    %c0_i32_0 = arith.constant 0 : i32
    %c0_i32_1 = arith.constant 0 : i32
    return %c0_i32, %c0_i32_0 : i32, i32
  }
  func.func @transform_2(%arg0: i32) -> (i32, i32) {
    %c0_i32 = arith.constant 0 : i32
    %c0_i32_0 = arith.constant 0 : i32
    %c0_i32_1 = arith.constant 0 : i32
    return %c0_i32, %c0_i32_0 : i32, i32
  }
  func.func @transform_3(%arg0: i32) -> (i32, i32) {
    %c0_i32 = arith.constant 0 : i32
    %c0_i32_0 = arith.constant 0 : i32
    %c0_i32_1 = arith.constant 0 : i32
    return %c0_i32, %c0_i32_0 : i32, i32
  }
  func.func @transform_4(%arg0: i32) -> (i32, i32) {
    %c0_i32 = arith.constant 0 : i32
    %c0_i32_0 = arith.constant 0 : i32
    %c0_i32_1 = arith.constant 0 : i32
    return %c0_i32, %c0_i32_0 : i32, i32
  }
  func.func @transform_5(%arg0: i32) -> (i32, i32) {
    %c0_i32 = arith.constant 0 : i32
    %c0_i32_0 = arith.constant 0 : i32
    %c0_i32_1 = arith.constant 0 : i32
    return %c0_i32, %c0_i32_0 : i32, i32
  }
  func.func @transform_6(%arg0: i32) -> (i32, i32) {
    %c0_i32 = arith.constant 0 : i32
    %c0_i32_0 = arith.constant 0 : i32
    %c0_i32_1 = arith.constant 0 : i32
    return %c0_i32, %c0_i32_0 : i32, i32
  }
  func.func @transform_7(%arg0: i32) -> (i32, i32) {
    %c0_i32 = arith.constant 0 : i32
    %c0_i32_0 = arith.constant 0 : i32
    return %arg0, %c0_i32 : i32, i32
  }
}

</mosaic_0001>

<bundles_post_ra>
// kernel: enhanced_mlp.1
= control target key start
LH: loop header
LB: loop body
LE: loop exit
PB: predicated region body
PF: predicated region fallthrough
CT: control target
= control target key end

     0   :  { %vm1561_vm0 = vcmask 130048   ;;  %s8568_s1 = inlined_call_operand.vmem [shape: bf16[784,512], index: 1, kind: input, shape index: {}]   ;;  %s8569_s0 = inlined_call_operand.vmem [shape: f32[256,784], index: 0, kind: input, shape index: {}]   ;;  %s8570_s3 = inlined_call_operand.vmem [shape: bf16[512,256], index: 3, kind: input, shape index: {}]   ;;  %s8571_s2 = inlined_call_operand.vmem [shape: f32[1,512], index: 2, kind: input, shape index: {}]   ;;  %s8572_s5 = inlined_call_operand.vmem [shape: bf16[256,128], index: 5, kind: input, shape index: {}]   ;;  %s8573_s4 = inlined_call_operand.vmem [shape: f32[1,256], index: 4, kind: input, shape index: {}]   ;;  %s8574_s6 = inlined_call_operand.vmem [shape: f32[1,128], index: 6, kind: input, shape index: {}]   ;;  %s8575_s7 = inlined_call_operand.vmem [shape: f32[256,128], index: 7, kind: output, shape index: {}]  }
   0x1   :  { %v5650_v0 = vld [vmem:[%s8568_s1 + $0x4] ss:$16 sps:$4 sm:$0xff]   ;;  %v5652_v1 = vld [vmem:[%s8568_s1] ss:$16 sps:$4 sm:$0xff]   ;;  %v28_v13 = vld [vmem:[%s8569_s0 + $0x8] sm:$0xff] }
   0x2   :  { %1610 = vmatprep.subr.bf16.mxu0 %v5650_v0  ;;  %4977 = vmatprep.subr.bf16.mxu1 %v5650_v0  ;;  %v5653_v2 = vld [vmem:[%s8568_s1 + $0x24] ss:$16 sps:$4 sm:$0xff]   ;;  %v5655_v3 = vld [vmem:[%s8568_s1 + $0x20] ss:$16 sps:$4 sm:$0xff]   ;;  %v140_v16 = vld [vmem:[%s8569_s0 + $0x388] sm:$0xff] }
   0x3   :  { %1611 = vmatpush1.bf16.msra.mxu0 %v5652_v1  ;;  %4993 = vmatpush1.bf16.msra.mxu1 %v5652_v1  ;;  %v5656_v4 = vld [vmem:[%s8568_s1 + $0x44] ss:$16 sps:$4 sm:$0xff]   ;;  %v5658_v5 = vld [vmem:[%s8568_s1 + $0x40] ss:$16 sps:$4 sm:$0xff]   ;;  %v34_v39 = vld [vmem:[%s8569_s0 + $0x38] sm:$0xff] }
   0x4   :  { %1612 = vmatprep.subr.bf16.mxu0 %v5653_v2  ;;  %4978 = vmatprep.subr.bf16.mxu1 %v5653_v2  ;;  %v5659_v6 = vld [vmem:[%s8568_s1 + $0x64] ss:$16 sps:$4 sm:$0xff]   ;;  %v5661_v7 = vld [vmem:[%s8568_s1 + $0x60] ss:$16 sps:$4 sm:$0xff]   ;;  %v146_v41 = vld [vmem:[%s8569_s0 + $0x3b8] sm:$0xff] }
   0x5   :  { %v5662_v8 = vld [vmem:[%s8568_s1 + $0x84] ss:$16 sps:$4 sm:$0xff]   ;;  %v5664_v9 = vld [vmem:[%s8568_s1 + $0x80] ss:$16 sps:$4 sm:$0xff]   ;;  %v5703_v43 = vld [vmem:[%s8568_s1 + $0xc] ss:$16 sps:$4 sm:$0xff]  }
   0x6   :  { %v5665_v10 = vld [vmem:[%s8568_s1 + $0xa4] ss:$16 sps:$4 sm:$0xff]   ;;  %v5667_v11 = vld [vmem:[%s8568_s1 + $0xa0] ss:$16 sps:$4 sm:$0xff]   ;;  %v42_v44 = vld [vmem:[%s8569_s0 + $0x78] sm:$0xff] }
   0x7   :  { %1613 = vmatpush1.bf16.msra.mxu0 %v5655_v3  ;;  %4994 = vmatpush1.bf16.msra.mxu1 %v5655_v3  ;;  %v5668_v12 = vld [vmem:[%s8568_s1 + $0xc4] ss:$16 sps:$4 sm:$0xff]   ;;  %v5670_v18 = vld [vmem:[%s8568_s1 + $0xc0] ss:$16 sps:$4 sm:$0xff]   ;;  %v154_v48 = vld [vmem:[%s8569_s0 + $0x3f8] sm:$0xff] }
   0x8   :  { %1614 = vmatprep.subr.bf16.mxu0 %v5656_v4  ;;  %4979 = vmatprep.subr.bf16.mxu1 %v5656_v4  ;;  %v35_v14 = vld [vmem:[%s8569_s0 + $0x40] sm:$0xff]  ;;  %v49_v47 = vld [vmem:[%s8569_s0 + $0xb0] sm:$0xff]  ;;  %v5701_v51 = vld [vmem:[%s8568_s1 + $0x8] ss:$16 sps:$4 sm:$0xff]  }
   0x9   :  { %v6142_v15 = vpack.c.bf16 %v35_v14, %v28_v13  ;;  %v147_v17 = vld [vmem:[%s8569_s0 + $0x3c0] sm:$0xff]  ;;  %v161_v49 = vld [vmem:[%s8569_s0 + $0x430] sm:$0xff]  ;;  %v5709_v53 = vld [vmem:[%s8568_s1 + $0x2c] ss:$16 sps:$4 sm:$0xff]   ;;  %v6263_v56 = vpack.c.bf16 %v49_v47, %v42_v44 }
   0xa   :  { %v6153_v19 = vpack.c.bf16 %v147_v17, %v140_v16  ;;  %v5671_v20 = vld [vmem:[%s8568_s1 + $0xe4] ss:$16 sps:$4 sm:$0xff]   ;;  %v5673_v21 = vld [vmem:[%s8568_s1 + $0xe0] ss:$16 sps:$4 sm:$0xff]   ;;  %v5707_v55 = vld [vmem:[%s8568_s1 + $0x28] ss:$16 sps:$4 sm:$0xff]   ;;  %v6265_v57 = vpack.c.bf16 %v161_v49, %v154_v48 }
   0xb   :  { %1615 = vmatpush1.bf16.msra.mxu0 %v5658_v5  ;;  %4995 = vmatpush1.bf16.msra.mxu1 %v5658_v5  ;;  %v5674_v22 = vld [vmem:[%s8568_s1 + $0x104] ss:$16 sps:$4 sm:$0xff]   ;;  %v5676_v23 = vld [vmem:[%s8568_s1 + $0x100] ss:$16 sps:$4 sm:$0xff]   ;;  %v48_v59 = vld [vmem:[%s8569_s0 + $0xa8] sm:$0xff] }
   0xc   :  { %1616 = vmatprep.subr.bf16.mxu0 %v5659_v6  ;;  %4980 = vmatprep.subr.bf16.mxu1 %v5659_v6  ;;  %v5677_v24 = vld [vmem:[%s8568_s1 + $0x124] ss:$16 sps:$4 sm:$0xff]   ;;  %v5679_v25 = vld [vmem:[%s8568_s1 + $0x120] ss:$16 sps:$4 sm:$0xff]   ;;  %v160_v61 = vld [vmem:[%s8569_s0 + $0x428] sm:$0xff] }
   0xd   :  { %1642 = vmatprep.mubr.bf16.mxu0 %v6142_v15  ;;  %1722 = vmatprep.mubr.bf16.mxu1 %v6153_v19  ;;  %v5680_v26 = vld [vmem:[%s8568_s1 + $0x144] ss:$16 sps:$4 sm:$0xff]   ;;  %v5682_v27 = vld [vmem:[%s8568_s1 + $0x140] ss:$16 sps:$4 sm:$0xff]   ;;  %v5715_v63 = vld [vmem:[%s8568_s1 + $0x4c] ss:$16 sps:$4 sm:$0xff]  }
   0xe   :  { %v5683_v28 = vld [vmem:[%s8568_s1 + $0x164] ss:$16 sps:$4 sm:$0xff]   ;;  %v5685_v29 = vld [vmem:[%s8568_s1 + $0x160] ss:$16 sps:$4 sm:$0xff]   ;;  %v56_v0 = vld [vmem:[%s8569_s0 + $0xe8] sm:$0xff] }
   0xf   :  { %1617 = vmatpush1.bf16.msra.mxu0 %v5661_v7  ;;  %4996 = vmatpush1.bf16.msra.mxu1 %v5661_v7  ;;  %v5686_v30 = vld [vmem:[%s8568_s1 + $0x184] ss:$16 sps:$4 sm:$0xff]   ;;  %v5688_v31 = vld [vmem:[%s8568_s1 + $0x180] ss:$16 sps:$4 sm:$0xff]   ;;  %v168_v4 = vld [vmem:[%s8569_s0 + $0x468] sm:$0xff] }
  0x10   :  { %1618 = vmatprep.subr.bf16.mxu0 %v5662_v8  ;;  %4981 = vmatprep.subr.bf16.mxu1 %v5662_v8  ;;  %v5689_v32 = vld [vmem:[%s8568_s1 + $0x1a4] ss:$16 sps:$4 sm:$0xff]   ;;  %v5691_v33 = vld [vmem:[%s8568_s1 + $0x1a0] ss:$16 sps:$4 sm:$0xff]   ;;  %v5713_v7 = vld [vmem:[%s8568_s1 + $0x48] ss:$16 sps:$4 sm:$0xff]  }
  0x11   :  { %v5692_v34 = vld [vmem:[%s8568_s1 + $0x1c4] ss:$16 sps:$4 sm:$0xff]   ;;  %v5694_v35 = vld [vmem:[%s8568_s1 + $0x1c0] ss:$16 sps:$4 sm:$0xff]   ;;  %v62_v16 = vld [vmem:[%s8569_s0 + $0x118] sm:$0xff] }
  0x12   :  { %v5695_v36 = vld [vmem:[%s8568_s1 + $0x1e4] ss:$16 sps:$4 sm:$0xff]   ;;  %v5697_v37 = vld [vmem:[%s8568_s1 + $0x1e0] ss:$16 sps:$4 sm:$0xff]   ;;  %v196_v49 = vld [vmem:[%s8569_s0 + $0x548] sm:$0xff] }
  0x13   :  { %1619 = vmatpush1.bf16.msra.mxu0 %v5664_v9  ;;  %4997 = vmatpush1.bf16.msra.mxu1 %v5664_v9  ;;  %v27_v38 = vld [vmem:[%s8569_s0] sm:$0xff]  ;;  %v41_v58 = vld [vmem:[%s8569_s0 + $0x70] sm:$0xff]  ;;  %v5721_v9 = vld [vmem:[%s8568_s1 + $0x6c] ss:$16 sps:$4 sm:$0xff]  }
  0x14   :  { %1620 = vmatprep.subr.bf16.mxu0 %v5665_v10  ;;  %4982 = vmatprep.subr.bf16.mxu1 %v5665_v10  ;;  %v139_v40 = vld [vmem:[%s8569_s0 + $0x380] sm:$0xff]  ;;  %v6232_v45 = vpack.c.bf16 %v34_v39, %v27_v38  ;;  %v153_v60 = vld [vmem:[%s8569_s0 + $0x3f0] sm:$0xff]  ;;  %v6292_v1 = vpack.c.bf16 %v48_v59, %v41_v58  ;;  %v188_v39 = vld [vmem:[%s8569_s0 + $0x508] sm:$0xff] }
  0x15   :  { %v5700_v42 = vld [vmem:[%s8568_s1 + $0x204] ss:$16 sps:$4 sm:$0xff]   ;;  %v6234_v46 = vpack.c.bf16 %v146_v41, %v139_v40  ;;  %v5698_v50 = vld [vmem:[%s8568_s1 + $0x200] ss:$16 sps:$4 sm:$0xff]   ;;  %v6294_v2 = vpack.c.bf16 %v160_v61, %v153_v60  ;;  %v5739_v41 = vld [vmem:[%s8568_s1 + $0xcc] ss:$16 sps:$4 sm:$0xff]  }
  0x16   :  { %v5706_v52 = vld [vmem:[%s8568_s1 + $0x224] ss:$16 sps:$4 sm:$0xff]   ;;  %v5704_v54 = vld [vmem:[%s8568_s1 + $0x220] ss:$16 sps:$4 sm:$0xff]   ;;  %v90_v61 = vld [vmem:[%s8569_s0 + $0x1f8] sm:$0xff] }
  0x17   :  { %1621 = vmatpush1.bf16.msra.mxu0 %v5667_v11  ;;  %4998 = vmatpush1.bf16.msra.mxu1 %v5667_v11  ;;  %v5712_v62 = vld [vmem:[%s8568_s1 + $0x244] ss:$16 sps:$4 sm:$0xff]   ;;  %v5710_v6 = vld [vmem:[%s8568_s1 + $0x240] ss:$16 sps:$4 sm:$0xff]   ;;  %v5719_v11 = vld [vmem:[%s8568_s1 + $0x68] ss:$16 sps:$4 sm:$0xff]  }
  0x18   :  { %1622 = vmatprep.subr.bf16.mxu0 %v5668_v12  ;;  %4983 = vmatprep.subr.bf16.mxu1 %v5668_v12  ;;  %v63_v3 = vld [vmem:[%s8569_s0 + $0x120] sm:$0xff]  ;;  %v181_v38 = vld [vmem:[%s8569_s0 + $0x4d0] sm:$0xff] }
  0x19   :  { %v175_v5 = vld [vmem:[%s8569_s0 + $0x4a0] sm:$0xff]  ;;  %v6323_v12 = vpack.c.bf16 %v63_v3, %v56_v0  ;;  %v6420_v48 = vpack.c.bf16 %v188_v39, %v181_v38  ;;  %v5751_v3 = vld [vmem:[%s8568_s1 + $0x10c] ss:$16 sps:$4 sm:$0xff]   ;;  %v5761_v39 = vld [vmem:[%s8568_s1 + $0x148] ss:$16 sps:$4 sm:$0xff]  }
  0x1a   :  { %v5718_v8 = vld [vmem:[%s8568_s1 + $0x264] ss:$16 sps:$4 sm:$0xff]   ;;  %v5716_v10 = vld [vmem:[%s8568_s1 + $0x260] ss:$16 sps:$4 sm:$0xff]   ;;  %v6325_v13 = vpack.c.bf16 %v175_v5, %v168_v4  ;;  %v98_v5 = vld [vmem:[%s8569_s0 + $0x238] sm:$0xff] }
  0x1b   :  { %1623 = vmatpush1.bf16.msra.mxu0 %v5670_v18  ;;  %4999 = vmatpush1.bf16.msra.mxu1 %v5670_v18  ;;  %v55_v14 = vld [vmem:[%s8569_s0 + $0xe0] sm:$0xff]  ;;  %v174_v18 = vld [vmem:[%s8569_s0 + $0x498] sm:$0xff] }
  0x1c   :  { %1624 = vmatprep.subr.bf16.mxu0 %v5671_v20  ;;  %4984 = vmatprep.subr.bf16.mxu1 %v5671_v20  ;;  %v167_v17 = vld [vmem:[%s8569_s0 + $0x460] sm:$0xff] }
  0x1d   :  { %v5724_v20 = vld [vmem:[%s8568_s1 + $0x284] ss:$16 sps:$4 sm:$0xff]   ;;  %v5746_v4 = vld [vmem:[%s8568_s1 + $0x300] ss:$16 sps:$4 sm:$0xff]  }
  0x1e   :  { %v5736_v40 = vld [vmem:[%s8568_s1 + $0x2c4] ss:$16 sps:$4 sm:$0xff]  }
  0x1f   :  { %1625 = vmatpush1.bf16.msra.mxu0 %v5673_v21  ;;  %5000 = vmatpush1.bf16.msra.mxu1 %v5673_v21  ;;  %v5727_v21 = vld [vmem:[%s8568_s1 + $0x8c] ss:$16 sps:$4 sm:$0xff]   ;;  %v91_v44 = vld [vmem:[%s8569_s0 + $0x200] sm:$0xff] }
  0x20   :  { %1626 = vmatprep.subr.bf16.mxu0 %v5674_v22  ;;  %4985 = vmatprep.subr.bf16.mxu1 %v5674_v22  ;;  %v70_v22 = vld [vmem:[%s8569_s0 + $0x158] sm:$0xff]  ;;  %v83_v60 = vld [vmem:[%s8569_s0 + $0x1c0] sm:$0xff] }
  0x21   :  { %v5748_v0 = vld [vmem:[%s8568_s1 + $0x304] ss:$16 sps:$4 sm:$0xff]  }
  0x22   :  { %v231_v38 = vld [vmem:[%s8569_s0 + $0x660] sm:$0xff] }
  0x23   :  { %1627 = vmatpush1.bf16.msra.mxu0 %v5676_v23  ;;  %5001 = vmatpush1.bf16.msra.mxu1 %v5676_v23  ;;  %v6352_v23 = vpack.c.bf16 %v62_v16, %v55_v14  ;;  %v5754_v14 = vld [vmem:[%s8568_s1 + $0x324] ss:$16 sps:$4 sm:$0xff]   ;;  %v5757_v16 = vld [vmem:[%s8568_s1 + $0x12c] ss:$16 sps:$4 sm:$0xff]  }
  0x24   :  { %1628 = vmatprep.subr.bf16.mxu0 %v5677_v24  ;;  %4986 = vmatprep.subr.bf16.mxu1 %v5677_v24  ;;  %v6354_v24 = vpack.c.bf16 %v174_v18, %v167_v17  ;;  %v5752_v17 = vld [vmem:[%s8568_s1 + $0x320] ss:$16 sps:$4 sm:$0xff]   ;;  %v5755_v18 = vld [vmem:[%s8568_s1 + $0x128] ss:$16 sps:$4 sm:$0xff]  }
  0x27   :  { %1629 = vmatpush1.bf16.msra.mxu0 %v5679_v25  ;;  %5002 = vmatpush1.bf16.msra.mxu1 %v5679_v25  ;;  %v77_v25 = vld [vmem:[%s8569_s0 + $0x190] sm:$0xff] }
  0x28   :  { %1630 = vmatprep.subr.bf16.mxu0 %v5680_v26  ;;  %4987 = vmatprep.subr.bf16.mxu1 %v5680_v26  ;;  %v182_v26 = vld [vmem:[%s8569_s0 + $0x4d8] sm:$0xff] }
  0x2b   :  { %1631 = vmatpush1.bf16.msra.mxu0 %v5682_v27  ;;  %5003 = vmatpush1.bf16.msra.mxu1 %v5682_v27  ;;  %v189_v27 = vld [vmem:[%s8569_s0 + $0x510] sm:$0xff] }
  0x2c   :  { %1632 = vmatprep.subr.bf16.mxu0 %v5683_v28  ;;  %4988 = vmatprep.subr.bf16.mxu1 %v5683_v28  ;;  %v5722_v28 = vld [vmem:[%s8568_s1 + $0x280] ss:$16 sps:$4 sm:$0xff]  }
  0x2f   :  { %1633 = vmatpush1.bf16.msra.mxu0 %v5685_v29  ;;  %5004 = vmatpush1.bf16.msra.mxu1 %v5685_v29  ;;  %v5725_v29 = vld [vmem:[%s8568_s1 + $0x88] ss:$16 sps:$4 sm:$0xff]  }
  0x30   :  { %1634 = vmatprep.subr.bf16.mxu0 %v5686_v30  ;;  %4989 = vmatprep.subr.bf16.mxu1 %v5686_v30  ;;  %v5730_v30 = vld [vmem:[%s8568_s1 + $0x2a4] ss:$16 sps:$4 sm:$0xff]  }
  0x33   :  { %1635 = vmatpush1.bf16.msra.mxu0 %v5688_v31  ;;  %5005 = vmatpush1.bf16.msra.mxu1 %v5688_v31  ;;  %v5733_v31 = vld [vmem:[%s8568_s1 + $0xac] ss:$16 sps:$4 sm:$0xff]  }
  0x34   :  { %1636 = vmatprep.subr.bf16.mxu0 %v5689_v32  ;;  %4990 = vmatprep.subr.bf16.mxu1 %v5689_v32  ;;  %v5728_v32 = vld [vmem:[%s8568_s1 + $0x2a0] ss:$16 sps:$4 sm:$0xff]  }
  0x37   :  { %1637 = vmatpush1.bf16.msra.mxu0 %v5691_v33  ;;  %5006 = vmatpush1.bf16.msra.mxu1 %v5691_v33  ;;  %v5731_v33 = vld [vmem:[%s8568_s1 + $0xa8] ss:$16 sps:$4 sm:$0xff]  }
  0x38   :  { %1638 = vmatprep.subr.bf16.mxu0 %v5692_v34  ;;  %4991 = vmatprep.subr.bf16.mxu1 %v5692_v34  ;;  %v6383_v34 = vpack.c.bf16 %v77_v25, %v70_v22  ;;  %v97_v22 = vld [vmem:[%s8569_s0 + $0x230] sm:$0xff]  ;;  %v104_v25 = vld [vmem:[%s8569_s0 + $0x268] sm:$0xff] }
  0x3b   :  { %1639 = vmatpush1.bf16.msra.mxu0 %v5694_v35  ;;  %5007 = vmatpush1.bf16.msra.mxu1 %v5694_v35  ;;  %v6385_v35 = vpack.c.bf16 %v189_v27, %v182_v26  ;;  %v209_v26 = vld [vmem:[%s8569_s0 + $0x5b0] sm:$0xff]  ;;  %v216_v27 = vld [vmem:[%s8569_s0 + $0x5e8] sm:$0xff] }
  0x3c   :  { %1640 = vmatprep.subr.bf16.mxu0 %v5695_v36  ;;  %4992 = vmatprep.subr.bf16.mxu1 %v5695_v36  ;;  %v69_v36 = vld [vmem:[%s8569_s0 + $0x150] sm:$0xff] }
  0x3f   :  { %1641 = vmatpush1.bf16.msra.mxu0 %v5697_v37  ;;  %5008 = vmatpush1.bf16.msra.mxu1 %v5697_v37  ;;  %v76_v37 = vld [vmem:[%s8569_s0 + $0x188] sm:$0xff] }
  0x40   :  { %1803 = vmatprep.subr.bf16.mxu0 %v5700_v42  ;;  %2382 = vmatprep.subr.bf16.mxu1 %v5703_v43  ;;  %v5734_v42 = vld [vmem:[%s8568_s1 + $0x2c0] ss:$16 sps:$4 sm:$0xff]   ;;  %v84_v43 = vld [vmem:[%s8569_s0 + $0x1c8] sm:$0xff]  ;;  %v6418_v47 = vpack.c.bf16 %v76_v37, %v69_v36  ;;  %v6540_v36 = vpack.c.bf16 %v216_v27, %v209_v26  ;;  %v5784_v26 = vld [vmem:[%s8568_s1 + $0x3c4] ss:$16 sps:$4 sm:$0xff]  }
  0x41   :  { %v6443_v58 = vpack.c.bf16 %v91_v44, %v84_v43  ;;  %v224_v37 = vld [vmem:[%s8569_s0 + $0x628] sm:$0xff] }
  0x42   :  { %1643 = vmatmul.mubr.bf16.vlgmr.msra.gmra.mrb[0].mxu0 %v6232_v45  ;;  %1723 = vmatmul.mubr.bf16.vlgmr.msra.gmra.mrb[0].mxu1 %v6234_v46  ;;  %v5767_v43 = vld [vmem:[%s8568_s1 + $0x168] ss:$16 sps:$4 sm:$0xff]   ;;  %v5787_v27 = vld [vmem:[%s8568_s1 + $0x1cc] ss:$16 sps:$4 sm:$0xff]  }
  0x43   :  { %1804 = vmatpush1.bf16.msra.mxu0 %v5698_v50  ;;  %2383 = vmatpush1.bf16.msra.mxu1 %v5701_v51  ;;  %v203_v50 = vld [vmem:[%s8569_s0 + $0x580] sm:$0xff]  ;;  %v5737_v51 = vld [vmem:[%s8568_s1 + $0xc8] ss:$16 sps:$4 sm:$0xff]  }
  0x44   :  { %1805 = vmatprep.subr.bf16.mxu0 %v5706_v52  ;;  %2384 = vmatprep.subr.bf16.mxu1 %v5709_v53  ;;  %v5742_v52 = vld [vmem:[%s8568_s1 + $0x2e4] ss:$16 sps:$4 sm:$0xff]   ;;  %v5745_v53 = vld [vmem:[%s8568_s1 + $0xec] ss:$16 sps:$4 sm:$0xff]   ;;  %v6445_v59 = vpack.c.bf16 %v203_v50, %v196_v49  ;;  %v6565_v49 = vpack.c.bf16 %v231_v38, %v224_v37  ;;  %v5785_v37 = vld [vmem:[%s8568_s1 + $0x1c8] ss:$16 sps:$4 sm:$0xff]  }
  0x45   :  { %1652 = vmatprep.mubr.bf16.mxu0 %v6263_v56  ;;  %1732 = vmatprep.mubr.bf16.mxu1 %v6265_v57  ;;  %v111_v50 = vld [vmem:[%s8569_s0 + $0x2a0] sm:$0xff] }
  0x46   :  { %v5790_v38 = vld [vmem:[%s8568_s1 + $0x3e4] ss:$16 sps:$4 sm:$0xff]  }
  0x47   :  { %1806 = vmatpush1.bf16.msra.mxu0 %v5704_v54  ;;  %2385 = vmatpush1.bf16.msra.mxu1 %v5707_v55  ;;  %v5740_v54 = vld [vmem:[%s8568_s1 + $0x2e0] ss:$16 sps:$4 sm:$0xff]   ;;  %v5743_v55 = vld [vmem:[%s8568_s1 + $0xe8] ss:$16 sps:$4 sm:$0xff]  }
  0x48   :  { %1807 = vmatprep.subr.bf16.mxu0 %v5712_v62  ;;  %2386 = vmatprep.subr.bf16.mxu1 %v5715_v63  ;;  %v195_v62 = vld [vmem:[%s8569_s0 + $0x540] sm:$0xff]  ;;  %v202_v63 = vld [vmem:[%s8569_s0 + $0x578] sm:$0xff] }
  0x4a   :  { %1653 = vmatmul.mubr.bf16.gmra.mrb[4].mxu0 %v6292_v1  ;;  %1733 = vmatmul.mubr.bf16.gmra.mrb[4].mxu1 %v6294_v2 }
  0x4b   :  { %1808 = vmatpush1.bf16.msra.mxu0 %v5710_v6  ;;  %2387 = vmatpush1.bf16.msra.mxu1 %v5713_v7  ;;  %v105_v6 = vld [vmem:[%s8569_s0 + $0x270] sm:$0xff]  ;;  %v6478_v7 = vpack.c.bf16 %v90_v61, %v83_v60  ;;  %v126_v61 = vld [vmem:[%s8569_s0 + $0x318] sm:$0xff] }
  0x4c   :  { %1809 = vmatprep.subr.bf16.mxu0 %v5718_v8  ;;  %2388 = vmatprep.subr.bf16.mxu1 %v5721_v9  ;;  %v6480_v8 = vpack.c.bf16 %v202_v63, %v195_v62  ;;  %v210_v9 = vld [vmem:[%s8569_s0 + $0x5b8] sm:$0xff]  ;;  %v5770_v60 = vld [vmem:[%s8568_s1 + $0x380] ss:$16 sps:$4 sm:$0xff]  }
  0x4d   :  { %1662 = vmatprep.mubr.bf16.mxu0 %v6323_v12  ;;  %1742 = vmatprep.mubr.bf16.mxu1 %v6325_v13  ;;  %v133_v62 = vld [vmem:[%s8569_s0 + $0x350] sm:$0xff] }
  0x4f   :  { %1810 = vmatpush1.bf16.msra.mxu0 %v5716_v10  ;;  %2389 = vmatpush1.bf16.msra.mxu1 %v5719_v11  ;;  %v217_v10 = vld [vmem:[%s8569_s0 + $0x5f0] sm:$0xff]  ;;  %v5749_v11 = vld [vmem:[%s8568_s1 + $0x108] ss:$16 sps:$4 sm:$0xff]  }
  0x50   :  { %1811 = vmatprep.subr.bf16.mxu0 %v5724_v20  ;;  %2390 = vmatprep.subr.bf16.mxu1 %v5727_v21  ;;  %v6503_v20 = vpack.c.bf16 %v105_v6, %v98_v5  ;;  %v6505_v21 = vpack.c.bf16 %v217_v10, %v210_v9  ;;  %v5773_v5 = vld [vmem:[%s8568_s1 + $0x188] ss:$16 sps:$4 sm:$0xff]   ;;  %v5778_v6 = vld [vmem:[%s8568_s1 + $0x3a4] ss:$16 sps:$4 sm:$0xff]   ;;  %v5781_v9 = vld [vmem:[%s8568_s1 + $0x1ac] ss:$16 sps:$4 sm:$0xff]  }
  0x51   :  { %v5776_v10 = vld [vmem:[%s8568_s1 + $0x3a0] ss:$16 sps:$4 sm:$0xff]  }
  0x52   :  { %1663 = vmatmul.mubr.bf16.gmra.mrb[8].mxu0 %v6352_v23  ;;  %1743 = vmatmul.mubr.bf16.gmra.mrb[8].mxu1 %v6354_v24 }
  0x53   :  { %1812 = vmatpush1.bf16.msra.mxu0 %v5722_v28  ;;  %2391 = vmatpush1.bf16.msra.mxu1 %v5725_v29  ;;  %v5760_v28 = vld [vmem:[%s8568_s1 + $0x344] ss:$16 sps:$4 sm:$0xff]   ;;  %v5763_v29 = vld [vmem:[%s8568_s1 + $0x14c] ss:$16 sps:$4 sm:$0xff]  }
  0x54   :  { %1813 = vmatprep.subr.bf16.mxu0 %v5730_v30  ;;  %2392 = vmatprep.subr.bf16.mxu1 %v5733_v31  ;;  %v5758_v30 = vld [vmem:[%s8568_s1 + $0x340] ss:$16 sps:$4 sm:$0xff]   ;;  %v112_v31 = vld [vmem:[%s8569_s0 + $0x2a8] sm:$0xff] }
  0x55   :  { %1672 = vmatprep.mubr.bf16.mxu0 %v6383_v34  ;;  %1752 = vmatprep.mubr.bf16.mxu1 %v6385_v35 }
  0x57   :  { %1814 = vmatpush1.bf16.msra.mxu0 %v5728_v32  ;;  %2393 = vmatpush1.bf16.msra.mxu1 %v5731_v33  ;;  %v119_v32 = vld [vmem:[%s8569_s0 + $0x2e0] sm:$0xff]  ;;  %v6538_v33 = vpack.c.bf16 %v104_v25, %v97_v22  ;;  %v237_v22 = vld [vmem:[%s8569_s0 + $0x690] sm:$0xff]  ;;  %v244_v25 = vld [vmem:[%s8569_s0 + $0x6c8] sm:$0xff] }
  0x58   :  { %1815 = vmatprep.subr.bf16.mxu0 %v5736_v40  ;;  %2394 = vmatprep.subr.bf16.mxu1 %v5739_v41  ;;  %v5766_v40 = vld [vmem:[%s8568_s1 + $0x364] ss:$16 sps:$4 sm:$0xff]   ;;  %v5769_v41 = vld [vmem:[%s8568_s1 + $0x16c] ss:$16 sps:$4 sm:$0xff]   ;;  %v6563_v44 = vpack.c.bf16 %v119_v32, %v112_v31 }
  0x59   :  { %v30_v31 = vld [vmem:[%s8569_s0 + $0x18] sm:$0xff]  ;;  %v37_v32 = vld [vmem:[%s8569_s0 + $0x50] sm:$0xff] }
  0x5a   :  { %1673 = vmatmul.mubr.bf16.gmra.mrb[12].mxu0 %v6418_v47  ;;  %1753 = vmatmul.mubr.bf16.gmra.mrb[12].mxu1 %v6420_v48 }
  0x5b   :  { %1816 = vmatpush1.bf16.msra.mxu0 %v5734_v42  ;;  %2395 = vmatpush1.bf16.msra.mxu1 %v5737_v51  ;;  %v5764_v42 = vld [vmem:[%s8568_s1 + $0x360] ss:$16 sps:$4 sm:$0xff]   ;;  %v118_v51 = vld [vmem:[%s8569_s0 + $0x2d8] sm:$0xff] }
  0x5c   :  { %1817 = vmatprep.subr.bf16.mxu0 %v5742_v52  ;;  %2396 = vmatprep.subr.bf16.mxu1 %v5745_v53  ;;  %v223_v52 = vld [vmem:[%s8569_s0 + $0x620] sm:$0xff]  ;;  %v230_v53 = vld [vmem:[%s8569_s0 + $0x658] sm:$0xff]  ;;  %v6598_v63 = vpack.c.bf16 %v118_v51, %v111_v50  ;;  %v36_v50 = vld [vmem:[%s8569_s0 + $0x48] sm:$0xff] }
  0x5d   :  { %1682 = vmatprep.mubr.bf16.mxu0 %v6443_v58  ;;  %1762 = vmatprep.mubr.bf16.mxu1 %v6445_v59  ;;  %v5796_v51 = vld [vmem:[%s8568_s1 + $0x404] ss:$16 sps:$4 sm:$0xff]  }
  0x5f   :  { %1818 = vmatpush1.bf16.msra.mxu0 %v5740_v54  ;;  %2397 = vmatpush1.bf16.msra.mxu1 %v5743_v55  ;;  %v5772_v54 = vld [vmem:[%s8568_s1 + $0x384] ss:$16 sps:$4 sm:$0xff]   ;;  %v5775_v55 = vld [vmem:[%s8568_s1 + $0x18c] ss:$16 sps:$4 sm:$0xff]  }
  0x60   :  { %1819 = vmatprep.subr.bf16.mxu0 %v5748_v0  ;;  %2398 = vmatprep.subr.bf16.mxu1 %v5751_v3  ;;  %v6600_v0 = vpack.c.bf16 %v230_v53, %v223_v52  ;;  %v238_v3 = vld [vmem:[%s8569_s0 + $0x698] sm:$0xff]  ;;  %v44_v53 = vld [vmem:[%s8569_s0 + $0x88] sm:$0xff] }
  0x61   :  { %v5799_v52 = vld [vmem:[%s8568_s1 + $0x20c] ss:$16 sps:$4 sm:$0xff]  }
  0x62   :  { %1683 = vmatmul.mubr.bf16.gmra.mrb[16].mxu0 %v6478_v7  ;;  %1763 = vmatmul.mubr.bf16.gmra.mrb[16].mxu1 %v6480_v8 }
  0x63   :  { %1820 = vmatpush1.bf16.msra.mxu0 %v5746_v4  ;;  %2399 = vmatpush1.bf16.msra.mxu1 %v5749_v11  ;;  %v245_v4 = vld [vmem:[%s8569_s0 + $0x6d0] sm:$0xff]  ;;  %v5779_v11 = vld [vmem:[%s8568_s1 + $0x1a8] ss:$16 sps:$4 sm:$0xff]  }
  0x64   :  { %1821 = vmatprep.subr.bf16.mxu0 %v5754_v14  ;;  %2400 = vmatprep.subr.bf16.mxu1 %v5757_v16  ;;  %v6623_v14 = vpack.c.bf16 %v133_v62, %v126_v61  ;;  %v6625_v16 = vpack.c.bf16 %v245_v4, %v238_v3  ;;  %v43_v62 = vld [vmem:[%s8569_s0 + $0x80] sm:$0xff]  ;;  %v50_v3 = vld [vmem:[%s8569_s0 + $0xb8] sm:$0xff] }
  0x65   :  { %1692 = vmatprep.mubr.bf16.mxu0 %v6503_v20  ;;  %1772 = vmatprep.mubr.bf16.mxu1 %v6505_v21  ;;  %v5800_v4 = vld [vmem:[%s8568_s1 + $0x420] ss:$16 sps:$4 sm:$0xff]  }
  0x67   :  { %1822 = vmatpush1.bf16.msra.mxu0 %v5752_v17  ;;  %2401 = vmatpush1.bf16.msra.mxu1 %v5755_v18  ;;  %v125_v17 = vld [vmem:[%s8569_s0 + $0x310] sm:$0xff]  ;;  %v132_v18 = vld [vmem:[%s8569_s0 + $0x348] sm:$0xff] }
  0x68   :  { %1823 = vmatprep.subr.bf16.mxu0 %v5760_v28  ;;  %2402 = vmatprep.subr.bf16.mxu1 %v5763_v29  ;;  %v5782_v28 = vld [vmem:[%s8568_s1 + $0x3c0] ss:$16 sps:$4 sm:$0xff]   ;;  %v6652_v29 = vpack.c.bf16 %v132_v18, %v125_v17  ;;  %v5808_v17 = vld [vmem:[%s8568_s1 + $0x444] ss:$16 sps:$4 sm:$0xff]   ;;  %v6745_v18 = vpack.c.bf16 %v50_v3, %v43_v62  ;;  %v5827_v62 = vld [vmem:[%s8568_s1 + $0x2a8] ss:$16 sps:$4 sm:$0xff]  }
  0x69   :  { %v5835_v3 = vld [vmem:[%s8568_s1 + $0x2cc] ss:$16 sps:$4 sm:$0xff]  }
  0x6a   :  { %1693 = vmatmul.mubr.bf16.gmra.mrb[20].mxu0 %v6538_v33  ;;  %1773 = vmatmul.mubr.bf16.gmra.mrb[20].mxu1 %v6540_v36 }
  0x6b   :  { %1824 = vmatpush1.bf16.msra.mxu0 %v5758_v30  ;;  %2403 = vmatpush1.bf16.msra.mxu1 %v5761_v39  ;;  %v6654_v30 = vpack.c.bf16 %v244_v25, %v237_v22  ;;  %v5793_v39 = vld [vmem:[%s8568_s1 + $0x1ec] ss:$16 sps:$4 sm:$0xff]   ;;  %v5806_v25 = vld [vmem:[%s8568_s1 + $0x440] ss:$16 sps:$4 sm:$0xff]  }
  0x6c   :  { %1825 = vmatprep.subr.bf16.mxu0 %v5766_v40  ;;  %2404 = vmatprep.subr.bf16.mxu1 %v5769_v41  ;;  %v5788_v40 = vld [vmem:[%s8568_s1 + $0x3e0] ss:$16 sps:$4 sm:$0xff]   ;;  %v6674_v41 = vpack.c.bf16 %v37_v32, %v30_v31  ;;  %v64_v31 = vld [vmem:[%s8569_s0 + $0x128] sm:$0xff] }
  0x6d   :  { %1702 = vmatprep.mubr.bf16.mxu0 %v6563_v44  ;;  %1782 = vmatprep.mubr.bf16.mxu1 %v6565_v49  ;;  %v72_v32 = vld [vmem:[%s8569_s0 + $0x168] sm:$0xff] }
  0x6f   :  { %1826 = vmatpush1.bf16.msra.mxu0 %v5764_v42  ;;  %2405 = vmatpush1.bf16.msra.mxu1 %v5767_v43  ;;  %v5791_v42 = vld [vmem:[%s8568_s1 + $0x1e8] ss:$16 sps:$4 sm:$0xff]   ;;  %v29_v43 = vld [vmem:[%s8569_s0 + $0x10] sm:$0xff] }
  0x70   :  { %1827 = vmatprep.subr.bf16.mxu0 %v5772_v54  ;;  %2406 = vmatprep.subr.bf16.mxu1 %v5775_v55  ;;  %v51_v54 = vld [vmem:[%s8569_s0 + $0xc0] sm:$0xff]  ;;  %v6701_v55 = vpack.c.bf16 %v36_v50, %v29_v43  ;;  %v5821_v50 = vld [vmem:[%s8568_s1 + $0x288] ss:$16 sps:$4 sm:$0xff]  }
  0x71   :  { %v6709_v61 = vpack.c.bf16 %v51_v54, %v44_v53  ;;  %v5818_v43 = vld [vmem:[%s8568_s1 + $0x480] ss:$16 sps:$4 sm:$0xff]   ;;  %v5829_v53 = vld [vmem:[%s8568_s1 + $0x2ac] ss:$16 sps:$4 sm:$0xff]  }
  0x72   :  { %1703 = vmatmul.mubr.bf16.gmra.mrb[24].mxu0 %v6598_v63  ;;  %1783 = vmatmul.mubr.bf16.gmra.mrb[24].mxu1 %v6600_v0  ;;  %v78_v54 = vld [vmem:[%s8569_s0 + $0x198] sm:$0xff] }
  0x73   :  { %1828 = vmatpush1.bf16.msra.mxu0 %v5770_v60  ;;  %2407 = vmatpush1.bf16.msra.mxu1 %v5773_v5  ;;  %v5794_v60 = vld [vmem:[%s8568_s1 + $0x400] ss:$16 sps:$4 sm:$0xff]   ;;  %v5802_v5 = vld [vmem:[%s8568_s1 + $0x424] ss:$16 sps:$4 sm:$0xff]  }
  0x74   :  { %1829 = vmatprep.subr.bf16.mxu0 %v5778_v6  ;;  %2408 = vmatprep.subr.bf16.mxu1 %v5781_v9  ;;  %v5805_v6 = vld [vmem:[%s8568_s1 + $0x22c] ss:$16 sps:$4 sm:$0xff]   ;;  %v5803_v9 = vld [vmem:[%s8568_s1 + $0x228] ss:$16 sps:$4 sm:$0xff]  }
  0x75   :  { %1712 = vmatprep.mubr.bf16.mxu0 %v6623_v14  ;;  %1792 = vmatprep.mubr.bf16.mxu1 %v6625_v16 }
  0x77   :  { %1830 = vmatpush1.bf16.msra.mxu0 %v5776_v10  ;;  %2409 = vmatpush1.bf16.msra.mxu1 %v5779_v11  ;;  %v58_v10 = vld [vmem:[%s8569_s0 + $0xf8] sm:$0xff]  ;;  %v65_v11 = vld [vmem:[%s8569_s0 + $0x130] sm:$0xff] }
  0x78   :  { %1831 = vmatprep.subr.bf16.mxu0 %v5784_v26  ;;  %2410 = vmatprep.subr.bf16.mxu1 %v5787_v27  ;;  %v6747_v22 = vpack.c.bf16 %v65_v11, %v58_v10  ;;  %v57_v26 = vld [vmem:[%s8569_s0 + $0xf0] sm:$0xff]  ;;  %v5841_v11 = vld [vmem:[%s8568_s1 + $0x2ec] ss:$16 sps:$4 sm:$0xff]  }
  0x79   :  { %v5814_v27 = vld [vmem:[%s8568_s1 + $0x464] ss:$16 sps:$4 sm:$0xff]  }
  0x7a   :  { %1713 = vmatmul.mubr.bf16.gmra.mrb[28].mxu0 %v6652_v29  ;;  %1793 = vmatmul.mubr.bf16.gmra.mrb[28].mxu1 %v6654_v30  ;;  %v5838_v10 = vld [vmem:[%s8568_s1 + $0x4e4] ss:$16 sps:$4 sm:$0xff]  }
  0x7b   :  { %1832 = vmatpush1.bf16.msra.mxu0 %v5782_v28  ;;  %2411 = vmatpush1.bf16.msra.mxu1 %v5785_v37  ;;  %v5817_v28 = vld [vmem:[%s8568_s1 + $0x26c] ss:$16 sps:$4 sm:$0xff]   ;;  %v79_v37 = vld [vmem:[%s8569_s0 + $0x1a0] sm:$0xff] }
  0x7c   :  { %1833 = vmatprep.subr.bf16.mxu0 %v5790_v38  ;;  %2412 = vmatprep.subr.bf16.mxu1 %v5793_v39  ;;  %v5815_v38 = vld [vmem:[%s8568_s1 + $0x268] ss:$16 sps:$4 sm:$0xff]   ;;  %v5823_v39 = vld [vmem:[%s8568_s1 + $0x28c] ss:$16 sps:$4 sm:$0xff]  }
  0x7d   :  { %1835 = vmatprep.mubr.bf16.mxu0 %v6674_v41  ;;  %2414 = vmatprep.mubr.bf16.mxu1 %v6142_v15  ;;  %v5797_v15 = vld [vmem:[%s8568_s1 + $0x208] ss:$16 sps:$4 sm:$0xff]  }
  0x7f   :  { %1834 = vmatpush1.bf16.msra.mxu0 %v5788_v40  ;;  %2413 = vmatpush1.bf16.msra.mxu1 %v5791_v42  ;;  %v6789_v40 = vpack.c.bf16 %v64_v31, %v57_v26  ;;  %v6791_v42 = vpack.c.bf16 %v79_v37, %v72_v32  ;;  %v5839_v26 = vld [vmem:[%s8568_s1 + $0x2e8] ss:$16 sps:$4 sm:$0xff]   ;;  %v5842_v32 = vld [vmem:[%s8568_s1 + $0x500] ss:$16 sps:$4 sm:$0xff]  }
  0x80   :  { %1996 = vmatprep.subr.bf16.mxu0 %v5796_v51  ;;  %2575 = vmatprep.subr.bf16.mxu1 %v5799_v52  ;;  %v71_v51 = vld [vmem:[%s8569_s0 + $0x160] sm:$0xff]  ;;  %v5845_v37 = vld [vmem:[%s8568_s1 + $0x308] ss:$16 sps:$4 sm:$0xff]  }
  0x81   :  { %v5826_v52 = vld [vmem:[%s8568_s1 + $0x4a4] ss:$16 sps:$4 sm:$0xff]  }
  0x82   :  { %1836 = vmatmul.mubr.bf16.vlgmr.msra.gmra.mrb[0].mxu0 %v6701_v55  ;;  %2415 = vmatmul.mubr.bf16.vlgmr.msra.gmra.mrb[32].mxu1 %v6232_v45  ;;  %v5811_v45 = vld [vmem:[%s8568_s1 + $0x24c] ss:$16 sps:$4 sm:$0xff]  }
  0x83   :  { %1997 = vmatpush1.bf16.msra.mxu0 %v5794_v60  ;;  %2576 = vmatpush1.bf16.msra.mxu1 %v5797_v15  ;;  %v86_v60 = vld [vmem:[%s8569_s0 + $0x1d8] sm:$0xff]  ;;  %v93_v15 = vld [vmem:[%s8569_s0 + $0x210] sm:$0xff] }
  0x84   :  { %1845 = vmatprep.mubr.bf16.mxu0 %v6709_v61  ;;  %2424 = vmatprep.mubr.bf16.mxu1 %v6263_v56  ;;  %v5809_v56 = vld [vmem:[%s8568_s1 + $0x248] ss:$16 sps:$4 sm:$0xff]  }
  0x85   :  { %1998 = vmatprep.subr.bf16.mxu0 %v5802_v5  ;;  %2577 = vmatprep.subr.bf16.mxu1 %v5805_v6  ;;  %v6835_v5 = vpack.c.bf16 %v93_v15, %v86_v60  ;;  %v5830_v6 = vld [vmem:[%s8568_s1 + $0x4c0] ss:$16 sps:$4 sm:$0xff]  }
  0x86   :  { %v5854_v60 = vld [vmem:[%s8568_s1 + $0x540] ss:$16 sps:$4 sm:$0xff]  }
  0x87   :  { %1999 = vmatpush1.bf16.msra.mxu0 %v5800_v4  ;;  %2578 = vmatpush1.bf16.msra.mxu1 %v5803_v9  ;;  %v6833_v4 = vpack.c.bf16 %v78_v54, %v71_v51  ;;  %v5833_v9 = vld [vmem:[%s8568_s1 + $0x2c8] ss:$16 sps:$4 sm:$0xff]   ;;  %v5848_v51 = vld [vmem:[%s8568_s1 + $0x520] ss:$16 sps:$4 sm:$0xff]  }
  0x88   :  { %2000 = vmatprep.subr.bf16.mxu0 %v5808_v17  ;;  %2579 = vmatprep.subr.bf16.mxu1 %v5811_v45  ;;  %v85_v17 = vld [vmem:[%s8569_s0 + $0x1d0] sm:$0xff]  ;;  %v92_v45 = vld [vmem:[%s8569_s0 + $0x208] sm:$0xff] }
  0x8a   :  { %1846 = vmatmul.mubr.bf16.gmra.mrb[4].mxu0 %v6745_v18  ;;  %2425 = vmatmul.mubr.bf16.gmra.mrb[36].mxu1 %v6292_v1  ;;  %v5812_v1 = vld [vmem:[%s8568_s1 + $0x460] ss:$16 sps:$4 sm:$0xff]  }
  0x8b   :  { %1855 = vmatprep.mubr.bf16.mxu0 %v6747_v22  ;;  %2434 = vmatprep.mubr.bf16.mxu1 %v6323_v12  ;;  %v5820_v12 = vld [vmem:[%s8568_s1 + $0x484] ss:$16 sps:$4 sm:$0xff]  }
  0x8c   :  { %2001 = vmatpush1.bf16.msra.mxu0 %v5806_v25  ;;  %2580 = vmatpush1.bf16.msra.mxu1 %v5809_v56  ;;  %v100_v25 = vld [vmem:[%s8569_s0 + $0x248] sm:$0xff]  ;;  %v5836_v56 = vld [vmem:[%s8568_s1 + $0x4e0] ss:$16 sps:$4 sm:$0xff]  }
  0x8d   :  { %2002 = vmatprep.subr.bf16.mxu0 %v5814_v27  ;;  %2581 = vmatprep.subr.bf16.mxu1 %v5817_v28  ;;  %v5847_v27 = vld [vmem:[%s8568_s1 + $0x30c] ss:$16 sps:$4 sm:$0xff]   ;;  %v6877_v28 = vpack.c.bf16 %v92_v45, %v85_v17 }
  0x8e   :  { %v5871_v17 = vld [vmem:[%s8568_s1 + $0x38c] ss:$16 sps:$4 sm:$0xff]  }
  0x90   :  { %2003 = vmatpush1.bf16.msra.mxu0 %v5812_v1  ;;  %2582 = vmatpush1.bf16.msra.mxu1 %v5815_v38  ;;  %v99_v1 = vld [vmem:[%s8569_s0 + $0x240] sm:$0xff]  ;;  %v106_v38 = vld [vmem:[%s8569_s0 + $0x278] sm:$0xff] }
  0x91   :  { %2004 = vmatprep.subr.bf16.mxu0 %v5820_v12  ;;  %2583 = vmatprep.subr.bf16.mxu1 %v5823_v39  ;;  %v5850_v12 = vld [vmem:[%s8568_s1 + $0x524] ss:$16 sps:$4 sm:$0xff]   ;;  %v5853_v39 = vld [vmem:[%s8568_s1 + $0x32c] ss:$16 sps:$4 sm:$0xff]   ;;  %v6921_v54 = vpack.c.bf16 %v106_v38, %v99_v1 }
  0x92   :  { %1856 = vmatmul.mubr.bf16.gmra.mrb[8].mxu0 %v6789_v40  ;;  %2435 = vmatmul.mubr.bf16.gmra.mrb[40].mxu1 %v6352_v23  ;;  %v5824_v23 = vld [vmem:[%s8568_s1 + $0x4a0] ss:$16 sps:$4 sm:$0xff]   ;;  %v5880_v1 = vld [vmem:[%s8568_s1 + $0x5c4] ss:$16 sps:$4 sm:$0xff]   ;;  %v5883_v38 = vld [vmem:[%s8568_s1 + $0x3cc] ss:$16 sps:$4 sm:$0xff]  }
  0x93   :  { %1865 = vmatprep.mubr.bf16.mxu0 %v6791_v42  ;;  %2444 = vmatprep.mubr.bf16.mxu1 %v6383_v34  ;;  %v5832_v34 = vld [vmem:[%s8568_s1 + $0x4c4] ss:$16 sps:$4 sm:$0xff]  }
  0x94   :  { %2005 = vmatpush1.bf16.msra.mxu0 %v5818_v43  ;;  %2584 = vmatpush1.bf16.msra.mxu1 %v5821_v50  ;;  %v114_v43 = vld [vmem:[%s8569_s0 + $0x2b8] sm:$0xff]  ;;  %v121_v50 = vld [vmem:[%s8569_s0 + $0x2f0] sm:$0xff] }
  0x95   :  { %2006 = vmatprep.subr.bf16.mxu0 %v5826_v52  ;;  %2585 = vmatprep.subr.bf16.mxu1 %v5829_v53  ;;  %v5851_v52 = vld [vmem:[%s8568_s1 + $0x328] ss:$16 sps:$4 sm:$0xff]   ;;  %v5859_v53 = vld [vmem:[%s8568_s1 + $0x34c] ss:$16 sps:$4 sm:$0xff]   ;;  %v6929_v15 = vpack.c.bf16 %v121_v50, %v114_v43  ;;  %v5878_v43 = vld [vmem:[%s8568_s1 + $0x5c0] ss:$16 sps:$4 sm:$0xff]  }
  0x96   :  { %v5881_v50 = vld [vmem:[%s8568_s1 + $0x3c8] ss:$16 sps:$4 sm:$0xff]  }
  0x98   :  { %2007 = vmatpush1.bf16.msra.mxu0 %v5824_v23  ;;  %2586 = vmatpush1.bf16.msra.mxu1 %v5827_v62  ;;  %v5862_v23 = vld [vmem:[%s8568_s1 + $0x564] ss:$16 sps:$4 sm:$0xff]   ;;  %v5865_v62 = vld [vmem:[%s8568_s1 + $0x36c] ss:$16 sps:$4 sm:$0xff]  }
  0x99   :  { %2008 = vmatprep.subr.bf16.mxu0 %v5832_v34  ;;  %2587 = vmatprep.subr.bf16.mxu1 %v5835_v3  ;;  %v113_v34 = vld [vmem:[%s8569_s0 + $0x2b0] sm:$0xff]  ;;  %v120_v3 = vld [vmem:[%s8569_s0 + $0x2e8] sm:$0xff] }
  0x9a   :  { %1866 = vmatmul.mubr.bf16.gmra.mrb[12].mxu0 %v6833_v4  ;;  %2445 = vmatmul.mubr.bf16.gmra.mrb[44].mxu1 %v6418_v47  ;;  %v107_v47 = vld [vmem:[%s8569_s0 + $0x280] sm:$0xff]  ;;  %v6965_v45 = vpack.c.bf16 %v120_v3, %v113_v34 }
  0x9b   :  { %1875 = vmatprep.mubr.bf16.mxu0 %v6835_v5  ;;  %2454 = vmatprep.mubr.bf16.mxu1 %v6443_v58  ;;  %v5844_v58 = vld [vmem:[%s8568_s1 + $0x504] ss:$16 sps:$4 sm:$0xff]   ;;  %v6879_v31 = vpack.c.bf16 %v107_v47, %v100_v25  ;;  %v5869_v47 = vld [vmem:[%s8568_s1 + $0x388] ss:$16 sps:$4 sm:$0xff]  }
  0x9c   :  { %2009 = vmatpush1.bf16.msra.mxu0 %v5830_v6  ;;  %2588 = vmatpush1.bf16.msra.mxu1 %v5833_v9  ;;  %v128_v6 = vld [vmem:[%s8569_s0 + $0x328] sm:$0xff]  ;;  %v135_v9 = vld [vmem:[%s8569_s0 + $0x360] sm:$0xff] }
  0x9d   :  { %2010 = vmatprep.subr.bf16.mxu0 %v5838_v10  ;;  %2589 = vmatprep.subr.bf16.mxu1 %v5841_v11  ;;  %v5860_v10 = vld [vmem:[%s8568_s1 + $0x560] ss:$16 sps:$4 sm:$0xff]   ;;  %v5863_v11 = vld [vmem:[%s8568_s1 + $0x368] ss:$16 sps:$4 sm:$0xff]   ;;  %v6967_v25 = vpack.c.bf16 %v135_v9, %v128_v6 }
  0x9e   :  { %v155_v6 = vld [vmem:[%s8569_s0 + $0x400] sm:$0xff]  ;;  %v162_v9 = vld [vmem:[%s8569_s0 + $0x438] sm:$0xff] }
  0xa0   :  { %2011 = vmatpush1.bf16.msra.mxu0 %v5836_v56  ;;  %2590 = vmatpush1.bf16.msra.mxu1 %v5839_v26  ;;  %v5874_v56 = vld [vmem:[%s8568_s1 + $0x5a4] ss:$16 sps:$4 sm:$0xff]   ;;  %v5877_v26 = vld [vmem:[%s8568_s1 + $0x3ac] ss:$16 sps:$4 sm:$0xff]  }
  0xa1   :  { %2012 = vmatprep.subr.bf16.mxu0 %v5844_v58  ;;  %2591 = vmatprep.subr.bf16.mxu1 %v5847_v27  ;;  %v127_v58 = vld [vmem:[%s8569_s0 + $0x320] sm:$0xff]  ;;  %v134_v27 = vld [vmem:[%s8569_s0 + $0x358] sm:$0xff] }
  0xa2   :  { %1876 = vmatmul.mubr.bf16.gmra.mrb[16].mxu0 %v6877_v28  ;;  %2455 = vmatmul.mubr.bf16.gmra.mrb[48].mxu1 %v6478_v7  ;;  %v5856_v7 = vld [vmem:[%s8568_s1 + $0x544] ss:$16 sps:$4 sm:$0xff]  }
  0xa3   :  { %1885 = vmatprep.mubr.bf16.mxu0 %v6879_v31  ;;  %2464 = vmatprep.mubr.bf16.mxu1 %v6503_v20  ;;  %v5857_v20 = vld [vmem:[%s8568_s1 + $0x348] ss:$16 sps:$4 sm:$0xff]  }
  0xa4   :  { %2013 = vmatpush1.bf16.msra.mxu0 %v5842_v32  ;;  %2592 = vmatpush1.bf16.msra.mxu1 %v5845_v37  ;;  %v142_v32 = vld [vmem:[%s8569_s0 + $0x398] sm:$0xff] }
  0xa5   :  { %2014 = vmatprep.subr.bf16.mxu0 %v5850_v12  ;;  %2593 = vmatprep.subr.bf16.mxu1 %v5853_v39  ;;  %v5875_v37 = vld [vmem:[%s8568_s1 + $0x3a8] ss:$16 sps:$4 sm:$0xff]   ;;  %v7009_v12 = vpack.c.bf16 %v134_v27, %v127_v58 }
  0xa6   :  { %v198_v58 = vld [vmem:[%s8569_s0 + $0x558] sm:$0xff] }
  0xa8   :  { %2015 = vmatpush1.bf16.msra.mxu0 %v5848_v51  ;;  %2594 = vmatpush1.bf16.msra.mxu1 %v5851_v52  ;;  %v5886_v51 = vld [vmem:[%s8568_s1 + $0x5e4] ss:$16 sps:$4 sm:$0xff]   ;;  %v5889_v52 = vld [vmem:[%s8568_s1 + $0x3ec] ss:$16 sps:$4 sm:$0xff]  }
  0xa9   :  { %2016 = vmatprep.subr.bf16.mxu0 %v5856_v7  ;;  %2595 = vmatprep.subr.bf16.mxu1 %v5859_v53  ;;  %v141_v7 = vld [vmem:[%s8569_s0 + $0x390] sm:$0xff]  ;;  %v148_v53 = vld [vmem:[%s8569_s0 + $0x3c8] sm:$0xff] }
  0xaa   :  { %1886 = vmatmul.mubr.bf16.gmra.mrb[20].mxu0 %v6921_v54  ;;  %2465 = vmatmul.mubr.bf16.gmra.mrb[52].mxu1 %v6538_v33  ;;  %v5868_v33 = vld [vmem:[%s8568_s1 + $0x584] ss:$16 sps:$4 sm:$0xff]   ;;  %v7053_v34 = vpack.c.bf16 %v148_v53, %v141_v7  ;;  %v240_v7 = vld [vmem:[%s8569_s0 + $0x6a8] sm:$0xff] }
  0xab   :  { %1895 = vmatprep.mubr.bf16.mxu0 %v6929_v15  ;;  %2474 = vmatprep.mubr.bf16.mxu1 %v6563_v44  ;;  %v5866_v44 = vld [vmem:[%s8568_s1 + $0x580] ss:$16 sps:$4 sm:$0xff]  }
  0xac   :  { %2017 = vmatpush1.bf16.msra.mxu0 %v5854_v60  ;;  %2596 = vmatpush1.bf16.msra.mxu1 %v5857_v20  ;;  %v156_v60 = vld [vmem:[%s8569_s0 + $0x408] sm:$0xff] }
  0xad   :  { %2018 = vmatprep.subr.bf16.mxu0 %v5862_v23  ;;  %2597 = vmatprep.subr.bf16.mxu1 %v5865_v62  ;;  %v5887_v20 = vld [vmem:[%s8568_s1 + $0x3e8] ss:$16 sps:$4 sm:$0xff]   ;;  %v5892_v23 = vld [vmem:[%s8568_s1 + $0x604] ss:$16 sps:$4 sm:$0xff]   ;;  %v5895_v62 = vld [vmem:[%s8568_s1 + $0x40c] ss:$16 sps:$4 sm:$0xff]  }
  0xb0   :  { %2019 = vmatpush1.bf16.msra.mxu0 %v5860_v10  ;;  %2598 = vmatpush1.bf16.msra.mxu1 %v5863_v11  ;;  %v170_v10 = vld [vmem:[%s8569_s0 + $0x478] sm:$0xff]  ;;  %v7073_v11 = vpack.c.bf16 %v162_v9, %v155_v6 }
  0xb1   :  { %2020 = vmatprep.subr.bf16.mxu0 %v5868_v33  ;;  %2599 = vmatprep.subr.bf16.mxu1 %v5871_v17  ;;  %v176_v17 = vld [vmem:[%s8569_s0 + $0x4a8] sm:$0xff]  ;;  %v46_v6 = vld [vmem:[%s8569_s0 + $0x98] sm:$0xff] }
  0xb2   :  { %1896 = vmatmul.mubr.bf16.gmra.mrb[24].mxu0 %v6965_v45  ;;  %2475 = vmatmul.mubr.bf16.gmra.mrb[56].mxu1 %v6598_v63  ;;  %v149_v63 = vld [vmem:[%s8569_s0 + $0x3d0] sm:$0xff] }
  0xb3   :  { %1905 = vmatprep.mubr.bf16.mxu0 %v6967_v25  ;;  %2484 = vmatprep.mubr.bf16.mxu1 %v6623_v14  ;;  %v5872_v14 = vld [vmem:[%s8568_s1 + $0x5a0] ss:$16 sps:$4 sm:$0xff]   ;;  %v7011_v39 = vpack.c.bf16 %v149_v63, %v142_v32  ;;  %v204_v63 = vld [vmem:[%s8569_s0 + $0x588] sm:$0xff] }
  0xb4   :  { %2021 = vmatpush1.bf16.msra.mxu0 %v5866_v44  ;;  %2600 = vmatpush1.bf16.msra.mxu1 %v5869_v47  ;;  %v184_v44 = vld [vmem:[%s8569_s0 + $0x4e8] sm:$0xff] }
  0xb5   :  { %2022 = vmatprep.subr.bf16.mxu0 %v5874_v56  ;;  %2601 = vmatprep.subr.bf16.mxu1 %v5877_v26  ;;  %v190_v26 = vld [vmem:[%s8569_s0 + $0x518] sm:$0xff] }
  0xb8   :  { %2023 = vmatpush1.bf16.msra.mxu0 %v5872_v14  ;;  %2602 = vmatpush1.bf16.msra.mxu1 %v5875_v37  ;;  %v212_v14 = vld [vmem:[%s8569_s0 + $0x5c8] sm:$0xff] }
  0xb9   :  { %2024 = vmatprep.subr.bf16.mxu0 %v5880_v1  ;;  %2603 = vmatprep.subr.bf16.mxu1 %v5883_v38  ;;  %v218_v38 = vld [vmem:[%s8569_s0 + $0x5f8] sm:$0xff] }
  0xba   :  { %1906 = vmatmul.mubr.bf16.gmra.mrb[28].mxu0 %v7009_v12  ;;  %2485 = vmatmul.mubr.bf16.gmra.mrb[60].mxu1 %v6652_v29  ;;  %v163_v29 = vld [vmem:[%s8569_s0 + $0x440] sm:$0xff] }
  0xbb   :  { %1915 = vmatprep.mubr.bf16.mxu0 %v7011_v39  ;;  %2494 = vmatprep.mubr.bf16.mxu1 %v6153_v19  ;;  %v5884_v19 = vld [vmem:[%s8568_s1 + $0x5e0] ss:$16 sps:$4 sm:$0xff]   ;;  %v7055_v3 = vpack.c.bf16 %v163_v29, %v156_v60  ;;  %v246_v29 = vld [vmem:[%s8569_s0 + $0x6d8] sm:$0xff] }
  0xbc   :  { %2025 = vmatpush1.bf16.msra.mxu0 %v5878_v43  ;;  %2604 = vmatpush1.bf16.msra.mxu1 %v5881_v50  ;;  %v226_v43 = vld [vmem:[%s8569_s0 + $0x638] sm:$0xff] }
  0xbd   :  { %2026 = vmatprep.subr.bf16.mxu0 %v5886_v51  ;;  %2605 = vmatprep.subr.bf16.mxu1 %v5889_v52  ;;  %v232_v52 = vld [vmem:[%s8569_s0 + $0x668] sm:$0xff] }
  0xc0   :  { %2027 = vmatpush1.bf16.msra.mxu0 %v5884_v19  ;;  %2606 = vmatpush1.bf16.msra.mxu1 %v5887_v20  ;;  %v32_v19 = vld [vmem:[%s8569_s0 + $0x28] sm:$0xff] }
  0xc1   :  { %2189 = vmatprep.subr.bf16.mxu0 %v5892_v23  ;;  %2768 = vmatprep.subr.bf16.mxu1 %v5895_v62  ;;  %v38_v62 = vld [vmem:[%s8569_s0 + $0x58] sm:$0xff] }
  0xc2   :  { %1916 = vmatmul.mubr.bf16.gmra.mrb[32].mxu0 %v7053_v34  ;;  %2495 = vmatmul.mubr.bf16.gmra.mrb[64].mxu1 %v6234_v46  ;;  %v177_v46 = vld [vmem:[%s8569_s0 + $0x4b0] sm:$0xff] }
  0xc3   :  { %1925 = vmatprep.mubr.bf16.mxu0 %v7055_v3  ;;  %2504 = vmatprep.mubr.bf16.mxu1 %v6265_v57  ;;  %v7075_v33 = vpack.c.bf16 %v177_v46, %v170_v10  ;;  %v169_v57 = vld [vmem:[%s8569_s0 + $0x470] sm:$0xff]  ;;  %v5893_v10 = vld [vmem:[%s8568_s1 + $0x408] ss:$16 sps:$4 sm:$0xff]  }
  0xc4   :  { %v7093_v47 = vpack.c.bf16 %v176_v17, %v169_v57  ;;  %v5898_v57 = vld [vmem:[%s8568_s1 + $0x42c] ss:$16 sps:$4 sm:$0xff]   ;;  %v45_v17 = vld [vmem:[%s8569_s0 + $0x90] sm:$0xff] }
  0xca   :  { %1926 = vmatmul.mubr.bf16.gmra.mrb[36].mxu0 %v7073_v11  ;;  %2505 = vmatmul.mubr.bf16.gmra.mrb[68].mxu1 %v6294_v2  ;;  %v191_v2 = vld [vmem:[%s8569_s0 + $0x520] sm:$0xff] }
  0xcb   :  { %1935 = vmatprep.mubr.bf16.mxu0 %v7075_v33  ;;  %2514 = vmatprep.mubr.bf16.mxu1 %v6325_v13  ;;  %v7095_v56 = vpack.c.bf16 %v191_v2, %v184_v44  ;;  %v183_v13 = vld [vmem:[%s8569_s0 + $0x4e0] sm:$0xff]  ;;  %v52_v44 = vld [vmem:[%s8569_s0 + $0xc8] sm:$0xff] }
  0xcc   :  { %v7113_v27 = vpack.c.bf16 %v190_v26, %v183_v13  ;;  %v5896_v2 = vld [vmem:[%s8568_s1 + $0x428] ss:$16 sps:$4 sm:$0xff]   ;;  %v67_v13 = vld [vmem:[%s8569_s0 + $0x140] sm:$0xff]  ;;  %v5901_v26 = vld [vmem:[%s8568_s1 + $0x44c] ss:$16 sps:$4 sm:$0xff]  }
  0xd2   :  { %1936 = vmatmul.mubr.bf16.gmra.mrb[40].mxu0 %v7093_v47  ;;  %2515 = vmatmul.mubr.bf16.gmra.mrb[72].mxu1 %v6354_v24  ;;  %v205_v24 = vld [vmem:[%s8569_s0 + $0x590] sm:$0xff] }
  0xd3   :  { %1945 = vmatprep.mubr.bf16.mxu0 %v7095_v56  ;;  %2524 = vmatprep.mubr.bf16.mxu1 %v6385_v35  ;;  %v7115_v32 = vpack.c.bf16 %v205_v24, %v198_v58  ;;  %v197_v35 = vld [vmem:[%s8569_s0 + $0x550] sm:$0xff]  ;;  %v7248_v58 = vpack.c.bf16 %v52_v44, %v45_v17  ;;  %v102_v17 = vld [vmem:[%s8569_s0 + $0x258] sm:$0xff] }
  0xd4   :  { %v7133_v37 = vpack.c.bf16 %v204_v63, %v197_v35  ;;  %v5904_v35 = vld [vmem:[%s8568_s1 + $0x46c] ss:$16 sps:$4 sm:$0xff]   ;;  %v59_v63 = vld [vmem:[%s8569_s0 + $0x100] sm:$0xff] }
  0xda   :  { %1946 = vmatmul.mubr.bf16.gmra.mrb[44].mxu0 %v7113_v27  ;;  %2525 = vmatmul.mubr.bf16.gmra.mrb[76].mxu1 %v6420_v48  ;;  %v219_v48 = vld [vmem:[%s8569_s0 + $0x600] sm:$0xff] }
  0xdb   :  { %1955 = vmatprep.mubr.bf16.mxu0 %v7115_v32  ;;  %2534 = vmatprep.mubr.bf16.mxu1 %v6445_v59  ;;  %v7135_v1 = vpack.c.bf16 %v219_v48, %v212_v14  ;;  %v211_v59 = vld [vmem:[%s8569_s0 + $0x5c0] sm:$0xff]  ;;  %v66_v14 = vld [vmem:[%s8569_s0 + $0x138] sm:$0xff] }
  0xdc   :  { %v7153_v50 = vpack.c.bf16 %v218_v38, %v211_v59  ;;  %v74_v48 = vld [vmem:[%s8569_s0 + $0x178] sm:$0xff]  ;;  %v7280_v38 = vpack.c.bf16 %v66_v14, %v59_v63 }
  0xdd   :  { %v5907_v59 = vld [vmem:[%s8568_s1 + $0x48c] ss:$16 sps:$4 sm:$0xff]   ;;  %v5917_v63 = vld [vmem:[%s8568_s1 + $0x508] ss:$16 sps:$4 sm:$0xff]  }
  0xde   :  { %v5922_v14 = vld [vmem:[%s8568_s1 + $0x52c] ss:$16 sps:$4 sm:$0xff]  }
  0xe2   :  { %1956 = vmatmul.mubr.bf16.gmra.mrb[48].mxu0 %v7133_v37  ;;  %2535 = vmatmul.mubr.bf16.gmra.mrb[80].mxu1 %v6480_v8  ;;  %v233_v8 = vld [vmem:[%s8569_s0 + $0x670] sm:$0xff] }
  0xe3   :  { %1965 = vmatprep.mubr.bf16.mxu0 %v7135_v1  ;;  %2544 = vmatprep.mubr.bf16.mxu1 %v6505_v21  ;;  %v7155_v51 = vpack.c.bf16 %v233_v8, %v226_v43  ;;  %v225_v21 = vld [vmem:[%s8569_s0 + $0x630] sm:$0xff]  ;;  %v5905_v8 = vld [vmem:[%s8568_s1 + $0x488] ss:$16 sps:$4 sm:$0xff]  }
  0xe4   :  { %v7173_v53 = vpack.c.bf16 %v232_v52, %v225_v21  ;;  %v5910_v21 = vld [vmem:[%s8568_s1 + $0x4ac] ss:$16 sps:$4 sm:$0xff]   ;;  %v73_v52 = vld [vmem:[%s8569_s0 + $0x170] sm:$0xff] }
  0xea   :  { %1966 = vmatmul.mubr.bf16.gmra.mrb[52].mxu0 %v7153_v50  ;;  %2545 = vmatmul.mubr.bf16.gmra.mrb[84].mxu1 %v6540_v36  ;;  %v247_v36 = vld [vmem:[%s8569_s0 + $0x6e0] sm:$0xff] }
  0xeb   :  { %1975 = vmatprep.mubr.bf16.mxu0 %v7155_v51  ;;  %2554 = vmatprep.mubr.bf16.mxu1 %v6565_v49  ;;  %v7175_v60 = vpack.c.bf16 %v247_v36, %v240_v7  ;;  %v239_v49 = vld [vmem:[%s8569_s0 + $0x6a0] sm:$0xff]  ;;  %v80_v7 = vld [vmem:[%s8569_s0 + $0x1a8] sm:$0xff] }
  0xec   :  { %v7193_v20 = vpack.c.bf16 %v246_v29, %v239_v49  ;;  %v88_v36 = vld [vmem:[%s8569_s0 + $0x1e8] sm:$0xff] }
  0xed   :  { %v5913_v29 = vld [vmem:[%s8568_s1 + $0x4cc] ss:$16 sps:$4 sm:$0xff]  }
  0xf2   :  { %1976 = vmatmul.mubr.bf16.gmra.mrb[56].mxu0 %v7173_v53  ;;  %2555 = vmatmul.mubr.bf16.gmra.mrb[88].mxu1 %v6600_v0  ;;  %v39_v0 = vld [vmem:[%s8569_s0 + $0x60] sm:$0xff] }
  0xf3   :  { %1985 = vmatprep.mubr.bf16.mxu0 %v7175_v60  ;;  %2564 = vmatprep.mubr.bf16.mxu1 %v6625_v16  ;;  %v7195_v23 = vpack.c.bf16 %v39_v0, %v32_v19  ;;  %v31_v16 = vld [vmem:[%s8569_s0 + $0x20] sm:$0xff]  ;;  %v7316_v0 = vpack.c.bf16 %v80_v7, %v73_v52 }
  0xf4   :  { %v7213_v9 = vpack.c.bf16 %v38_v62, %v31_v16 }
  0xfa   :  { %1986 = vmatmul.mubr.bf16.gmra.mrb[60].mxu0 %v7193_v20  ;;  %2565 = vmatmul.mubr.bf16.gmra.mrb[92].mxu1 %v6654_v30  ;;  %v53_v30 = vld [vmem:[%s8569_s0 + $0xd0] sm:$0xff] }
  0xfb   :  { %2028 = vmatprep.mubr.bf16.mxu0 %v7195_v23  ;;  %2607 = vmatprep.mubr.bf16.mxu1 %v6674_v41  ;;  %v5890_v41 = vld [vmem:[%s8568_s1 + $0x600] ss:$16 sps:$4 sm:$0xff]   ;;  %v7221_v46 = vpack.c.bf16 %v53_v30, %v46_v6  ;;  %v5911_v30 = vld [vmem:[%s8568_s1 + $0x4c8] ss:$16 sps:$4 sm:$0xff]  }
 0x102   :  { %2029 = vmatmul.mubr.bf16.vlgmr.msra.gmra.mrb[0].mxu0 %v7213_v9  ;;  %2608 = vmatmul.mubr.bf16.vlgmr.msra.gmra.mrb[32].mxu1 %v6701_v55  ;;  %v60_v55 = vld [vmem:[%s8569_s0 + $0x108] sm:$0xff] }
 0x103   :  { %2190 = vmatpush1.bf16.msra.mxu0 %v5890_v41  ;;  %2769 = vmatpush1.bf16.msra.mxu1 %v5893_v10  ;;  %v7250_v24 = vpack.c.bf16 %v67_v13, %v60_v55  ;;  %v5916_v41 = vld [vmem:[%s8568_s1 + $0x4ec] ss:$16 sps:$4 sm:$0xff]   ;;  %v87_v10 = vld [vmem:[%s8569_s0 + $0x1e0] sm:$0xff] }
 0x104   :  { %2038 = vmatprep.mubr.bf16.mxu0 %v7221_v46  ;;  %2617 = vmatprep.mubr.bf16.mxu1 %v6709_v61  ;;  %v5899_v61 = vld [vmem:[%s8568_s1 + $0x448] ss:$16 sps:$4 sm:$0xff]  }
 0x105   :  { %2770 = vmatprep.subr.bf16.mxu1 %v5898_v57  ;;  %v94_v57 = vld [vmem:[%s8569_s0 + $0x218] sm:$0xff] }
 0x106   :  { %v7356_v13 = vpack.c.bf16 %v94_v57, %v87_v10  ;;  %v130_v10 = vld [vmem:[%s8569_s0 + $0x338] sm:$0xff] }
 0x107   :  { %2771 = vmatpush1.bf16.msra.mxu1 %v5896_v2  ;;  %v5919_v2 = vld [vmem:[%s8568_s1 + $0x50c] ss:$16 sps:$4 sm:$0xff]  }
 0x108   :  { %2772 = vmatprep.subr.bf16.mxu1 %v5901_v26 }
 0x10a   :  { %2039 = vmatmul.mubr.bf16.gmra.mrb[4].mxu0 %v7248_v58  ;;  %2618 = vmatmul.mubr.bf16.gmra.mrb[36].mxu1 %v6745_v18  ;;  %v81_v18 = vld [vmem:[%s8569_s0 + $0x1b0] sm:$0xff] }
 0x10b   :  { %2048 = vmatprep.mubr.bf16.mxu0 %v7250_v24  ;;  %2627 = vmatprep.mubr.bf16.mxu1 %v6747_v22  ;;  %v5902_v22 = vld [vmem:[%s8568_s1 + $0x468] ss:$16 sps:$4 sm:$0xff]   ;;  %v7282_v43 = vpack.c.bf16 %v81_v18, %v74_v48  ;;  %v101_v48 = vld [vmem:[%s8569_s0 + $0x250] sm:$0xff] }
 0x10c   :  { %2773 = vmatpush1.bf16.msra.mxu1 %v5899_v61  ;;  %v108_v18 = vld [vmem:[%s8569_s0 + $0x288] sm:$0xff] }
 0x10d   :  { %2774 = vmatprep.subr.bf16.mxu1 %v5904_v35  ;;  %v7396_v52 = vpack.c.bf16 %v108_v18, %v101_v48  ;;  %v5929_v48 = vld [vmem:[%s8568_s1 + $0x588] ss:$16 sps:$4 sm:$0xff]   ;;  %v5934_v18 = vld [vmem:[%s8568_s1 + $0x5ac] ss:$16 sps:$4 sm:$0xff]  }
 0x110   :  { %2775 = vmatpush1.bf16.msra.mxu1 %v5902_v22  ;;  %v116_v22 = vld [vmem:[%s8569_s0 + $0x2c8] sm:$0xff] }
 0x111   :  { %2776 = vmatprep.subr.bf16.mxu1 %v5907_v59 }
 0x112   :  { %2049 = vmatmul.mubr.bf16.gmra.mrb[8].mxu0 %v7280_v38  ;;  %2628 = vmatmul.mubr.bf16.gmra.mrb[40].mxu1 %v6789_v40  ;;  %v95_v40 = vld [vmem:[%s8569_s0 + $0x220] sm:$0xff] }
 0x113   :  { %2058 = vmatprep.mubr.bf16.mxu0 %v7282_v43  ;;  %2637 = vmatprep.mubr.bf16.mxu1 %v6791_v42  ;;  %v5908_v42 = vld [vmem:[%s8568_s1 + $0x4a8] ss:$16 sps:$4 sm:$0xff]   ;;  %v7320_v62 = vpack.c.bf16 %v95_v40, %v88_v36 }
 0x114   :  { %2777 = vmatpush1.bf16.msra.mxu1 %v5905_v8  ;;  %v5925_v8 = vld [vmem:[%s8568_s1 + $0x54c] ss:$16 sps:$4 sm:$0xff]  }
 0x115   :  { %v7309_v49 = vpop.f32.mrb[0].mxu1  ;;  %2778 = vmatprep.subr.bf16.mxu1 %v5910_v21 }
 0x116   :  { %v7314_v19 = vpop.f32.mrb[1].mxu1 }
 0x117   :  { %v7318_v16 = vpop.f32.mrb[2].mxu1 }
 0x118   :  { %v7322_v6 = vpop.f32.mrb[3].mxu1  ;;  %2779 = vmatpush1.bf16.msra.mxu1 %v5908_v42  ;;  %v5923_v42 = vld [vmem:[%s8568_s1 + $0x548] ss:$16 sps:$4 sm:$0xff]  }
 0x119   :  { %2780 = vmatprep.subr.bf16.mxu1 %v5913_v29  ;;  %v5928_v29 = vld [vmem:[%s8568_s1 + $0x56c] ss:$16 sps:$4 sm:$0xff]  }
 0x11a   :  { %2059 = vmatmul.mubr.bf16.gmra.mrb[12].mxu0 %v7316_v0  ;;  %2638 = vmatmul.mubr.bf16.gmra.mrb[44].mxu1 %v6833_v4  ;;  %v109_v4 = vld [vmem:[%s8569_s0 + $0x290] sm:$0xff] }
 0x11b   :  { %2068 = vmatprep.mubr.bf16.mxu0 %v7320_v62  ;;  %2647 = vmatprep.mubr.bf16.mxu1 %v6835_v5  ;;  %v5914_v5 = vld [vmem:[%s8568_s1 + $0x4e8] ss:$16 sps:$4 sm:$0xff]   ;;  %v7360_v61 = vpack.c.bf16 %v109_v4, %v102_v17  ;;  %v5931_v17 = vld [vmem:[%s8568_s1 + $0x58c] ss:$16 sps:$4 sm:$0xff]  }
 0x11c   :  { %2781 = vmatpush1.bf16.msra.mxu1 %v5911_v30  ;;  %v115_v30 = vld [vmem:[%s8569_s0 + $0x2c0] sm:$0xff] }
 0x11d   :  { %v7349_v44 = vpop.f32.mrb[4].mxu1  ;;  %2782 = vmatprep.subr.bf16.mxu1 %v5916_v41  ;;  %v122_v41 = vld [vmem:[%s8569_s0 + $0x2f8] sm:$0xff] }
 0x11e   :  { %v7354_v55 = vpop.f32.mrb[5].mxu1 }
 0x11f   :  { %v7358_v26 = vpop.f32.mrb[6].mxu1 }
 0x120   :  { %v7362_v35 = vpop.f32.mrb[7].mxu1  ;;  %2783 = vmatpush1.bf16.msra.mxu1 %v5914_v5  ;;  %v7436_v5 = vpack.c.bf16 %v122_v41, %v115_v30 }
 0x121   :  { %2784 = vmatprep.subr.bf16.mxu1 %v5919_v2 }
 0x122   :  { %2069 = vmatmul.mubr.bf16.gmra.mrb[16].mxu0 %v7356_v13  ;;  %2648 = vmatmul.mubr.bf16.gmra.mrb[48].mxu1 %v6877_v28  ;;  %v123_v28 = vld [vmem:[%s8569_s0 + $0x300] sm:$0xff] }
 0x123   :  { %2078 = vmatprep.mubr.bf16.mxu0 %v7360_v61  ;;  %2657 = vmatprep.mubr.bf16.mxu1 %v6879_v31  ;;  %v5920_v31 = vld [vmem:[%s8568_s1 + $0x528] ss:$16 sps:$4 sm:$0xff]   ;;  %v7400_v36 = vpack.c.bf16 %v123_v28, %v116_v22  ;;  %v129_v22 = vld [vmem:[%s8569_s0 + $0x330] sm:$0xff] }
 0x124   :  { %2785 = vmatpush1.bf16.msra.mxu1 %v5917_v63  ;;  %v136_v28 = vld [vmem:[%s8569_s0 + $0x368] sm:$0xff] }
 0x125   :  { %v7389_v59 = vpop.f32.mrb[8].mxu1  ;;  %2786 = vmatprep.subr.bf16.mxu1 %v5922_v14  ;;  %v7476_v30 = vpack.c.bf16 %v136_v28, %v129_v22  ;;  %v158_v22 = vld [vmem:[%s8569_s0 + $0x418] sm:$0xff] }
 0x126   :  { %v7394_v21 = vpop.f32.mrb[9].mxu1 }
 0x127   :  { %v7398_v7 = vpop.f32.mrb[10].mxu1 }
 0x128   :  { %v7402_v40 = vpop.f32.mrb[11].mxu1  ;;  %2787 = vmatpush1.bf16.msra.mxu1 %v5920_v31  ;;  %v144_v31 = vld [vmem:[%s8569_s0 + $0x3a8] sm:$0xff] }
 0x129   :  { %2788 = vmatprep.subr.bf16.mxu1 %v5925_v8 }
 0x12a   :  { %2079 = vmatmul.mubr.bf16.gmra.mrb[20].mxu0 %v7396_v52  ;;  %2658 = vmatmul.mubr.bf16.gmra.mrb[52].mxu1 %v6921_v54  ;;  %v137_v54 = vld [vmem:[%s8569_s0 + $0x370] sm:$0xff] }
 0x12b   :  { %2088 = vmatprep.mubr.bf16.mxu0 %v7400_v36  ;;  %2667 = vmatprep.mubr.bf16.mxu1 %v6929_v15  ;;  %v5926_v15 = vld [vmem:[%s8568_s1 + $0x568] ss:$16 sps:$4 sm:$0xff]   ;;  %v7440_v63 = vpack.c.bf16 %v137_v54, %v130_v10 }
 0x12c   :  { %2789 = vmatpush1.bf16.msra.mxu1 %v5923_v42  ;;  %v5937_v42 = vld [vmem:[%s8568_s1 + $0x5cc] ss:$16 sps:$4 sm:$0xff]  }
 0x12d   :  { %v7429_v57 = vpop.f32.mrb[12].mxu1  ;;  %2790 = vmatprep.subr.bf16.mxu1 %v5928_v29 }
 0x12e   :  { %v7434_v4 = vpop.f32.mrb[13].mxu1 }
 0x12f   :  { %v7438_v2 = vpop.f32.mrb[14].mxu1 }
 0x130   :  { %v7442_v14 = vpop.f32.mrb[15].mxu1  ;;  %2791 = vmatpush1.bf16.msra.mxu1 %v5926_v15  ;;  %v5935_v15 = vld [vmem:[%s8568_s1 + $0x5c8] ss:$16 sps:$4 sm:$0xff]  }
 0x131   :  { %2792 = vmatprep.subr.bf16.mxu1 %v5931_v17  ;;  %v5940_v17 = vld [vmem:[%s8568_s1 + $0x5ec] ss:$16 sps:$4 sm:$0xff]  }
 0x132   :  { %2089 = vmatmul.mubr.bf16.gmra.mrb[24].mxu0 %v7436_v5  ;;  %2668 = vmatmul.mubr.bf16.gmra.mrb[56].mxu1 %v6965_v45  ;;  %v151_v45 = vld [vmem:[%s8569_s0 + $0x3e0] sm:$0xff] }
 0x133   :  { %2098 = vmatprep.mubr.bf16.mxu0 %v7440_v63  ;;  %2677 = vmatprep.mubr.bf16.mxu1 %v6967_v25  ;;  %v5932_v25 = vld [vmem:[%s8568_s1 + $0x5a8] ss:$16 sps:$4 sm:$0xff]   ;;  %v7480_v10 = vpack.c.bf16 %v151_v45, %v144_v31  ;;  %v5943_v31 = vld [vmem:[%s8568_s1 + $0x60c] ss:$16 sps:$4 sm:$0xff]  }
 0x134   :  { %2793 = vmatpush1.bf16.msra.mxu1 %v5929_v48  ;;  %v143_v48 = vld [vmem:[%s8569_s0 + $0x3a0] sm:$0xff] }
 0x135   :  { %v7469_v8 = vpop.f32.mrb[16].mxu1  ;;  %2794 = vmatprep.subr.bf16.mxu1 %v5934_v18  ;;  %v150_v18 = vld [vmem:[%s8569_s0 + $0x3d8] sm:$0xff] }
 0x136   :  { %v7474_v29 = vpop.f32.mrb[17].mxu1 }
 0x137   :  { %v7478_v41 = vpop.f32.mrb[18].mxu1 }
 0x138   :  { %v7482_v54 = vpop.f32.mrb[19].mxu1  ;;  %2795 = vmatpush1.bf16.msra.mxu1 %v5932_v25  ;;  %v7516_v25 = vpack.c.bf16 %v150_v18, %v143_v48  ;;  %v164_v48 = vld [vmem:[%s8569_s0 + $0x448] sm:$0xff] }
 0x139   :  { %8576 = vst [vmem:[#allocation2_spill] sm:$0xff] %v7482_v54  ;;  %2796 = vmatprep.subr.bf16.mxu1 %v5937_v42  ;;  %v172_v18 = vld [vmem:[%s8569_s0 + $0x488] sm:$0xff] }
 0x13a   :  { %2099 = vmatmul.mubr.bf16.gmra.mrb[28].mxu0 %v7476_v30  ;;  %2678 = vmatmul.mubr.bf16.gmra.mrb[60].mxu1 %v7009_v12  ;;  %v165_v12 = vld [vmem:[%s8569_s0 + $0x450] sm:$0xff] }
 0x13b   :  { %2108 = vmatprep.mubr.bf16.mxu0 %v7480_v10  ;;  %2687 = vmatprep.mubr.bf16.mxu1 %v7011_v39  ;;  %v5938_v39 = vld [vmem:[%s8568_s1 + $0x5e8] ss:$16 sps:$4 sm:$0xff]   ;;  %v7520_v54 = vpack.c.bf16 %v165_v12, %v158_v22 }
 0x13c   :  { %2797 = vmatpush1.bf16.msra.mxu1 %v5935_v15 }
 0x13d   :  { %v7509_v28 = vpop.f32.mrb[20].mxu1  ;;  %2798 = vmatprep.subr.bf16.mxu1 %v5940_v17  ;;  %v157_v17 = vld [vmem:[%s8569_s0 + $0x410] sm:$0xff] }
 0x13e   :  { %v7514_v45 = vpop.f32.mrb[21].mxu1 }
 0x13f   :  { %v7518_v42 = vpop.f32.mrb[22].mxu1 }
 0x140   :  { %v7522_v15 = vpop.f32.mrb[23].mxu1  ;;  %2799 = vmatpush1.bf16.msra.mxu1 %v5938_v39 }
 0x141   :  { %8577 = vst [vmem:[#allocation3_spill] sm:$0xff] %v7522_v15  ;;  %2961 = vmatprep.subr.bf16.mxu1 %v5943_v31 }
 0x142   :  { %2109 = vmatmul.mubr.bf16.gmra.mrb[32].mxu0 %v7516_v25  ;;  %2688 = vmatmul.mubr.bf16.gmra.mrb[64].mxu1 %v7053_v34  ;;  %v179_v34 = vld [vmem:[%s8569_s0 + $0x4c0] sm:$0xff] }
 0x143   :  { %2118 = vmatprep.mubr.bf16.mxu0 %v7520_v54  ;;  %2697 = vmatprep.mubr.bf16.mxu1 %v7055_v3  ;;  %v7544_v3 = vpack.c.bf16 %v164_v48, %v157_v17  ;;  %v7548_v31 = vpack.c.bf16 %v179_v34, %v172_v18  ;;  %v178_v17 = vld [vmem:[%s8569_s0 + $0x4b8] sm:$0xff] }
 0x144   :  { %v186_v48 = vld [vmem:[%s8569_s0 + $0x4f8] sm:$0xff] }
 0x145   :  { %v7540_v22 = vpop.f32.mrb[24].mxu1 }
 0x146   :  { %8578 = vst [vmem:[#allocation4_spill] sm:$0xff] %v7540_v22  ;;  %v7542_v12 = vpop.f32.mrb[25].mxu1 }
 0x147   :  { %8579 = vst [vmem:[#allocation5_spill] sm:$0xff] %v7542_v12  ;;  %v7546_v39 = vpop.f32.mrb[26].mxu1  ;;  %v171_v12 = vld [vmem:[%s8569_s0 + $0x480] sm:$0xff] }
 0x148   :  { %8580 = vst [vmem:[#allocation6_spill] sm:$0xff] %v7546_v39  ;;  %v7550_v15 = vpop.f32.mrb[27].mxu1 }
 0x149   :  { %8581 = vst [vmem:[#allocation7_spill] sm:$0xff] %v7550_v15 }
 0x14a   :  { %2119 = vmatmul.mubr.bf16.gmra.mrb[36].mxu0 %v7544_v3  ;;  %2698 = vmatmul.mubr.bf16.gmra.mrb[68].mxu1 %v7073_v11  ;;  %v193_v11 = vld [vmem:[%s8569_s0 + $0x530] sm:$0xff] }
 0x14b   :  { %2128 = vmatprep.mubr.bf16.mxu0 %v7548_v31  ;;  %2707 = vmatprep.mubr.bf16.mxu1 %v7075_v33  ;;  %v7572_v33 = vpack.c.bf16 %v178_v17, %v171_v12  ;;  %v7576_v39 = vpack.c.bf16 %v193_v11, %v186_v48  ;;  %v192_v12 = vld [vmem:[%s8569_s0 + $0x528] sm:$0xff] }
 0x14c   :  { %v200_v17 = vld [vmem:[%s8569_s0 + $0x568] sm:$0xff] }
 0x14d   :  { %v7568_v18 = vpop.f32.mrb[28].mxu1 }
 0x14e   :  { %v7570_v34 = vpop.f32.mrb[29].mxu1 }
 0x14f   :  { %8582 = vst [vmem:[#allocation8_spill] sm:$0xff] %v7570_v34  ;;  %v7574_v15 = vpop.f32.mrb[30].mxu1  ;;  %v185_v34 = vld [vmem:[%s8569_s0 + $0x4f0] sm:$0xff] }
 0x150   :  { %8583 = vst [vmem:[#allocation9_spill] sm:$0xff] %v7574_v15  ;;  %v7578_v22 = vpop.f32.mrb[31].mxu1  ;;  %v7596_v48 = vpack.c.bf16 %v192_v12, %v185_v34  ;;  %v214_v34 = vld [vmem:[%s8569_s0 + $0x5d8] sm:$0xff]  ;;  %v5946_v12 = vld [vmem:[%s8570_s3 + $0x4] ss:$8 sps:$4 sm:$0xff]  }
 0x151   :  { %8584 = vst [vmem:[#allocation10_spill] sm:$0xff] %v7578_v22  ;;  %v206_v22 = vld [vmem:[%s8569_s0 + $0x598] sm:$0xff]  ;;  %3742 = vmatprep.subr.bf16.mxu0 %v5946_v12  ;;  %v220_v15 = vld [vmem:[%s8569_s0 + $0x608] sm:$0xff] }
 0x152   :  { %2129 = vmatmul.mubr.bf16.gmra.mrb[40].mxu0 %v7572_v33  ;;  %2708 = vmatmul.mubr.bf16.gmra.mrb[72].mxu1 %v7093_v47  ;;  %v207_v47 = vld [vmem:[%s8569_s0 + $0x5a0] sm:$0xff] }
 0x153   :  { %2138 = vmatprep.mubr.bf16.mxu0 %v7576_v39  ;;  %2717 = vmatprep.mubr.bf16.mxu1 %v7095_v56  ;;  %v7598_v11 = vpack.c.bf16 %v207_v47, %v200_v17  ;;  %v199_v56 = vld [vmem:[%s8569_s0 + $0x560] sm:$0xff]  ;;  %v213_v47 = vld [vmem:[%s8569_s0 + $0x5d0] sm:$0xff] }
 0x154   :  { %v7619_v17 = vpack.c.bf16 %v206_v22, %v199_v56  ;;  %v228_v22 = vld [vmem:[%s8569_s0 + $0x648] sm:$0xff]  ;;  %v7639_v56 = vpack.c.bf16 %v220_v15, %v213_v47  ;;  %v242_v15 = vld [vmem:[%s8569_s0 + $0x6b8] sm:$0xff] }
 0x15a   :  { %2139 = vmatmul.mubr.bf16.gmra.mrb[44].mxu0 %v7596_v48  ;;  %2718 = vmatmul.mubr.bf16.gmra.mrb[76].mxu1 %v7113_v27  ;;  %v221_v27 = vld [vmem:[%s8569_s0 + $0x610] sm:$0xff] }
 0x15b   :  { %2148 = vmatprep.mubr.bf16.mxu0 %v7598_v11  ;;  %2727 = vmatprep.mubr.bf16.mxu1 %v7115_v32  ;;  %v7621_v32 = vpack.c.bf16 %v221_v27, %v214_v34  ;;  %v234_v27 = vld [vmem:[%s8569_s0 + $0x678] sm:$0xff] }
 0x162   :  { %2149 = vmatmul.mubr.bf16.gmra.mrb[48].mxu0 %v7619_v17  ;;  %2728 = vmatmul.mubr.bf16.gmra.mrb[80].mxu1 %v7133_v37  ;;  %v235_v37 = vld [vmem:[%s8569_s0 + $0x680] sm:$0xff] }
 0x163   :  { %2158 = vmatprep.mubr.bf16.mxu0 %v7621_v32  ;;  %2737 = vmatprep.mubr.bf16.mxu1 %v7135_v1  ;;  %v7641_v34 = vpack.c.bf16 %v235_v37, %v228_v22  ;;  %v227_v1 = vld [vmem:[%s8569_s0 + $0x640] sm:$0xff]  ;;  %v248_v22 = vld [vmem:[%s8569_s0 + $0x6e8] sm:$0xff] }
 0x164   :  { %v7659_v12 = vpack.c.bf16 %v234_v27, %v227_v1  ;;  %v6056_v1 = vmov 0  }
 0x16a   :  { %2159 = vmatmul.mubr.bf16.gmra.mrb[52].mxu0 %v7639_v56  ;;  %2738 = vmatmul.mubr.bf16.gmra.mrb[84].mxu1 %v7153_v50  ;;  %v249_v50 = vld [vmem:[%s8569_s0 + $0x6f0] sm:$0xff] }
 0x16b   :  { %2168 = vmatprep.mubr.bf16.mxu0 %v7641_v34  ;;  %2747 = vmatprep.mubr.bf16.mxu1 %v7155_v51  ;;  %v7661_v47 = vpack.c.bf16 %v249_v50, %v242_v15  ;;  %v241_v51 = vld [vmem:[%s8569_s0 + $0x6b0] sm:$0xff]  ;;  %v5944_v15 = vld [vmem:[%s8570_s3] ss:$8 sps:$4 sm:$0xff]  }
 0x16c   :  { %v7673_v37 = vpack.c.bf16 %v248_v22, %v241_v51  ;;  %v47_v50 = vld [vmem:[%s8569_s0 + $0xa0] sm:$0xff]  ;;  %v54_v51 = vld [vmem:[%s8569_s0 + $0xd8] sm:$0xff] }
 0x16d   :  { %v5947_v22 = vld [vmem:[%s8570_s3 + $0x10] ss:$8 sps:$4 sm:$0xff]  }
 0x172   :  { %2169 = vmatmul.mubr.bf16.gmra.mrb[56].mxu0 %v7659_v12  ;;  %2748 = vmatmul.mubr.bf16.gmra.mrb[88].mxu1 %v7173_v53  ;;  %v33_v53 = vld [vmem:[%s8569_s0 + $0x30] sm:$0xff] }
 0x173   :  { %2178 = vmatprep.mubr.bf16.mxu0 %v7661_v47  ;;  %2757 = vmatprep.mubr.bf16.mxu1 %v7175_v60  ;;  %v40_v60 = vld [vmem:[%s8569_s0 + $0x68] sm:$0xff] }
 0x174   :  { %v7685_v27 = vpack.c.bf16 %v40_v60, %v33_v53  ;;  %v7713_v53 = vpack.c.bf16 %v54_v51, %v47_v50  ;;  %v5950_v60 = vld [vmem:[%s8570_s3 + $0x20] ss:$8 sps:$4 sm:$0xff]   ;;  %v5961_v51 = vld [vmem:[%s8570_s3 + $0x54] ss:$8 sps:$4 sm:$0xff]  }
 0x17a   :  { %2179 = vmatmul.mubr.bf16.gmra.mrb[60].mxu0 %v7673_v37  ;;  %2758 = vmatmul.mubr.bf16.gmra.mrb[92].mxu1 %v7193_v20  ;;  %v5941_v20 = vld [vmem:[%s8568_s1 + $0x608] ss:$16 sps:$4 sm:$0xff]  }
 0x17b   :  { %2221 = vmatprep.mubr.bf16.mxu0 %v6056_v1  ;;  %2800 = vmatprep.mubr.bf16.mxu1 %v7195_v23  ;;  %v5949_v23 = vld [vmem:[%s8570_s3 + $0x14] ss:$8 sps:$4 sm:$0xff]  }
 0x182   :  { %4752 = vmatmul.mubr.msk.bf16.vlgmr.msra.gmra.mrb[0].mxu0 %vm1561_vm0, %v7685_v27  ;;  %2801 = vmatmul.mubr.bf16.vlgmr.msra.gmra.mrb[32].mxu1 %v7213_v9  ;;  %v5952_v9 = vld [vmem:[%s8570_s3 + $0x24] ss:$8 sps:$4 sm:$0xff]  }
 0x183   :  { %2962 = vmatpush1.bf16.msra.mxu1 %v5941_v20  ;;  %2231 = vmatprep.mubr.bf16.mxu0 %v6056_v1  ;;  %v61_v20 = vld [vmem:[%s8569_s0 + $0x110] sm:$0xff] }
 0x184   :  { %2810 = vmatprep.mubr.bf16.mxu1 %v7221_v46  ;;  %3743 = vmatpush1.bf16.msra.mxu0 %v5944_v15  ;;  %v5955_v46 = vld [vmem:[%s8570_s3 + $0x34] ss:$8 sps:$4 sm:$0xff]   ;;  %v68_v15 = vld [vmem:[%s8569_s0 + $0x148] sm:$0xff] }
 0x185   :  { %3744 = vmatprep.subr.bf16.mxu0 %v5949_v23  ;;  %v5953_v23 = vld [vmem:[%s8570_s3 + $0x30] ss:$8 sps:$4 sm:$0xff]   ;;  %v7738_v50 = vpack.c.bf16 %v68_v15, %v61_v20  ;;  %v5967_v20 = vld [vmem:[%s8570_s3 + $0x74] ss:$8 sps:$4 sm:$0xff]  }
 0x186   :  { %v89_v15 = vld [vmem:[%s8569_s0 + $0x1f0] sm:$0xff] }
 0x188   :  { %3745 = vmatpush1.bf16.msra.mxu0 %v5947_v22  ;;  %v75_v22 = vld [vmem:[%s8569_s0 + $0x180] sm:$0xff] }
 0x189   :  { %3746 = vmatprep.subr.bf16.mxu0 %v5952_v9  ;;  %v82_v9 = vld [vmem:[%s8569_s0 + $0x1b8] sm:$0xff] }
 0x18a   :  { %4753 = vmatmul.mubr.msk.bf16.gmra.mrb[4].mxu0 %vm1561_vm0, %v7713_v53  ;;  %2811 = vmatmul.mubr.bf16.gmra.mrb[36].mxu1 %v7248_v58  ;;  %v5958_v58 = vld [vmem:[%s8570_s3 + $0x44] ss:$8 sps:$4 sm:$0xff]  }
 0x18b   :  { %2241 = vmatprep.mubr.bf16.mxu0 %v6056_v1  ;;  %2820 = vmatprep.mubr.bf16.mxu1 %v7250_v24  ;;  %v5956_v24 = vld [vmem:[%s8570_s3 + $0x40] ss:$8 sps:$4 sm:$0xff]  }
 0x18c   :  { %3747 = vmatpush1.bf16.msra.mxu0 %v5950_v60  ;;  %v5959_v60 = vld [vmem:[%s8570_s3 + $0x50] ss:$8 sps:$4 sm:$0xff]  }
 0x18d   :  { %3748 = vmatprep.subr.bf16.mxu0 %v5955_v46  ;;  %v7763_v46 = vpack.c.bf16 %v82_v9, %v75_v22  ;;  %v103_v22 = vld [vmem:[%s8569_s0 + $0x260] sm:$0xff]  ;;  %v110_v9 = vld [vmem:[%s8569_s0 + $0x298] sm:$0xff] }
 0x190   :  { %3749 = vmatpush1.bf16.msra.mxu0 %v5953_v23  ;;  %v96_v23 = vld [vmem:[%s8569_s0 + $0x228] sm:$0xff] }
 0x191   :  { %3750 = vmatprep.subr.bf16.mxu0 %v5958_v58  ;;  %v5965_v58 = vld [vmem:[%s8570_s3 + $0x70] ss:$8 sps:$4 sm:$0xff]  }
 0x192   :  { %4754 = vmatmul.mubr.msk.bf16.gmra.mrb[8].mxu0 %vm1561_vm0, %v7738_v50  ;;  %2821 = vmatmul.mubr.bf16.gmra.mrb[40].mxu1 %v7280_v38  ;;  %v5964_v38 = vld [vmem:[%s8570_s3 + $0x64] ss:$8 sps:$4 sm:$0xff]  }
 0x193   :  { %2251 = vmatprep.mubr.bf16.mxu0 %v6056_v1  ;;  %2830 = vmatprep.mubr.bf16.mxu1 %v7282_v43  ;;  %v5962_v43 = vld [vmem:[%s8570_s3 + $0x60] ss:$8 sps:$4 sm:$0xff]  }
 0x194   :  { %3751 = vmatpush1.bf16.msra.mxu0 %v5956_v24  ;;  %v7788_v24 = vpack.c.bf16 %v96_v23, %v89_v15  ;;  %v5979_v15 = vld [vmem:[%s8570_s3 + $0xb4] ss:$8 sps:$4 sm:$0xff]   ;;  %v131_v23 = vld [vmem:[%s8569_s0 + $0x340] sm:$0xff] }
 0x195   :  { %3752 = vmatprep.subr.bf16.mxu0 %v5961_v51  ;;  %v5973_v51 = vld [vmem:[%s8570_s3 + $0x94] ss:$8 sps:$4 sm:$0xff]  }
 0x198   :  { %3753 = vmatpush1.bf16.msra.mxu0 %v5959_v60  ;;  %v7810_v60 = vpack.c.bf16 %v110_v9, %v103_v22  ;;  %v5985_v22 = vld [vmem:[%s8570_s3 + $0xd4] ss:$8 sps:$4 sm:$0xff]   ;;  %v159_v9 = vld [vmem:[%s8569_s0 + $0x420] sm:$0xff] }
 0x199   :  { %3754 = vmatprep.subr.bf16.mxu0 %v5964_v38  ;;  %v5976_v38 = vld [vmem:[%s8570_s3 + $0xa4] ss:$8 sps:$4 sm:$0xff]  }
 0x19a   :  { %4755 = vmatmul.mubr.msk.bf16.gmra.mrb[12].mxu0 %vm1561_vm0, %v7763_v46  ;;  %2831 = vmatmul.mubr.bf16.gmra.mrb[44].mxu1 %v7316_v0  ;;  %v5970_v0 = vld [vmem:[%s8570_s3 + $0x84] ss:$8 sps:$4 sm:$0xff]  }
 0x19b   :  { %2261 = vmatprep.mubr.bf16.mxu0 %v6056_v1  ;;  %2840 = vmatprep.mubr.bf16.mxu1 %v7320_v62  ;;  %v5968_v62 = vld [vmem:[%s8570_s3 + $0x80] ss:$8 sps:$4 sm:$0xff]  }
 0x19c   :  { %3755 = vmatpush1.bf16.msra.mxu0 %v5962_v43  ;;  %v117_v43 = vld [vmem:[%s8569_s0 + $0x2d0] sm:$0xff] }
 0x19d   :  { %3756 = vmatprep.subr.bf16.mxu0 %v5967_v20 }
 0x1a0   :  { %3757 = vmatpush1.bf16.msra.mxu0 %v5965_v58 }
 0x1a1   :  { %3758 = vmatprep.subr.bf16.mxu0 %v5970_v0  ;;  %v5982_v0 = vld [vmem:[%s8570_s3 + $0xc4] ss:$8 sps:$4 sm:$0xff]  }
 0x1a2   :  { %4756 = vmatmul.mubr.msk.bf16.gmra.mrb[16].mxu0 %vm1561_vm0, %v7788_v24  ;;  %2841 = vmatmul.mubr.bf16.gmra.mrb[48].mxu1 %v7356_v13  ;;  %v5971_v13 = vld [vmem:[%s8570_s3 + $0x90] ss:$8 sps:$4 sm:$0xff]  }
 0x1a3   :  { %2271 = vmatprep.mubr.bf16.mxu0 %v6056_v1  ;;  %2850 = vmatprep.mubr.bf16.mxu1 %v7360_v61  ;;  %v5974_v61 = vld [vmem:[%s8570_s3 + $0xa0] ss:$8 sps:$4 sm:$0xff]  }
 0x1a4   :  { %3759 = vmatpush1.bf16.msra.mxu0 %v5968_v62  ;;  %v145_v62 = vld [vmem:[%s8569_s0 + $0x3b0] sm:$0xff] }
 0x1a5   :  { %3760 = vmatprep.subr.bf16.mxu0 %v5973_v51 }
 0x1a8   :  { %3761 = vmatpush1.bf16.msra.mxu0 %v5971_v13 }
 0x1a9   :  { %3762 = vmatprep.subr.bf16.mxu0 %v5976_v38  ;;  %v173_v38 = vld [vmem:[%s8569_s0 + $0x490] sm:$0xff] }
 0x1aa   :  { %4757 = vmatmul.mubr.msk.bf16.gmra.mrb[20].mxu0 %vm1561_vm0, %v7810_v60  ;;  %2851 = vmatmul.mubr.bf16.gmra.mrb[52].mxu1 %v7396_v52  ;;  %v124_v52 = vld [vmem:[%s8569_s0 + $0x308] sm:$0xff] }
 0x1ab   :  { %2281 = vmatprep.mubr.bf16.mxu0 %v6056_v1  ;;  %2860 = vmatprep.mubr.bf16.mxu1 %v7400_v36  ;;  %v7829_v20 = vpack.c.bf16 %v124_v52, %v117_v43  ;;  %v5977_v36 = vld [vmem:[%s8570_s3 + $0xb0] ss:$8 sps:$4 sm:$0xff]  }
 0x1ac   :  { %3763 = vmatpush1.bf16.msra.mxu0 %v5974_v61  ;;  %v5988_v61 = vld [vmem:[%s8570_s3 + $0xe4] ss:$8 sps:$4 sm:$0xff]   ;;  %v194_v52 = vld [vmem:[%s8569_s0 + $0x538] sm:$0xff] }
 0x1ad   :  { %3764 = vmatprep.subr.bf16.mxu0 %v5979_v15  ;;  %v208_v15 = vld [vmem:[%s8569_s0 + $0x5a8] sm:$0xff] }
 0x1b0   :  { %3765 = vmatpush1.bf16.msra.mxu0 %v5977_v36 }
 0x1b1   :  { %3766 = vmatprep.subr.bf16.mxu0 %v5982_v0 }
 0x1b2   :  { %4758 = vmatmul.mubr.msk.bf16.gmra.mrb[24].mxu0 %vm1561_vm0, %v7829_v20  ;;  %2861 = vmatmul.mubr.bf16.gmra.mrb[56].mxu1 %v7436_v5  ;;  %v138_v5 = vld [vmem:[%s8569_s0 + $0x378] sm:$0xff] }
 0x1b3   :  { %2291 = vmatprep.mubr.bf16.mxu0 %v6056_v1  ;;  %2870 = vmatprep.mubr.bf16.mxu1 %v7440_v63  ;;  %v7848_v58 = vpack.c.bf16 %v138_v5, %v131_v23  ;;  %v5980_v63 = vld [vmem:[%s8570_s3 + $0xc0] ss:$8 sps:$4 sm:$0xff]   ;;  %v222_v5 = vld [vmem:[%s8569_s0 + $0x618] sm:$0xff] }
 0x1b4   :  { %3767 = vmatpush1.bf16.msra.mxu0 %v5980_v63  ;;  %v5994_v63 = vld [vmem:[%s8570_s3 + $0x104] ss:$8 sps:$4 sm:$0xff]  }
 0x1b5   :  { %3768 = vmatprep.subr.bf16.mxu0 %v5985_v22 }
 0x1ba   :  { %4759 = vmatmul.mubr.msk.bf16.gmra.mrb[28].mxu0 %vm1561_vm0, %v7848_v58  ;;  %2871 = vmatmul.mubr.bf16.gmra.mrb[60].mxu1 %v7476_v30  ;;  %v152_v30 = vld [vmem:[%s8569_s0 + $0x3e8] sm:$0xff] }
 0x1bb   :  { %2301 = vmatprep.mubr.bf16.mxu0 %v6056_v1  ;;  %2880 = vmatprep.mubr.bf16.mxu1 %v7480_v10  ;;  %v7867_v51 = vpack.c.bf16 %v152_v30, %v145_v62  ;;  %v5983_v10 = vld [vmem:[%s8570_s3 + $0xd0] ss:$8 sps:$4 sm:$0xff]  }
 0x1bc   :  { %3769 = vmatpush1.bf16.msra.mxu0 %v5983_v10 }
 0x1bd   :  { %3770 = vmatprep.subr.bf16.mxu0 %v5988_v61 }
 0x1c2   :  { %4760 = vmatmul.mubr.msk.bf16.gmra.mrb[32].mxu0 %vm1561_vm0, %v7867_v51  ;;  %2881 = vmatmul.mubr.bf16.gmra.mrb[64].mxu1 %v7516_v25  ;;  %v166_v25 = vld [vmem:[%s8569_s0 + $0x458] sm:$0xff] }
 0x1c3   :  { %2311 = vmatprep.mubr.bf16.mxu0 %v6056_v1  ;;  %2890 = vmatprep.mubr.bf16.mxu1 %v7520_v54  ;;  %v7886_v13 = vpack.c.bf16 %v166_v25, %v159_v9  ;;  %v5986_v54 = vld [vmem:[%s8570_s3 + $0xe0] ss:$8 sps:$4 sm:$0xff]  }
 0x1c4   :  { %3771 = vmatpush1.bf16.msra.mxu0 %v5986_v54 }
 0x1ca   :  { %4761 = vmatmul.mubr.msk.bf16.gmra.mrb[36].mxu0 %vm1561_vm0, %v7886_v13  ;;  %2891 = vmatmul.mubr.bf16.gmra.mrb[68].mxu1 %v7544_v3  ;;  %v180_v3 = vld [vmem:[%s8569_s0 + $0x4c8] sm:$0xff] }
 0x1cb   :  { %2321 = vmatprep.mubr.bf16.mxu0 %v6056_v1  ;;  %2900 = vmatprep.mubr.bf16.mxu1 %v7548_v31  ;;  %v7905_v43 = vpack.c.bf16 %v180_v3, %v173_v38  ;;  %v187_v31 = vld [vmem:[%s8569_s0 + $0x500] sm:$0xff] }
 0x1cc   :  { %v7918_v36 = vpack.c.bf16 %v194_v52, %v187_v31  ;;  %v5992_v31 = vld [vmem:[%s8570_s3 + $0x100] ss:$8 sps:$4 sm:$0xff]  }
 0x1d2   :  { %4762 = vmatmul.mubr.msk.bf16.gmra.mrb[40].mxu0 %vm1561_vm0, %v7905_v43  ;;  %2901 = vmatmul.mubr.bf16.gmra.mrb[72].mxu1 %v7572_v33  ;;  %v5991_v33 = vld [vmem:[%s8570_s3 + $0xf4] ss:$8 sps:$4 sm:$0xff]  }
 0x1d3   :  { %2331 = vmatprep.mubr.bf16.mxu0 %v6056_v1  ;;  %2910 = vmatprep.mubr.bf16.mxu1 %v7576_v39  ;;  %v201_v39 = vld [vmem:[%s8569_s0 + $0x570] sm:$0xff] }
 0x1d4   :  { %3772 = vmatprep.subr.bf16.mxu0 %v5991_v33  ;;  %v7937_v23 = vpack.c.bf16 %v208_v15, %v201_v39  ;;  %v5997_v39 = vld [vmem:[%s8570_s3 + $0x114] ss:$8 sps:$4 sm:$0xff]  }
 0x1da   :  { %4763 = vmatmul.mubr.msk.bf16.gmra.mrb[44].mxu0 %vm1561_vm0, %v7918_v36  ;;  %2911 = vmatmul.mubr.bf16.gmra.mrb[76].mxu1 %v7596_v48  ;;  %v5989_v48 = vld [vmem:[%s8570_s3 + $0xf0] ss:$8 sps:$4 sm:$0xff]  }
 0x1db   :  { %2341 = vmatprep.mubr.bf16.mxu0 %v6056_v1  ;;  %2920 = vmatprep.mubr.bf16.mxu1 %v7598_v11  ;;  %v215_v11 = vld [vmem:[%s8569_s0 + $0x5e0] sm:$0xff] }
 0x1dc   :  { %3773 = vmatpush1.bf16.msra.mxu0 %v5989_v48  ;;  %v7953_v0 = vpack.c.bf16 %v222_v5, %v215_v11 }
 0x1dd   :  { %3935 = vmatprep.subr.bf16.mxu0 %v5994_v63  ;;  %v5995_v63 = vld [vmem:[%s8570_s3 + $0x110] ss:$8 sps:$4 sm:$0xff]  }
 0x1e2   :  { %4764 = vmatmul.mubr.msk.bf16.gmra.mrb[48].mxu0 %vm1561_vm0, %v7937_v23  ;;  %2921 = vmatmul.mubr.bf16.gmra.mrb[80].mxu1 %v7619_v17  ;;  %v229_v17 = vld [vmem:[%s8569_s0 + $0x650] sm:$0xff] }
 0x1e3   :  { %2351 = vmatprep.mubr.bf16.mxu0 %v6056_v1  ;;  %2930 = vmatprep.mubr.bf16.mxu1 %v7621_v32  ;;  %v236_v32 = vld [vmem:[%s8569_s0 + $0x688] sm:$0xff] }
 0x1e4   :  { %v7966_v62 = vpack.c.bf16 %v236_v32, %v229_v17 }
 0x1ea   :  { %4765 = vmatmul.mubr.msk.bf16.gmra.mrb[52].mxu0 %vm1561_vm0, %v7953_v0  ;;  %2931 = vmatmul.mubr.bf16.gmra.mrb[84].mxu1 %v7639_v56  ;;  %v243_v56 = vld [vmem:[%s8569_s0 + $0x6c0] sm:$0xff] }
 0x1eb   :  { %2361 = vmatprep.mubr.bf16.mxu0 %v6056_v1  ;;  %2940 = vmatprep.mubr.bf16.mxu1 %v7641_v34  ;;  %v250_v34 = vld [vmem:[%s8569_s0 + $0x6f8] sm:$0xff] }
 0x1ec   :  { %v7979_v30 = vpack.c.bf16 %v250_v34, %v243_v56  ;;  %v6000_v56 = vld [vmem:[%s8570_s3 + $0x124] ss:$8 sps:$4 sm:$0xff]  }
 0x1f2   :  { %4766 = vmatmul.mubr.msk.bf16.gmra.mrb[56].mxu0 %vm1561_vm0, %v7966_v62  ;;  %2941 = vmatmul.mubr.bf16.gmra.mrb[88].mxu1 %v7659_v12  ;;  %v561_v12 = vlaneseq }
 0x1f3   :  { %2371 = vmatprep.mubr.bf16.mxu0 %v6056_v1  ;;  %2950 = vmatprep.mubr.bf16.mxu1 %v7661_v47 }
 0x1f4   :  { %v8015_v47 = vshrl.u32 %v561_v12, 7 }
 0x1fa   :  { %4767 = vmatmul.mubr.msk.bf16.gmra.mrb[60].mxu0 %vm1561_vm0, %v7979_v30  ;;  %2951 = vmatmul.mubr.bf16.gmra.mrb[92].mxu1 %v7673_v37  ;;  %v563_v37 = vsub.s32 0, %v8015_v47 }
 0x1fb   :  { %2993 = vmatprep.mubr.bf16.mxu1 %v6056_v1 }
 0x202   :  { %4768 = vmatmul.mubr.msk.bf16.vlgmr.msra.gmra.mrb[32].mxu1 %vm1561_vm0, %v7685_v27  ;;  %v8021_v27 = vld [vmem:[%s8571_s2] sm:$0xf] }
 0x203   :  { %3003 = vmatprep.mubr.bf16.mxu1 %v6056_v1 }
 0x20a   :  { %4769 = vmatmul.mubr.msk.bf16.gmra.mrb[36].mxu1 %vm1561_vm0, %v7713_v53  ;;  %v567_v53 = vsub.s32 1, %v8015_v47 }
 0x20b   :  { %3013 = vmatprep.mubr.bf16.mxu1 %v6056_v1 }
 0x212   :  { %4770 = vmatmul.mubr.msk.bf16.gmra.mrb[40].mxu1 %vm1561_vm0, %v7738_v50  ;;  %v8030_v50 = vrot.slane %v8021_v27, %v563_v37 }
 0x213   :  { %3023 = vmatprep.mubr.bf16.mxu1 %v6056_v1 }
 0x21a   :  { %4771 = vmatmul.mubr.msk.bf16.gmra.mrb[44].mxu1 %vm1561_vm0, %v7763_v46  ;;  %v8035_v46 = vrot.slane %v8021_v27, %v567_v53 }
 0x21b   :  { %3033 = vmatprep.mubr.bf16.mxu1 %v6056_v1 }
 0x222   :  { %4772 = vmatmul.mubr.msk.bf16.gmra.mrb[48].mxu1 %vm1561_vm0, %v7788_v24 }
 0x223   :  { %3043 = vmatprep.mubr.bf16.mxu1 %v6056_v1 }
 0x22a   :  { %4773 = vmatmul.mubr.msk.bf16.gmra.mrb[52].mxu1 %vm1561_vm0, %v7810_v60 }
 0x22b   :  { %3053 = vmatprep.mubr.bf16.mxu1 %v6056_v1 }
 0x232   :  { %4774 = vmatmul.mubr.msk.bf16.gmra.mrb[56].mxu1 %vm1561_vm0, %v7829_v20 }
 0x233   :  { %3063 = vmatprep.mubr.bf16.mxu1 %v6056_v1 }
 0x23a   :  { %4775 = vmatmul.mubr.msk.bf16.gmra.mrb[60].mxu1 %vm1561_vm0, %v7848_v58 }
 0x23b   :  { %3073 = vmatprep.mubr.bf16.mxu1 %v6056_v1 }
 0x242   :  { %4776 = vmatmul.mubr.msk.bf16.gmra.mrb[64].mxu1 %vm1561_vm0, %v7867_v51 }
 0x243   :  { %3083 = vmatprep.mubr.bf16.mxu1 %v6056_v1 }
 0x24a   :  { %4777 = vmatmul.mubr.msk.bf16.gmra.mrb[68].mxu1 %vm1561_vm0, %v7886_v13 }
 0x24b   :  { %3093 = vmatprep.mubr.bf16.mxu1 %v6056_v1 }
 0x252   :  { %4778 = vmatmul.mubr.msk.bf16.gmra.mrb[72].mxu1 %vm1561_vm0, %v7905_v43 }
 0x253   :  { %3103 = vmatprep.mubr.bf16.mxu1 %v6056_v1 }
 0x255   :  { %v2223_v24 = vpop.f32.mrb[0].mxu0 }
 0x256   :  { %v5009_v60 = vadd.f32 %v2223_v24, %v8030_v50  ;;  %v2225_v20 = vpop.f32.mrb[1].mxu0 }
 0x257   :  { %v5010_v58 = vadd.f32 %v2225_v20, %v8035_v46  ;;  %v2227_v51 = vpop.f32.mrb[2].mxu0 }
 0x258   :  { %v5011_v10 = vadd.f32 %v2227_v51, %v8030_v50  ;;  %v2229_v22 = vpop.f32.mrb[3].mxu0  ;;  %v3154_v25 = vmax.f32 %v5009_v60, 0.0 }
 0x259   :  { %v5012_v9 = vadd.f32 %v2229_v22, %v8035_v46  ;;  %v3155_v54 = vmax.f32 %v5010_v58, 0.0  ;;  %v5998_v58 = vld [vmem:[%s8570_s3 + $0x120] ss:$8 sps:$4 sm:$0xff]  }
 0x25a   :  { %v3158_v13 = vmax.f32 %v5011_v10, 0.0  ;;  %4779 = vmatmul.mubr.msk.bf16.gmra.mrb[76].mxu1 %vm1561_vm0, %v7918_v36  ;;  %v6003_v10 = vld [vmem:[%s8570_s3 + $0x134] ss:$8 sps:$4 sm:$0xff]  }
 0x25b   :  { %v3159_v61 = vmax.f32 %v5012_v9, 0.0  ;;  %3113 = vmatprep.mubr.bf16.mxu1 %v6056_v1 }
 0x25c   :  { %v3282_v38 = vpack.c.bf16 %v3158_v13, %v3154_v25 }
 0x25d   :  { %v3283_v3 = vpack.c.bf16 %v3159_v61, %v3155_v54  ;;  %v2233_v43 = vpop.f32.mrb[4].mxu0  ;;  %v6001_v61 = vld [vmem:[%s8570_s3 + $0x130] ss:$8 sps:$4 sm:$0xff]  }
 0x25e   :  { %v5013_v52 = vadd.f32 %v2233_v43, %v8030_v50  ;;  %v2235_v33 = vpop.f32.mrb[5].mxu0  ;;  %v6006_v43 = vld [vmem:[%s8570_s3 + $0x144] ss:$8 sps:$4 sm:$0xff]  }
 0x25f   :  { %v5014_v36 = vadd.f32 %v2235_v33, %v8035_v46  ;;  %v2237_v15 = vpop.f32.mrb[6].mxu0  ;;  %3774 = vmatprep.mubr.bf16.mxu0 %v3283_v3 }
 0x260   :  { %v5015_v48 = vadd.f32 %v2237_v15, %v8030_v50  ;;  %v2239_v11 = vpop.f32.mrb[7].mxu0  ;;  %3775 = vmatmul.mubr.bf16.vlgmr.msra.gmra.mrb[64].mxu0 %v3282_v38  ;;  %v3162_v17 = vmax.f32 %v5013_v52, 0.0  ;;  %v6004_v15 = vld [vmem:[%s8570_s3 + $0x140] ss:$8 sps:$4 sm:$0xff]  }
 0x261   :  { %v5016_v5 = vadd.f32 %v2239_v11, %v8035_v46  ;;  %3936 = vmatpush1.bf16.msra.mxu0 %v5992_v31  ;;  %v3163_v34 = vmax.f32 %v5014_v36, 0.0  ;;  %v6009_v11 = vld [vmem:[%s8570_s3 + $0x154] ss:$8 sps:$4 sm:$0xff]  }
 0x262   :  { %v3166_v32 = vmax.f32 %v5015_v48, 0.0  ;;  %4780 = vmatmul.mubr.msk.bf16.gmra.mrb[80].mxu1 %vm1561_vm0, %v7937_v23  ;;  %3937 = vmatprep.subr.bf16.mxu0 %v5997_v39 }
 0x263   :  { %v3167_v12 = vmax.f32 %v5016_v5, 0.0  ;;  %3123 = vmatprep.mubr.bf16.mxu1 %v6056_v1 }
 0x264   :  { %v3286_v24 = vpack.c.bf16 %v3166_v32, %v3162_v17 }
 0x265   :  { %v3287_v60 = vpack.c.bf16 %v3167_v12, %v3163_v34  ;;  %v2243_v20 = vpop.f32.mrb[8].mxu0  ;;  %3938 = vmatpush1.bf16.msra.mxu0 %v5995_v63  ;;  %v6007_v34 = vld [vmem:[%s8570_s3 + $0x150] ss:$8 sps:$4 sm:$0xff]  }
 0x266   :  { %v5017_v51 = vadd.f32 %v2243_v20, %v8030_v50  ;;  %v2245_v23 = vpop.f32.mrb[9].mxu0  ;;  %3939 = vmatprep.subr.bf16.mxu0 %v6000_v56 }
 0x267   :  { %v5018_v22 = vadd.f32 %v2245_v23, %v8035_v46  ;;  %v2247_v9 = vpop.f32.mrb[10].mxu0  ;;  %3784 = vmatprep.mubr.bf16.mxu0 %v3287_v60  ;;  %v6012_v60 = vld [vmem:[%s8570_s3 + $0x164] ss:$8 sps:$4 sm:$0xff]  }
 0x268   :  { %v5019_v25 = vadd.f32 %v2247_v9, %v8030_v50  ;;  %v2249_v13 = vpop.f32.mrb[11].mxu0  ;;  %3785 = vmatmul.mubr.bf16.gmra.mrb[68].mxu0 %v3286_v24  ;;  %v3170_v38 = vmax.f32 %v5017_v51, 0.0 }
 0x269   :  { %v5020_v54 = vadd.f32 %v2249_v13, %v8035_v46  ;;  %3940 = vmatpush1.bf16.msra.mxu0 %v5998_v58  ;;  %v3171_v31 = vmax.f32 %v5018_v22, 0.0  ;;  %v6010_v22 = vld [vmem:[%s8570_s3 + $0x160] ss:$8 sps:$4 sm:$0xff]  }
 0x26a   :  { %v3174_v3 = vmax.f32 %v5019_v25, 0.0  ;;  %4781 = vmatmul.mubr.msk.bf16.gmra.mrb[84].mxu1 %vm1561_vm0, %v7953_v0  ;;  %3941 = vmatprep.subr.bf16.mxu0 %v6003_v10  ;;  %v6015_v25 = vld [vmem:[%s8570_s3 + $0x174] ss:$8 sps:$4 sm:$0xff]  }
 0x26b   :  { %v3175_v52 = vmax.f32 %v5020_v54, 0.0  ;;  %3133 = vmatprep.mubr.bf16.mxu1 %v6056_v1 }
 0x26c   :  { %v3290_v33 = vpack.c.bf16 %v3174_v3, %v3170_v38  ;;  %v6013_v3 = vld [vmem:[%s8570_s3 + $0x170] ss:$8 sps:$4 sm:$0xff]  }
 0x26d   :  { %v3291_v39 = vpack.c.bf16 %v3175_v52, %v3171_v31  ;;  %v2253_v36 = vpop.f32.mrb[12].mxu0  ;;  %3942 = vmatpush1.bf16.msra.mxu0 %v6001_v61  ;;  %v6018_v52 = vld [vmem:[%s8570_s3 + $0x184] ss:$8 sps:$4 sm:$0xff]  }
 0x26e   :  { %v5021_v48 = vadd.f32 %v2253_v36, %v8030_v50  ;;  %v2255_v0 = vpop.f32.mrb[13].mxu0  ;;  %3943 = vmatprep.subr.bf16.mxu0 %v6006_v43 }
 0x26f   :  { %v5022_v5 = vadd.f32 %v2255_v0, %v8035_v46  ;;  %v2257_v63 = vpop.f32.mrb[14].mxu0  ;;  %3794 = vmatprep.mubr.bf16.mxu0 %v3291_v39  ;;  %v6016_v0 = vld [vmem:[%s8570_s3 + $0x180] ss:$8 sps:$4 sm:$0xff]  }
 0x270   :  { %v5023_v17 = vadd.f32 %v2257_v63, %v8030_v50  ;;  %v2259_v32 = vpop.f32.mrb[15].mxu0  ;;  %3795 = vmatmul.mubr.bf16.gmra.mrb[72].mxu0 %v3290_v33  ;;  %v3178_v12 = vmax.f32 %v5021_v48, 0.0 }
 0x271   :  { %v5024_v56 = vadd.f32 %v2259_v32, %v8035_v46  ;;  %3944 = vmatpush1.bf16.msra.mxu0 %v6004_v15  ;;  %v3179_v20 = vmax.f32 %v5022_v5, 0.0 }
 0x272   :  { %v3182_v24 = vmax.f32 %v5023_v17, 0.0  ;;  %4782 = vmatmul.mubr.msk.bf16.gmra.mrb[88].mxu1 %vm1561_vm0, %v7966_v62  ;;  %3945 = vmatprep.subr.bf16.mxu0 %v6009_v11 }
 0x273   :  { %v3183_v58 = vmax.f32 %v5024_v56, 0.0  ;;  %3143 = vmatprep.mubr.bf16.mxu1 %v6056_v1 }
 0x274   :  { %v3294_v51 = vpack.c.bf16 %v3182_v24, %v3178_v12  ;;  %v6019_v12 = vld [vmem:[%s8570_s3 + $0x190] ss:$8 sps:$4 sm:$0xff]  }
 0x275   :  { %v3295_v23 = vpack.c.bf16 %v3183_v58, %v3179_v20  ;;  %v2263_v10 = vpop.f32.mrb[16].mxu0  ;;  %3946 = vmatpush1.bf16.msra.mxu0 %v6007_v34  ;;  %v6024_v20 = vld [vmem:[%s8570_s3 + $0x1a4] ss:$8 sps:$4 sm:$0xff]  }
 0x276   :  { %v5025_v9 = vadd.f32 %v2263_v10, %v8030_v50  ;;  %v2265_v62 = vpop.f32.mrb[17].mxu0  ;;  %3947 = vmatprep.subr.bf16.mxu0 %v6012_v60 }
 0x277   :  { %v5026_v13 = vadd.f32 %v2265_v62, %v8035_v46  ;;  %v2267_v54 = vpop.f32.mrb[18].mxu0  ;;  %3804 = vmatprep.mubr.bf16.mxu0 %v3295_v23 }
 0x278   :  { %v5027_v1 = vadd.f32 %v2267_v54, %v8030_v50  ;;  %v2269_v61 = vpop.f32.mrb[19].mxu0  ;;  %3805 = vmatmul.mubr.bf16.gmra.mrb[76].mxu0 %v3294_v51  ;;  %v3186_v43 = vmax.f32 %v5025_v9, 0.0  ;;  %v6022_v9 = vld [vmem:[%s8570_s3 + $0x1a0] ss:$8 sps:$4 sm:$0xff]  }
 0x279   :  { %v5028_v38 = vadd.f32 %v2269_v61, %v8035_v46  ;;  %3948 = vmatpush1.bf16.msra.mxu0 %v6010_v22  ;;  %v3187_v33 = vmax.f32 %v5026_v13, 0.0  ;;  %v6027_v13 = vld [vmem:[%s8570_s3 + $0x1b4] ss:$8 sps:$4 sm:$0xff]  }
 0x27a   :  { %v3190_v31 = vmax.f32 %v5027_v1, 0.0  ;;  %4783 = vmatmul.mubr.msk.bf16.gmra.mrb[92].mxu1 %vm1561_vm0, %v7979_v30  ;;  %3949 = vmatprep.subr.bf16.mxu0 %v6015_v25  ;;  %v6021_v30 = vld [vmem:[%s8570_s3 + $0x194] ss:$8 sps:$4 sm:$0xff]  }
 0x27b   :  { %v3191_v39 = vmax.f32 %v5028_v38, 0.0 }
 0x27c   :  { %v3298_v36 = vpack.c.bf16 %v3190_v31, %v3186_v43  ;;  %v6025_v43 = vld [vmem:[%s8570_s3 + $0x1b0] ss:$8 sps:$4 sm:$0xff]  }
 0x27d   :  { %v3299_v15 = vpack.c.bf16 %v3191_v39, %v3187_v33  ;;  %v2273_v48 = vpop.f32.mrb[20].mxu0  ;;  %3950 = vmatpush1.bf16.msra.mxu0 %v6013_v3  ;;  %v6030_v33 = vld [vmem:[%s8570_s3 + $0x1c4] ss:$8 sps:$4 sm:$0xff]  }
 0x27e   :  { %v5029_v11 = vadd.f32 %v2273_v48, %v8030_v50  ;;  %v2275_v5 = vpop.f32.mrb[21].mxu0  ;;  %3951 = vmatprep.subr.bf16.mxu0 %v6018_v52 }
 0x27f   :  { %v5030_v63 = vadd.f32 %v2275_v5, %v8035_v46  ;;  %v2277_v17 = vpop.f32.mrb[22].mxu0  ;;  %3814 = vmatprep.mubr.bf16.mxu0 %v3299_v15 }
 0x280   :  { %v5031_v32 = vadd.f32 %v2277_v17, %v8030_v50  ;;  %v2279_v56 = vpop.f32.mrb[23].mxu0  ;;  %3815 = vmatmul.mubr.bf16.gmra.mrb[80].mxu0 %v3298_v36  ;;  %v3194_v24 = vmax.f32 %v5029_v11, 0.0  ;;  %v6028_v11 = vld [vmem:[%s8570_s3 + $0x1c0] ss:$8 sps:$4 sm:$0xff]  }
 0x281   :  { %v5032_v34 = vadd.f32 %v2279_v56, %v8035_v46  ;;  %3952 = vmatpush1.bf16.msra.mxu0 %v6016_v0  ;;  %v3195_v58 = vmax.f32 %v5030_v63, 0.0  ;;  %v6033_v63 = vld [vmem:[%s8570_s3 + $0x1d4] ss:$8 sps:$4 sm:$0xff]  }
 0x282   :  { %v3198_v60 = vmax.f32 %v5031_v32, 0.0  ;;  %3953 = vmatprep.subr.bf16.mxu0 %v6021_v30 }
 0x283   :  { %v3199_v51 = vmax.f32 %v5032_v34, 0.0 }
 0x284   :  { %v3302_v23 = vpack.c.bf16 %v3198_v60, %v3194_v24  ;;  %v6031_v24 = vld [vmem:[%s8570_s3 + $0x1d0] ss:$8 sps:$4 sm:$0xff]  }
 0x285   :  { %v3303_v10 = vpack.c.bf16 %v3199_v51, %v3195_v58  ;;  %v2283_v22 = vpop.f32.mrb[24].mxu0  ;;  %3954 = vmatpush1.bf16.msra.mxu0 %v6019_v12  ;;  %v6036_v58 = vld [vmem:[%s8570_s3 + $0x1e4] ss:$8 sps:$4 sm:$0xff]  }
 0x286   :  { %v5033_v62 = vadd.f32 %v2283_v22, %v8030_v50  ;;  %v2285_v25 = vpop.f32.mrb[25].mxu0  ;;  %3955 = vmatprep.subr.bf16.mxu0 %v6024_v20 }
 0x287   :  { %v5034_v54 = vadd.f32 %v2285_v25, %v8035_v46  ;;  %v2287_v1 = vpop.f32.mrb[26].mxu0  ;;  %3824 = vmatprep.mubr.bf16.mxu0 %v3303_v10  ;;  %v1725_v10 = vadd.f32 %v7309_v49, %v8030_v50  ;;  %v6039_v49 = vld [vmem:[%s8570_s3 + $0x1f4] ss:$8 sps:$4 sm:$0xff]  }
 0x288   :  { %v5035_v61 = vadd.f32 %v2287_v1, %v8030_v50  ;;  %v2289_v38 = vpop.f32.mrb[27].mxu0  ;;  %3825 = vmatmul.mubr.bf16.gmra.mrb[84].mxu0 %v3302_v23  ;;  %v3202_v31 = vmax.f32 %v5033_v62, 0.0 }
 0x289   :  { %v5036_v3 = vadd.f32 %v2289_v38, %v8035_v46  ;;  %3956 = vmatpush1.bf16.msra.mxu0 %v6022_v9  ;;  %v3203_v39 = vmax.f32 %v5034_v54, 0.0  ;;  %v1727_v9 = vadd.f32 %v7314_v19, %v8035_v46  ;;  %v1729_v54 = vadd.f32 %v7318_v16, %v8030_v50  ;;  %v6037_v16 = vld [vmem:[%s8570_s3 + $0x1f0] ss:$8 sps:$4 sm:$0xff]  }
 0x28a   :  { %v3206_v52 = vmax.f32 %v5035_v61, 0.0  ;;  %3957 = vmatprep.subr.bf16.mxu0 %v6027_v13  ;;  %v6034_v13 = vld [vmem:[%s8570_s3 + $0x1e0] ss:$8 sps:$4 sm:$0xff]   ;;  %v1731_v19 = vadd.f32 %v7322_v6, %v8035_v46  ;;  %v1735_v6 = vadd.f32 %v7349_v44, %v8030_v50 }
 0x28b   :  { %v3207_v36 = vmax.f32 %v5036_v3, 0.0 }
 0x28c   :  { %v3306_v15 = vpack.c.bf16 %v3206_v52, %v3202_v31 }
 0x28d   :  { %v3307_v48 = vpack.c.bf16 %v3207_v36, %v3203_v39  ;;  %v2293_v0 = vpop.f32.mrb[28].mxu0  ;;  %3958 = vmatpush1.bf16.msra.mxu0 %v6025_v43 }
 0x28e   :  { %v5037_v5 = vadd.f32 %v2293_v0, %v8030_v50  ;;  %v2295_v30 = vpop.f32.mrb[29].mxu0  ;;  %3959 = vmatprep.subr.bf16.mxu0 %v6030_v33  ;;  %v1737_v0 = vadd.f32 %v7354_v55, %v8035_v46 }
 0x28f   :  { %v5038_v17 = vadd.f32 %v2295_v30, %v8035_v46  ;;  %v2297_v32 = vpop.f32.mrb[30].mxu0  ;;  %3834 = vmatprep.mubr.bf16.mxu0 %v3307_v48  ;;  %v1739_v30 = vadd.f32 %v7358_v26, %v8030_v50 }
 0x290   :  { %v5039_v56 = vadd.f32 %v2297_v32, %v8030_v50  ;;  %v2299_v34 = vpop.f32.mrb[31].mxu0  ;;  %3835 = vmatmul.mubr.bf16.gmra.mrb[88].mxu0 %v3306_v15  ;;  %v3210_v60 = vmax.f32 %v5037_v5, 0.0  ;;  %v1741_v32 = vadd.f32 %v7362_v35, %v8035_v46 }
 0x291   :  { %v5040_v12 = vadd.f32 %v2299_v34, %v8035_v46  ;;  %3960 = vmatpush1.bf16.msra.mxu0 %v6028_v11  ;;  %v3211_v51 = vmax.f32 %v5038_v17, 0.0 }
 0x292   :  { %v3214_v20 = vmax.f32 %v5039_v56, 0.0  ;;  %3961 = vmatprep.subr.bf16.mxu0 %v6033_v63 }
 0x293   :  { %v3215_v23 = vmax.f32 %v5040_v12, 0.0 }
 0x294   :  { %v3310_v22 = vpack.c.bf16 %v3214_v20, %v3210_v60 }
 0x295   :  { %v3311_v62 = vpack.c.bf16 %v3215_v23, %v3211_v51  ;;  %v2303_v25 = vpop.f32.mrb[32].mxu0  ;;  %3962 = vmatpush1.bf16.msra.mxu0 %v6031_v24  ;;  %v1745_v51 = vadd.f32 %v7389_v59, %v8030_v50  ;;  %v1747_v23 = vadd.f32 %v7394_v21, %v8035_v46 }
 0x296   :  { %v5042_v1 = vadd.f32 %v2303_v25, %v1725_v10  ;;  %v2305_v61 = vpop.f32.mrb[33].mxu0  ;;  %3963 = vmatprep.subr.bf16.mxu0 %v6036_v58  ;;  %v1751_v25 = vadd.f32 %v7402_v40, %v8035_v46 }
 0x297   :  { %v5044_v38 = vadd.f32 %v2305_v61, %v1727_v9  ;;  %v2307_v3 = vpop.f32.mrb[34].mxu0  ;;  %3844 = vmatprep.mubr.bf16.mxu0 %v3311_v62 }
 0x298   :  { %v5046_v43 = vadd.f32 %v2307_v3, %v1729_v54  ;;  %v2309_v31 = vpop.f32.mrb[35].mxu0  ;;  %3845 = vmatmul.mubr.bf16.gmra.mrb[92].mxu0 %v3310_v22  ;;  %v3218_v33 = vmax.f32 %v5042_v1, 0.0  ;;  %v1749_v22 = vadd.f32 %v7398_v7, %v8030_v50  ;;  %v1755_v3 = vadd.f32 %v7429_v57, %v8030_v50 }
 0x299   :  { %v5048_v52 = vadd.f32 %v2309_v31, %v1731_v19  ;;  %3964 = vmatpush1.bf16.msra.mxu0 %v6034_v13  ;;  %v3219_v36 = vmax.f32 %v5044_v38, 0.0 }
 0x29a   :  { %v3222_v39 = vmax.f32 %v5046_v43, 0.0  ;;  %3965 = vmatprep.subr.bf16.mxu0 %v6039_v49  ;;  %v1757_v43 = vadd.f32 %v7434_v4, %v8035_v46 }
 0x29b   :  { %v3223_v15 = vmax.f32 %v5048_v52, 0.0  ;;  %v1759_v52 = vadd.f32 %v7438_v2, %v8030_v50 }
 0x29c   :  { %v3314_v48 = vpack.c.bf16 %v3222_v39, %v3218_v33  ;;  %v1761_v39 = vadd.f32 %v7442_v14, %v8035_v46 }
 0x29d   :  { %v3315_v11 = vpack.c.bf16 %v3223_v15, %v3219_v36  ;;  %v2313_v5 = vpop.f32.mrb[36].mxu0  ;;  %3966 = vmatpush1.bf16.msra.mxu0 %v6037_v16 }
 0x29e   :  { %v5050_v63 = vadd.f32 %v2313_v5, %v1735_v6  ;;  %v2315_v17 = vpop.f32.mrb[37].mxu0 }
 0x29f   :  { %v5052_v56 = vadd.f32 %v2315_v17, %v1737_v0  ;;  %v2317_v34 = vpop.f32.mrb[38].mxu0  ;;  %3854 = vmatprep.mubr.bf16.mxu0 %v3315_v11 }
 0x2a0   :  { %v5054_v12 = vadd.f32 %v2317_v34, %v1739_v30  ;;  %v2319_v44 = vpop.f32.mrb[39].mxu0  ;;  %3855 = vmatmul.mubr.bf16.gmra.mrb[96].mxu0 %v3314_v48  ;;  %v3226_v60 = vmax.f32 %v5050_v63, 0.0  ;;  %v1765_v30 = vadd.f32 %v7469_v8, %v8030_v50  ;;  %v1767_v63 = vadd.f32 %v7474_v29, %v8035_v46 }
 0x2a1   :  { %v5056_v24 = vadd.f32 %v2319_v44, %v1741_v32  ;;  %v3227_v20 = vmax.f32 %v5052_v56, 0.0  ;;  %v1769_v32 = vadd.f32 %v7478_v41, %v8030_v50 }
 0x2a2   :  { %v3230_v55 = vmax.f32 %v5054_v12, 0.0  ;;  %v8585_v12 = vld [vmem:[#allocation2_spill] sm:$0xff] }
 0x2a3   :  { %v3231_v58 = vmax.f32 %v5056_v24, 0.0  ;;  %v1771_v44 = vadd.f32 %v8585_v12, %v8035_v46 }
 0x2a4   :  { %v3318_v26 = vpack.c.bf16 %v3230_v55, %v3226_v60 }
 0x2a5   :  { %v3319_v10 = vpack.c.bf16 %v3231_v58, %v3227_v20  ;;  %v2323_v35 = vpop.f32.mrb[40].mxu0 }
 0x2a6   :  { %v5058_v9 = vadd.f32 %v2323_v35, %v1745_v51  ;;  %v2325_v62 = vpop.f32.mrb[41].mxu0 }
 0x2a7   :  { %v5060_v13 = vadd.f32 %v2325_v62, %v1747_v23  ;;  %v2327_v54 = vpop.f32.mrb[42].mxu0  ;;  %3864 = vmatprep.mubr.bf16.mxu0 %v3319_v10  ;;  %v1775_v23 = vadd.f32 %v7509_v28, %v8030_v50  ;;  %v1777_v10 = vadd.f32 %v7514_v45, %v8035_v46  ;;  %v6040_v45 = vld [vmem:[%s8572_s5 + $0x40] sm:$0xff]  }
 0x2a8   :  { %v5062_v1 = vadd.f32 %v2327_v54, %v1749_v22  ;;  %v2329_v61 = vpop.f32.mrb[43].mxu0  ;;  %3865 = vmatmul.mubr.bf16.gmra.mrb[100].mxu0 %v3318_v26  ;;  %v3234_v49 = vmax.f32 %v5058_v9, 0.0  ;;  %v1779_v9 = vadd.f32 %v7518_v42, %v8030_v50  ;;  %4865 = vmatprep.subr.bf16.mxu1 %v6040_v45 }
 0x2a9   :  { %v5064_v59 = vadd.f32 %v2329_v61, %v1751_v25  ;;  %v3235_v21 = vmax.f32 %v5060_v13, 0.0  ;;  %v8586_v13 = vld [vmem:[#allocation3_spill] sm:$0xff] }
 0x2aa   :  { %v3238_v19 = vmax.f32 %v5062_v1, 0.0  ;;  %v1781_v54 = vadd.f32 %v8586_v13, %v8035_v46 }
 0x2ab   :  { %v3239_v38 = vmax.f32 %v5064_v59, 0.0 }
 0x2ac   :  { %v3322_v7 = vpack.c.bf16 %v3238_v19, %v3234_v49 }
 0x2ad   :  { %v3323_v31 = vpack.c.bf16 %v3239_v38, %v3235_v21  ;;  %v2333_v40 = vpop.f32.mrb[44].mxu0 }
 0x2ae   :  { %v5066_v16 = vadd.f32 %v2333_v40, %v1755_v3  ;;  %v2335_v33 = vpop.f32.mrb[45].mxu0  ;;  %v8587_v3 = vld [vmem:[#allocation4_spill] sm:$0xff]  ;;  %v8588_v40 = vld [vmem:[#allocation5_spill] sm:$0xff] }
 0x2af   :  { %v5068_v36 = vadd.f32 %v2335_v33, %v1757_v43  ;;  %v2337_v15 = vpop.f32.mrb[46].mxu0  ;;  %3874 = vmatprep.mubr.bf16.mxu0 %v3323_v31  ;;  %v6041_v31 = vld [vmem:[%s8572_s5] sm:$0xff]  }
 0x2b0   :  { %v5070_v6 = vadd.f32 %v2337_v15, %v1759_v52  ;;  %v2339_v48 = vpop.f32.mrb[47].mxu0  ;;  %3875 = vmatmul.mubr.bf16.gmra.mrb[104].mxu0 %v3322_v7  ;;  %v3242_v0 = vmax.f32 %v5066_v16, 0.0  ;;  %v1785_v7 = vadd.f32 %v8587_v3, %v8030_v50  ;;  %v1787_v52 = vadd.f32 %v8588_v40, %v8035_v46  ;;  %4866 = vmatpush3.bf16.msra.mxu1 %v6041_v31  ;;  %v6046_v3 = vld [vmem:[%s8572_s5 + $0x58] sm:$0xff]  }
 0x2b1   :  { %v5072_v57 = vadd.f32 %v2339_v48, %v1761_v39  ;;  %v3243_v4 = vmax.f32 %v5068_v36, 0.0  ;;  %v8589_v39 = vld [vmem:[#allocation6_spill] sm:$0xff]  ;;  %v8590_v48 = vld [vmem:[#allocation7_spill] sm:$0xff] }
 0x2b2   :  { %v3246_v11 = vmax.f32 %v5070_v6, 0.0  ;;  %v1789_v36 = vadd.f32 %v8589_v39, %v8030_v50  ;;  %v6048_v39 = vld [vmem:[%s8572_s5 + $0x60] sm:$0xff]  }
 0x2b3   :  { %v3247_v5 = vmax.f32 %v5072_v57, 0.0  ;;  %v1791_v57 = vadd.f32 %v8590_v48, %v8035_v46 }
 0x2b4   :  { %v3326_v2 = vpack.c.bf16 %v3246_v11, %v3242_v0 }
 0x2b5   :  { %v3327_v17 = vpack.c.bf16 %v3247_v5, %v3243_v4  ;;  %v2343_v14 = vpop.f32.mrb[48].mxu0 }
 0x2b6   :  { %v5074_v56 = vadd.f32 %v2343_v14, %v1765_v30  ;;  %v2345_v34 = vpop.f32.mrb[49].mxu0 }
 0x2b7   :  { %v5076_v24 = vadd.f32 %v2345_v34, %v1767_v63  ;;  %v2347_v60 = vpop.f32.mrb[50].mxu0  ;;  %3884 = vmatprep.mubr.bf16.mxu0 %v3327_v17  ;;  %v8591_v34 = vld [vmem:[#allocation8_spill] sm:$0xff] }
 0x2b8   :  { %v5078_v55 = vadd.f32 %v2347_v60, %v1769_v32  ;;  %v2349_v20 = vpop.f32.mrb[51].mxu0  ;;  %3885 = vmatmul.mubr.bf16.gmra.mrb[108].mxu0 %v3326_v2  ;;  %v3250_v58 = vmax.f32 %v5074_v56, 0.0  ;;  %v1795_v32 = vadd.f32 %v7568_v18, %v8030_v50  ;;  %v1797_v12 = vadd.f32 %v8591_v34, %v8035_v46  ;;  %v8592_v60 = vld [vmem:[#allocation9_spill] sm:$0xff] }
 0x2b9   :  { %v5080_v8 = vadd.f32 %v2349_v20, %v1771_v44  ;;  %v3251_v29 = vmax.f32 %v5076_v24, 0.0  ;;  %v575_v18 = vsub.s32 3, %v8015_v47 }
 0x2ba   :  { %v3254_v51 = vmax.f32 %v5078_v55, 0.0  ;;  %v1799_v55 = vadd.f32 %v8592_v60, %v8030_v50  ;;  %v6042_v50 = vld [vmem:[%s8572_s5 + $0x48] sm:$0xff]  }
 0x2bb   :  { %v3255_v26 = vmax.f32 %v5080_v8, 0.0  ;;  %v8255_v13 = vrot.slane %v8021_v27, %v575_v18  ;;  %4867 = vmatprep.subr.bf16.mxu1 %v6042_v50  ;;  %v6055_v50 = vld [vmem:[%s8572_s5 + $0x38] sm:$0xff]  }
 0x2bc   :  { %v3330_v41 = vpack.c.bf16 %v3254_v51, %v3250_v58  ;;  %v571_v58 = vsub.s32 2, %v8015_v47  ;;  %v8593_v51 = vld [vmem:[#allocation10_spill] sm:$0xff] }
 0x2bd   :  { %v3331_v35 = vpack.c.bf16 %v3255_v26, %v3251_v29  ;;  %v2353_v22 = vpop.f32.mrb[52].mxu0  ;;  %v1801_v29 = vadd.f32 %v8593_v51, %v8035_v46 }
 0x2be   :  { %v5082_v62 = vadd.f32 %v2353_v22, %v1775_v23  ;;  %v2355_v25 = vpop.f32.mrb[53].mxu0 }
 0x2bf   :  { %v5084_v1 = vadd.f32 %v2355_v25, %v1777_v10  ;;  %v2357_v61 = vpop.f32.mrb[54].mxu0  ;;  %3894 = vmatprep.mubr.bf16.mxu0 %v3331_v35 }
 0x2c0   :  { %v5086_v59 = vadd.f32 %v2357_v61, %v1779_v9  ;;  %v2359_v49 = vpop.f32.mrb[55].mxu0  ;;  %3895 = vmatmul.mubr.bf16.gmra.mrb[112].mxu0 %v3330_v41  ;;  %v3258_v28 = vmax.f32 %v5082_v62, 0.0  ;;  %v8252_v62 = vrot.slane %v8021_v27, %v571_v58  ;;  %v6053_v58 = vld [vmem:[%s8572_s5 + $0x30] sm:$0xff]  }
 0x2c1   :  { %v5088_v19 = vadd.f32 %v2359_v49, %v1781_v54  ;;  %v3259_v38 = vmax.f32 %v5084_v1, 0.0  ;;  %v6043_v1 = vld [vmem:[%s8572_s5 + $0x8] sm:$0xff]  }
 0x2c2   :  { %v3262_v21 = vmax.f32 %v5086_v59, 0.0  ;;  %4868 = vmatpush3.bf16.msra.mxu1 %v6043_v1 }
 0x2c3   :  { %v3263_v42 = vmax.f32 %v5088_v19, 0.0 }
 0x2c4   :  { %v3334_v43 = vpack.c.bf16 %v3262_v21, %v3258_v28 }
 0x2c5   :  { %v3335_v16 = vpack.c.bf16 %v3263_v42, %v3259_v38  ;;  %v2363_v33 = vpop.f32.mrb[56].mxu0  ;;  %v6044_v38 = vld [vmem:[%s8572_s5 + $0x50] sm:$0xff]  }
 0x2c6   :  { %v5090_v15 = vadd.f32 %v2363_v33, %v1785_v7  ;;  %v2365_v6 = vpop.f32.mrb[57].mxu0  ;;  %v6045_v42 = vld [vmem:[%s8572_s5 + $0x10] sm:$0xff]   ;;  %4869 = vmatprep.subr.bf16.mxu1 %v6044_v38 }
 0x2c7   :  { %v5092_v0 = vadd.f32 %v2365_v6, %v1787_v52  ;;  %v2367_v11 = vpop.f32.mrb[58].mxu0  ;;  %3904 = vmatprep.mubr.bf16.mxu0 %v3335_v16  ;;  %4870 = vmatpush3.bf16.msra.mxu1 %v6045_v42  ;;  %v6047_v16 = vld [vmem:[%s8572_s5 + $0x18] sm:$0xff]  }
 0x2c8   :  { %v5094_v4 = vadd.f32 %v2367_v11, %v1789_v36  ;;  %v2369_v5 = vpop.f32.mrb[59].mxu0  ;;  %3905 = vmatmul.mubr.bf16.gmra.mrb[116].mxu0 %v3334_v43  ;;  %v3266_v2 = vmax.f32 %v5090_v15, 0.0  ;;  %4871 = vmatprep.subr.bf16.mxu1 %v6046_v3  ;;  %v6049_v11 = vld [vmem:[%s8572_s5 + $0x20] sm:$0xff]  }
 0x2c9   :  { %v5096_v30 = vadd.f32 %v2369_v5, %v1791_v57  ;;  %v3267_v17 = vmax.f32 %v5092_v0, 0.0 }
 0x2ca   :  { %v3270_v63 = vmax.f32 %v5094_v4, 0.0 }
 0x2cb   :  { %v3271_v14 = vmax.f32 %v5096_v30, 0.0  ;;  %4872 = vmatpush3.bf16.msra.mxu1 %v6047_v16  ;;  %v6050_v30 = vld [vmem:[%s8572_s5 + $0x68] sm:$0xff]  }
 0x2cc   :  { %v3338_v56 = vpack.c.bf16 %v3270_v63, %v3266_v2  ;;  %4873 = vmatprep.subr.bf16.mxu1 %v6048_v39 }
 0x2cd   :  { %v3339_v44 = vpack.c.bf16 %v3271_v14, %v3267_v17  ;;  %v2373_v24 = vpop.f32.mrb[60].mxu0 }
 0x2ce   :  { %v5098_v20 = vadd.f32 %v2373_v24, %v1795_v32  ;;  %v2375_v8 = vpop.f32.mrb[61].mxu0 }
 0x2cf   :  { %v5100_v26 = vadd.f32 %v2375_v8, %v1797_v12  ;;  %v2377_v23 = vpop.f32.mrb[62].mxu0  ;;  %3914 = vmatprep.mubr.bf16.mxu0 %v3339_v44  ;;  %4874 = vmatpush3.bf16.msra.mxu1 %v6049_v11  ;;  %v6052_v12 = vld [vmem:[%s8572_s5 + $0x70] sm:$0xff]  }
 0x2d0   :  { %v5102_v41 = vadd.f32 %v2377_v23, %v1799_v55  ;;  %v2379_v10 = vpop.f32.mrb[63].mxu0  ;;  %3915 = vmatmul.mubr.bf16.gmra.mrb[120].mxu0 %v3338_v56  ;;  %v3274_v22 = vmax.f32 %v5098_v20, 0.0  ;;  %v6051_v56 = vld [vmem:[%s8572_s5 + $0x28] sm:$0xff]   ;;  %4875 = vmatprep.subr.bf16.mxu1 %v6050_v30 }
 0x2d1   :  { %v5104_v35 = vadd.f32 %v2379_v10, %v1801_v29  ;;  %v3275_v25 = vmax.f32 %v5100_v26, 0.0  ;;  %v6054_v26 = vld [vmem:[%s8572_s5 + $0x78] sm:$0xff]  }
 0x2d2   :  { %v3278_v9 = vmax.f32 %v5102_v41, 0.0 }
 0x2d3   :  { %v3279_v46 = vmax.f32 %v5104_v35, 0.0  ;;  %4876 = vmatpush3.bf16.msra.mxu1 %v6051_v56 }
 0x2d4   :  { %v3342_v54 = vpack.c.bf16 %v3278_v9, %v3274_v22  ;;  %4877 = vmatprep.subr.bf16.mxu1 %v6052_v12 }
 0x2d5   :  { %v3343_v61 = vpack.c.bf16 %v3279_v46, %v3275_v25  ;;  %v2995_v59 = vpop.f32.mrb[32].mxu1 }
 0x2d6   :  { %v5105_v49 = vadd.f32 %v2995_v59, %v8252_v62  ;;  %v2997_v28 = vpop.f32.mrb[33].mxu1 }
 0x2d7   :  { %v5106_v19 = vadd.f32 %v2997_v28, %v8255_v13  ;;  %v2999_v21 = vpop.f32.mrb[34].mxu1  ;;  %3924 = vmatprep.mubr.bf16.mxu0 %v3343_v61  ;;  %4878 = vmatpush3.bf16.msra.mxu1 %v6053_v58 }
 0x2d8   :  { %v5107_v45 = vadd.f32 %v2999_v21, %v8252_v62  ;;  %v3001_v27 = vpop.f32.mrb[35].mxu1  ;;  %3925 = vmatmul.mubr.bf16.gmra.mrb[124].mxu0 %v3342_v54  ;;  %v3156_v43 = vmax.f32 %v5105_v49, 0.0  ;;  %4879 = vmatprep.subr.bf16.mxu1 %v6054_v26 }
 0x2d9   :  { %v5108_v7 = vadd.f32 %v3001_v27, %v8255_v13  ;;  %v3157_v40 = vmax.f32 %v5106_v19, 0.0 }
 0x2da   :  { %v3160_v31 = vmax.f32 %v5107_v45, 0.0 }
 0x2db   :  { %v3161_v52 = vmax.f32 %v5108_v7, 0.0  ;;  %4880 = vmatpush3.bf16.msra.mxu1 %v6055_v50 }
 0x2dc   :  { %v3284_v33 = vpack.c.bf16 %v3160_v31, %v3156_v43 }
 0x2dd   :  { %v3285_v36 = vpack.c.bf16 %v3161_v52, %v3157_v40  ;;  %v3005_v15 = vpop.f32.mrb[36].mxu1 }
 0x2de   :  { %v5109_v6 = vadd.f32 %v3005_v15, %v8252_v62  ;;  %v3007_v48 = vpop.f32.mrb[37].mxu1 }
 0x2df   :  { %v5110_v57 = vadd.f32 %v3007_v48, %v8255_v13  ;;  %v3009_v0 = vpop.f32.mrb[38].mxu1  ;;  %3967 = vmatprep.mubr.bf16.mxu0 %v3285_v36 }
 0x2e0   :  { %v5111_v4 = vadd.f32 %v3009_v0, %v8252_v62  ;;  %v3011_v5 = vpop.f32.mrb[39].mxu1  ;;  %3968 = vmatmul.mubr.bf16.vlgmr.msra.gmra.mrb[64].mxu0 %v3284_v33  ;;  %v3164_v63 = vmax.f32 %v5109_v6, 0.0 }
 0x2e1   :  { %v5112_v2 = vadd.f32 %v3011_v5, %v8255_v13  ;;  %v3165_v14 = vmax.f32 %v5110_v57, 0.0 }
 0x2e2   :  { %v3168_v17 = vmax.f32 %v5111_v4, 0.0 }
 0x2e3   :  { %v3169_v32 = vmax.f32 %v5112_v2, 0.0 }
 0x2e4   :  { %v3288_v34 = vpack.c.bf16 %v3168_v17, %v3164_v63 }
 0x2e5   :  { %v3289_v44 = vpack.c.bf16 %v3169_v32, %v3165_v14  ;;  %v3015_v24 = vpop.f32.mrb[40].mxu1 }
 0x2e6   :  { %v5113_v60 = vadd.f32 %v3015_v24, %v8252_v62  ;;  %v3017_v55 = vpop.f32.mrb[41].mxu1 }
 0x2e7   :  { %v5114_v20 = vadd.f32 %v3017_v55, %v8255_v13  ;;  %v3019_v8 = vpop.f32.mrb[42].mxu1  ;;  %3977 = vmatprep.mubr.bf16.mxu0 %v3289_v44 }
 0x2e8   :  { %v5115_v51 = vadd.f32 %v3019_v8, %v8252_v62  ;;  %v3021_v29 = vpop.f32.mrb[43].mxu1  ;;  %3978 = vmatmul.mubr.bf16.gmra.mrb[68].mxu0 %v3288_v34  ;;  %v3172_v18 = vmax.f32 %v5113_v60, 0.0 }
 0x2e9   :  { %v5116_v23 = vadd.f32 %v3021_v29, %v8255_v13  ;;  %v3173_v10 = vmax.f32 %v5114_v20, 0.0 }
 0x2ea   :  { %v3176_v41 = vmax.f32 %v5115_v51, 0.0 }
 0x2eb   :  { %v3177_v35 = vmax.f32 %v5116_v23, 0.0 }
 0x2ec   :  { %v3292_v22 = vpack.c.bf16 %v3176_v41, %v3172_v18 }
 0x2ed   :  { %v3293_v9 = vpack.c.bf16 %v3177_v35, %v3173_v10  ;;  %v3025_v25 = vpop.f32.mrb[44].mxu1 }
 0x2ee   :  { %v5117_v46 = vadd.f32 %v3025_v25, %v8252_v62  ;;  %v3027_v54 = vpop.f32.mrb[45].mxu1 }
 0x2ef   :  { %v5118_v1 = vadd.f32 %v3027_v54, %v8255_v13  ;;  %v3029_v61 = vpop.f32.mrb[46].mxu1  ;;  %3987 = vmatprep.mubr.bf16.mxu0 %v3293_v9 }
 0x2f0   :  { %v5119_v59 = vadd.f32 %v3029_v61, %v8252_v62  ;;  %v3031_v49 = vpop.f32.mrb[47].mxu1  ;;  %3988 = vmatmul.mubr.bf16.gmra.mrb[72].mxu0 %v3292_v22  ;;  %v3180_v19 = vmax.f32 %v5117_v46, 0.0 }
 0x2f1   :  { %v5120_v28 = vadd.f32 %v3031_v49, %v8255_v13  ;;  %v3181_v45 = vmax.f32 %v5118_v1, 0.0 }
 0x2f2   :  { %v3184_v21 = vmax.f32 %v5119_v59, 0.0 }
 0x2f3   :  { %v3185_v27 = vmax.f32 %v5120_v28, 0.0 }
 0x2f4   :  { %v3296_v38 = vpack.c.bf16 %v3184_v21, %v3180_v19 }
 0x2f5   :  { %v3297_v42 = vpack.c.bf16 %v3185_v27, %v3181_v45  ;;  %v3035_v3 = vpop.f32.mrb[48].mxu1 }
 0x2f6   :  { %v5121_v7 = vadd.f32 %v3035_v3, %v8252_v62  ;;  %v3037_v43 = vpop.f32.mrb[49].mxu1 }
 0x2f7   :  { %v5122_v31 = vadd.f32 %v3037_v43, %v8255_v13  ;;  %v3039_v40 = vpop.f32.mrb[50].mxu1  ;;  %3997 = vmatprep.mubr.bf16.mxu0 %v3297_v42 }
 0x2f8   :  { %v5123_v52 = vadd.f32 %v3039_v40, %v8252_v62  ;;  %v3041_v16 = vpop.f32.mrb[51].mxu1  ;;  %3998 = vmatmul.mubr.bf16.gmra.mrb[76].mxu0 %v3296_v38  ;;  %v3188_v39 = vmax.f32 %v5121_v7, 0.0 }
 0x2f9   :  { %v5124_v33 = vadd.f32 %v3041_v16, %v8255_v13  ;;  %v3189_v15 = vmax.f32 %v5122_v31, 0.0 }
 0x2fa   :  { %v3192_v36 = vmax.f32 %v5123_v52, 0.0 }
 0x2fb   :  { %v3193_v6 = vmax.f32 %v5124_v33, 0.0 }
 0x2fc   :  { %v3300_v48 = vpack.c.bf16 %v3192_v36, %v3188_v39 }
 0x2fd   :  { %v3301_v57 = vpack.c.bf16 %v3193_v6, %v3189_v15  ;;  %v3045_v0 = vpop.f32.mrb[52].mxu1 }
 0x2fe   :  { %v5125_v11 = vadd.f32 %v3045_v0, %v8252_v62  ;;  %v3047_v4 = vpop.f32.mrb[53].mxu1 }
 0x2ff   :  { %v5126_v5 = vadd.f32 %v3047_v4, %v8255_v13  ;;  %v3049_v30 = vpop.f32.mrb[54].mxu1  ;;  %4007 = vmatprep.mubr.bf16.mxu0 %v3301_v57 }
 0x300   :  { %v5127_v2 = vadd.f32 %v3049_v30, %v8252_v62  ;;  %v3051_v63 = vpop.f32.mrb[55].mxu1  ;;  %4008 = vmatmul.mubr.bf16.gmra.mrb[80].mxu0 %v3300_v48  ;;  %v3196_v14 = vmax.f32 %v5125_v11, 0.0 }
 0x301   :  { %v5128_v17 = vadd.f32 %v3051_v63, %v8255_v13  ;;  %v3197_v56 = vmax.f32 %v5126_v5, 0.0 }
 0x302   :  { %v3200_v32 = vmax.f32 %v5127_v2, 0.0 }
 0x303   :  { %v3201_v34 = vmax.f32 %v5128_v17, 0.0 }
 0x304   :  { %v3304_v12 = vpack.c.bf16 %v3200_v32, %v3196_v14 }
 0x305   :  { %v3305_v44 = vpack.c.bf16 %v3201_v34, %v3197_v56  ;;  %v3055_v24 = vpop.f32.mrb[56].mxu1 }
 0x306   :  { %v5129_v60 = vadd.f32 %v3055_v24, %v8252_v62  ;;  %v3057_v55 = vpop.f32.mrb[57].mxu1 }
 0x307   :  { %v5130_v20 = vadd.f32 %v3057_v55, %v8255_v13  ;;  %v3059_v8 = vpop.f32.mrb[58].mxu1  ;;  %4017 = vmatprep.mubr.bf16.mxu0 %v3305_v44 }
 0x308   :  { %v5131_v58 = vadd.f32 %v3059_v8, %v8252_v62  ;;  %v3061_v51 = vpop.f32.mrb[59].mxu1  ;;  %4018 = vmatmul.mubr.bf16.gmra.mrb[84].mxu0 %v3304_v12  ;;  %v3204_v26 = vmax.f32 %v5129_v60, 0.0 }
 0x309   :  { %v5132_v29 = vadd.f32 %v3061_v51, %v8255_v13  ;;  %v3205_v18 = vmax.f32 %v5130_v20, 0.0 }
 0x30a   :  { %v3208_v23 = vmax.f32 %v5131_v58, 0.0 }
 0x30b   :  { %v3209_v41 = vmax.f32 %v5132_v29, 0.0 }
 0x30c   :  { %v3308_v10 = vpack.c.bf16 %v3208_v23, %v3204_v26 }
 0x30d   :  { %v3309_v35 = vpack.c.bf16 %v3209_v41, %v3205_v18  ;;  %v3065_v50 = vpop.f32.mrb[60].mxu1 }
 0x30e   :  { %v5133_v22 = vadd.f32 %v3065_v50, %v8252_v62  ;;  %v3067_v9 = vpop.f32.mrb[61].mxu1 }
 0x30f   :  { %v5134_v25 = vadd.f32 %v3067_v9, %v8255_v13  ;;  %v3069_v46 = vpop.f32.mrb[62].mxu1  ;;  %4027 = vmatprep.mubr.bf16.mxu0 %v3309_v35 }
 0x310   :  { %v5135_v54 = vadd.f32 %v3069_v46, %v8252_v62  ;;  %v3071_v1 = vpop.f32.mrb[63].mxu1  ;;  %4028 = vmatmul.mubr.bf16.gmra.mrb[88].mxu0 %v3308_v10  ;;  %v3212_v59 = vmax.f32 %v5133_v22, 0.0 }
 0x311   :  { %v5136_v61 = vadd.f32 %v3071_v1, %v8255_v13  ;;  %v3213_v28 = vmax.f32 %v5134_v25, 0.0 }
 0x312   :  { %v3216_v49 = vmax.f32 %v5135_v54, 0.0 }
 0x313   :  { %v3217_v19 = vmax.f32 %v5136_v61, 0.0 }
 0x314   :  { %v3312_v21 = vpack.c.bf16 %v3216_v49, %v3212_v59 }
 0x315   :  { %v3313_v45 = vpack.c.bf16 %v3217_v19, %v3213_v28  ;;  %v3075_v27 = vpop.f32.mrb[64].mxu1 }
 0x316   :  { %v5137_v38 = vadd.f32 %v3075_v27, %v8252_v62  ;;  %v3077_v42 = vpop.f32.mrb[65].mxu1 }
 0x317   :  { %v5138_v3 = vadd.f32 %v3077_v42, %v8255_v13  ;;  %v3079_v7 = vpop.f32.mrb[66].mxu1  ;;  %4037 = vmatprep.mubr.bf16.mxu0 %v3313_v45 }
 0x318   :  { %v5139_v43 = vadd.f32 %v3079_v7, %v8252_v62  ;;  %v3081_v31 = vpop.f32.mrb[67].mxu1  ;;  %4038 = vmatmul.mubr.bf16.gmra.mrb[92].mxu0 %v3312_v21  ;;  %v3220_v52 = vmax.f32 %v5137_v38, 0.0 }
 0x319   :  { %v5140_v40 = vadd.f32 %v3081_v31, %v8255_v13  ;;  %v3221_v33 = vmax.f32 %v5138_v3, 0.0 }
 0x31a   :  { %v3224_v16 = vmax.f32 %v5139_v43, 0.0 }
 0x31b   :  { %v3225_v39 = vmax.f32 %v5140_v40, 0.0 }
 0x31c   :  { %v3316_v36 = vpack.c.bf16 %v3224_v16, %v3220_v52 }
 0x31d   :  { %v3317_v15 = vpack.c.bf16 %v3225_v39, %v3221_v33  ;;  %v3085_v6 = vpop.f32.mrb[68].mxu1 }
 0x31e   :  { %v5141_v48 = vadd.f32 %v3085_v6, %v8252_v62  ;;  %v3087_v57 = vpop.f32.mrb[69].mxu1 }
 0x31f   :  { %v5142_v0 = vadd.f32 %v3087_v57, %v8255_v13  ;;  %v3089_v11 = vpop.f32.mrb[70].mxu1  ;;  %4047 = vmatprep.mubr.bf16.mxu0 %v3317_v15 }
 0x320   :  { %v5143_v4 = vadd.f32 %v3089_v11, %v8252_v62  ;;  %v3091_v5 = vpop.f32.mrb[71].mxu1  ;;  %4048 = vmatmul.mubr.bf16.gmra.mrb[96].mxu0 %v3316_v36  ;;  %v3228_v2 = vmax.f32 %v5141_v48, 0.0 }
 0x321   :  { %v5144_v30 = vadd.f32 %v3091_v5, %v8255_v13  ;;  %v3229_v17 = vmax.f32 %v5142_v0, 0.0 }
 0x322   :  { %v3232_v63 = vmax.f32 %v5143_v4, 0.0 }
 0x323   :  { %v3233_v14 = vmax.f32 %v5144_v30, 0.0 }
 0x324   :  { %v3320_v32 = vpack.c.bf16 %v3232_v63, %v3228_v2 }
 0x325   :  { %v3321_v56 = vpack.c.bf16 %v3233_v14, %v3229_v17  ;;  %v3095_v34 = vpop.f32.mrb[72].mxu1 }
 0x326   :  { %v5145_v12 = vadd.f32 %v3095_v34, %v8252_v62  ;;  %v3097_v44 = vpop.f32.mrb[73].mxu1 }
 0x327   :  { %v5146_v24 = vadd.f32 %v3097_v44, %v8255_v13  ;;  %v3099_v60 = vpop.f32.mrb[74].mxu1  ;;  %4057 = vmatprep.mubr.bf16.mxu0 %v3321_v56 }
 0x328   :  { %v5147_v55 = vadd.f32 %v3099_v60, %v8252_v62  ;;  %v3101_v20 = vpop.f32.mrb[75].mxu1  ;;  %4058 = vmatmul.mubr.bf16.gmra.mrb[100].mxu0 %v3320_v32  ;;  %v3236_v58 = vmax.f32 %v5145_v12, 0.0 }
 0x329   :  { %v5148_v8 = vadd.f32 %v3101_v20, %v8255_v13  ;;  %v3237_v29 = vmax.f32 %v5146_v24, 0.0 }
 0x32a   :  { %v3240_v51 = vmax.f32 %v5147_v55, 0.0 }
 0x32b   :  { %v3241_v26 = vmax.f32 %v5148_v8, 0.0 }
 0x32c   :  { %v3324_v23 = vpack.c.bf16 %v3240_v51, %v3236_v58 }
 0x32d   :  { %v3325_v18 = vpack.c.bf16 %v3241_v26, %v3237_v29  ;;  %v3105_v41 = vpop.f32.mrb[76].mxu1 }
 0x32e   :  { %v5149_v10 = vadd.f32 %v3105_v41, %v8252_v62  ;;  %v3107_v35 = vpop.f32.mrb[77].mxu1 }
 0x32f   :  { %v5150_v50 = vadd.f32 %v3107_v35, %v8255_v13  ;;  %v3109_v22 = vpop.f32.mrb[78].mxu1  ;;  %4067 = vmatprep.mubr.bf16.mxu0 %v3325_v18 }
 0x330   :  { %v5151_v9 = vadd.f32 %v3109_v22, %v8252_v62  ;;  %v3111_v25 = vpop.f32.mrb[79].mxu1  ;;  %4068 = vmatmul.mubr.bf16.gmra.mrb[104].mxu0 %v3324_v23  ;;  %v3244_v54 = vmax.f32 %v5149_v10, 0.0 }
 0x331   :  { %v5152_v46 = vadd.f32 %v3111_v25, %v8255_v13  ;;  %v3245_v61 = vmax.f32 %v5150_v50, 0.0 }
 0x332   :  { %v3248_v1 = vmax.f32 %v5151_v9, 0.0 }
 0x333   :  { %v3249_v59 = vmax.f32 %v5152_v46, 0.0 }
 0x334   :  { %v3328_v49 = vpack.c.bf16 %v3248_v1, %v3244_v54 }
 0x335   :  { %v3329_v28 = vpack.c.bf16 %v3249_v59, %v3245_v61  ;;  %v3115_v19 = vpop.f32.mrb[80].mxu1  ;;  %v3410_v59 = vld [vmem:[%s8573_s4] sm:$0x3] }
 0x336   :  { %v5153_v21 = vadd.f32 %v3115_v19, %v8252_v62  ;;  %v3117_v45 = vpop.f32.mrb[81].mxu1 }
 0x337   :  { %v5154_v27 = vadd.f32 %v3117_v45, %v8255_v13  ;;  %v3119_v38 = vpop.f32.mrb[82].mxu1  ;;  %4077 = vmatprep.mubr.bf16.mxu0 %v3329_v28 }
 0x338   :  { %v5155_v42 = vadd.f32 %v3119_v38, %v8252_v62  ;;  %v3121_v3 = vpop.f32.mrb[83].mxu1  ;;  %4078 = vmatmul.mubr.bf16.gmra.mrb[108].mxu0 %v3328_v49  ;;  %v3252_v43 = vmax.f32 %v5153_v21, 0.0  ;;  %v8365_v49 = vrot.slane %v3410_v59, %v563_v37 }
 0x339   :  { %v5156_v7 = vadd.f32 %v3121_v3, %v8255_v13  ;;  %v3253_v40 = vmax.f32 %v5154_v27, 0.0 }
 0x33a   :  { %v3256_v31 = vmax.f32 %v5155_v42, 0.0 }
 0x33b   :  { %v3257_v52 = vmax.f32 %v5156_v7, 0.0 }
 0x33c   :  { %v3332_v16 = vpack.c.bf16 %v3256_v31, %v3252_v43 }
 0x33d   :  { %v3333_v33 = vpack.c.bf16 %v3257_v52, %v3253_v40  ;;  %v3125_v39 = vpop.f32.mrb[84].mxu1 }
 0x33e   :  { %v5157_v36 = vadd.f32 %v3125_v39, %v8252_v62  ;;  %v3127_v15 = vpop.f32.mrb[85].mxu1 }
 0x33f   :  { %v5158_v6 = vadd.f32 %v3127_v15, %v8255_v13  ;;  %v3129_v48 = vpop.f32.mrb[86].mxu1  ;;  %4087 = vmatprep.mubr.bf16.mxu0 %v3333_v33 }
 0x340   :  { %v5159_v57 = vadd.f32 %v3129_v48, %v8252_v62  ;;  %v3131_v0 = vpop.f32.mrb[87].mxu1  ;;  %4088 = vmatmul.mubr.bf16.gmra.mrb[112].mxu0 %v3332_v16  ;;  %v3260_v4 = vmax.f32 %v5157_v36, 0.0 }
 0x341   :  { %v5160_v11 = vadd.f32 %v3131_v0, %v8255_v13  ;;  %v3261_v30 = vmax.f32 %v5158_v6, 0.0 }
 0x342   :  { %v3264_v5 = vmax.f32 %v5159_v57, 0.0 }
 0x343   :  { %v3265_v2 = vmax.f32 %v5160_v11, 0.0 }
 0x344   :  { %v3336_v63 = vpack.c.bf16 %v3264_v5, %v3260_v4 }
 0x345   :  { %v3337_v17 = vpack.c.bf16 %v3265_v2, %v3261_v30  ;;  %v3135_v14 = vpop.f32.mrb[88].mxu1 }
 0x346   :  { %v5161_v32 = vadd.f32 %v3135_v14, %v8252_v62  ;;  %v3137_v56 = vpop.f32.mrb[89].mxu1 }
 0x347   :  { %v5162_v34 = vadd.f32 %v3137_v56, %v8255_v13  ;;  %v3139_v12 = vpop.f32.mrb[90].mxu1  ;;  %4097 = vmatprep.mubr.bf16.mxu0 %v3337_v17 }
 0x348   :  { %v5163_v44 = vadd.f32 %v3139_v12, %v8252_v62  ;;  %v3141_v24 = vpop.f32.mrb[91].mxu1  ;;  %4098 = vmatmul.mubr.bf16.gmra.mrb[116].mxu0 %v3336_v63  ;;  %v3268_v55 = vmax.f32 %v5161_v32, 0.0 }
 0x349   :  { %v5164_v60 = vadd.f32 %v3141_v24, %v8255_v13  ;;  %v3269_v8 = vmax.f32 %v5162_v34, 0.0 }
 0x34a   :  { %v3272_v20 = vmax.f32 %v5163_v44, 0.0 }
 0x34b   :  { %v3273_v58 = vmax.f32 %v5164_v60, 0.0 }
 0x34c   :  { %v3340_v51 = vpack.c.bf16 %v3272_v20, %v3268_v55 }
 0x34d   :  { %v3341_v29 = vpack.c.bf16 %v3273_v58, %v3269_v8  ;;  %v3145_v26 = vpop.f32.mrb[92].mxu1 }
 0x34e   :  { %v5165_v23 = vadd.f32 %v3145_v26, %v8252_v62  ;;  %v3147_v18 = vpop.f32.mrb[93].mxu1 }
 0x34f   :  { %v5166_v41 = vadd.f32 %v3147_v18, %v8255_v13  ;;  %v3149_v10 = vpop.f32.mrb[94].mxu1  ;;  %4107 = vmatprep.mubr.bf16.mxu0 %v3341_v29 }
 0x350   :  { %v5167_v35 = vadd.f32 %v3149_v10, %v8252_v62  ;;  %v3151_v50 = vpop.f32.mrb[95].mxu1  ;;  %4108 = vmatmul.mubr.bf16.gmra.mrb[120].mxu0 %v3340_v51  ;;  %v3276_v9 = vmax.f32 %v5165_v23, 0.0  ;;  %v8369_v62 = vrot.slane %v3410_v59, %v567_v53 }
 0x351   :  { %v5168_v22 = vadd.f32 %v3151_v50, %v8255_v13  ;;  %v3277_v46 = vmax.f32 %v5166_v41, 0.0 }
 0x352   :  { %v3280_v25 = vmax.f32 %v5167_v35, 0.0 }
 0x353   :  { %v3281_v54 = vmax.f32 %v5168_v22, 0.0 }
 0x354   :  { %v3344_v1 = vpack.c.bf16 %v3280_v25, %v3276_v9 }
 0x355   :  { %v3345_v61 = vpack.c.bf16 %v3281_v54, %v3277_v46 }
 0x357   :  { %4117 = vmatprep.mubr.bf16.mxu0 %v3345_v61 }
 0x358   :  { %4118 = vmatmul.mubr.bf16.gmra.mrb[124].mxu0 %v3344_v1 }
 0x3b3   :  { %v3969_v13 = vpop.f32.mrb[64].mxu0 }
 0x3b4   :  { %v5169_v28 = vadd.f32 %v3969_v13, %v8365_v49  ;;  %v3971_v19 = vpop.f32.mrb[65].mxu0 }
 0x3b5   :  { %v5170_v21 = vadd.f32 %v3971_v19, %v8369_v62  ;;  %v3973_v45 = vpop.f32.mrb[66].mxu0 }
 0x3b6   :  { %v5171_v27 = vadd.f32 %v3973_v45, %v8365_v49  ;;  %v3975_v38 = vpop.f32.mrb[67].mxu0  ;;  %v4128_v3 = vmax.f32 %v5169_v28, 0.0 }
 0x3b7   :  { %v5172_v42 = vadd.f32 %v3975_v38, %v8369_v62  ;;  %v4129_v37 = vmax.f32 %v5170_v21, 0.0 }
 0x3b8   :  { %v4130_v7 = vmax.f32 %v5171_v27, 0.0 }
 0x3b9   :  { %v4131_v43 = vmax.f32 %v5172_v42, 0.0 }
 0x3ba   :  { %v4192_v31 = vpack.c.bf16 %v4130_v7, %v4128_v3 }
 0x3bb   :  { %v4193_v47 = vpack.c.bf16 %v4131_v43, %v4129_v37  ;;  %v3979_v53 = vpop.f32.mrb[68].mxu0 }
 0x3bc   :  { %v5173_v40 = vadd.f32 %v3979_v53, %v8365_v49  ;;  %v3981_v52 = vpop.f32.mrb[69].mxu0 }
 0x3bd   :  { %v5174_v16 = vadd.f32 %v3981_v52, %v8369_v62  ;;  %v3983_v33 = vpop.f32.mrb[70].mxu0  ;;  %4391 = vmatprep.mubr.bf16.mxu1 %v4193_v47 }
 0x3be   :  { %v5175_v39 = vadd.f32 %v3983_v33, %v8365_v49  ;;  %v3985_v36 = vpop.f32.mrb[71].mxu0  ;;  %4392 = vmatmul.mubr.bf16.vlgmr.msra.gmra.mrb[96].mxu1 %v4192_v31  ;;  %v4132_v6 = vmax.f32 %v5173_v40, 0.0 }
 0x3bf   :  { %v5176_v15 = vadd.f32 %v3985_v36, %v8369_v62  ;;  %v4133_v57 = vmax.f32 %v5174_v16, 0.0 }
 0x3c0   :  { %v4134_v48 = vmax.f32 %v5175_v39, 0.0 }
 0x3c1   :  { %v4135_v0 = vmax.f32 %v5176_v15, 0.0 }
 0x3c2   :  { %v4194_v11 = vpack.c.bf16 %v4134_v48, %v4132_v6 }
 0x3c3   :  { %v4195_v4 = vpack.c.bf16 %v4135_v0, %v4133_v57  ;;  %v3989_v5 = vpop.f32.mrb[72].mxu0 }
 0x3c4   :  { %v5177_v30 = vadd.f32 %v3989_v5, %v8365_v49  ;;  %v3991_v2 = vpop.f32.mrb[73].mxu0 }
 0x3c5   :  { %v5178_v63 = vadd.f32 %v3991_v2, %v8369_v62  ;;  %v3993_v17 = vpop.f32.mrb[74].mxu0  ;;  %4399 = vmatprep.mubr.bf16.mxu1 %v4195_v4 }
 0x3c6   :  { %v5179_v14 = vadd.f32 %v3993_v17, %v8365_v49  ;;  %v3995_v32 = vpop.f32.mrb[75].mxu0  ;;  %4400 = vmatmul.mubr.bf16.gmra.mrb[100].mxu1 %v4194_v11  ;;  %v4136_v34 = vmax.f32 %v5177_v30, 0.0 }
 0x3c7   :  { %v5180_v56 = vadd.f32 %v3995_v32, %v8369_v62  ;;  %v4137_v44 = vmax.f32 %v5178_v63, 0.0 }
 0x3c8   :  { %v4138_v12 = vmax.f32 %v5179_v14, 0.0 }
 0x3c9   :  { %v4139_v24 = vmax.f32 %v5180_v56, 0.0 }
 0x3ca   :  { %v4196_v60 = vpack.c.bf16 %v4138_v12, %v4136_v34 }
 0x3cb   :  { %v4197_v55 = vpack.c.bf16 %v4139_v24, %v4137_v44  ;;  %v3999_v20 = vpop.f32.mrb[76].mxu0 }
 0x3cc   :  { %v5181_v8 = vadd.f32 %v3999_v20, %v8365_v49  ;;  %v4001_v58 = vpop.f32.mrb[77].mxu0 }
 0x3cd   :  { %v5182_v51 = vadd.f32 %v4001_v58, %v8369_v62  ;;  %v4003_v29 = vpop.f32.mrb[78].mxu0  ;;  %4407 = vmatprep.mubr.bf16.mxu1 %v4197_v55 }
 0x3ce   :  { %v5183_v26 = vadd.f32 %v4003_v29, %v8365_v49  ;;  %v4005_v23 = vpop.f32.mrb[79].mxu0  ;;  %4408 = vmatmul.mubr.bf16.gmra.mrb[104].mxu1 %v4196_v60  ;;  %v4140_v41 = vmax.f32 %v5181_v8, 0.0 }
 0x3cf   :  { %v5184_v18 = vadd.f32 %v4005_v23, %v8369_v62  ;;  %v4141_v35 = vmax.f32 %v5182_v51, 0.0 }
 0x3d0   :  { %v4142_v10 = vmax.f32 %v5183_v26, 0.0 }
 0x3d1   :  { %v4143_v50 = vmax.f32 %v5184_v18, 0.0 }
 0x3d2   :  { %v4198_v22 = vpack.c.bf16 %v4142_v10, %v4140_v41 }
 0x3d3   :  { %v4199_v9 = vpack.c.bf16 %v4143_v50, %v4141_v35  ;;  %v4009_v25 = vpop.f32.mrb[80].mxu0 }
 0x3d4   :  { %v5185_v46 = vadd.f32 %v4009_v25, %v8365_v49  ;;  %v4011_v54 = vpop.f32.mrb[81].mxu0 }
 0x3d5   :  { %v5186_v1 = vadd.f32 %v4011_v54, %v8369_v62  ;;  %v4013_v61 = vpop.f32.mrb[82].mxu0  ;;  %4415 = vmatprep.mubr.bf16.mxu1 %v4199_v9 }
 0x3d6   :  { %v5187_v59 = vadd.f32 %v4013_v61, %v8365_v49  ;;  %v4015_v13 = vpop.f32.mrb[83].mxu0  ;;  %4416 = vmatmul.mubr.bf16.gmra.mrb[108].mxu1 %v4198_v22  ;;  %v4144_v19 = vmax.f32 %v5185_v46, 0.0 }
 0x3d7   :  { %v5188_v28 = vadd.f32 %v4015_v13, %v8369_v62  ;;  %v4145_v45 = vmax.f32 %v5186_v1, 0.0 }
 0x3d8   :  { %v4146_v21 = vmax.f32 %v5187_v59, 0.0 }
 0x3d9   :  { %v4147_v27 = vmax.f32 %v5188_v28, 0.0 }
 0x3da   :  { %v4200_v38 = vpack.c.bf16 %v4146_v21, %v4144_v19 }
 0x3db   :  { %v4201_v42 = vpack.c.bf16 %v4147_v27, %v4145_v45  ;;  %v4019_v3 = vpop.f32.mrb[84].mxu0 }
 0x3dc   :  { %v5189_v7 = vadd.f32 %v4019_v3, %v8365_v49  ;;  %v4021_v37 = vpop.f32.mrb[85].mxu0 }
 0x3dd   :  { %v5190_v43 = vadd.f32 %v4021_v37, %v8369_v62  ;;  %v4023_v31 = vpop.f32.mrb[86].mxu0  ;;  %4423 = vmatprep.mubr.bf16.mxu1 %v4201_v42 }
 0x3de   :  { %v5191_v47 = vadd.f32 %v4023_v31, %v8365_v49  ;;  %v4025_v53 = vpop.f32.mrb[87].mxu0  ;;  %4424 = vmatmul.mubr.bf16.gmra.mrb[112].mxu1 %v4200_v38  ;;  %v4148_v52 = vmax.f32 %v5189_v7, 0.0 }
 0x3df   :  { %v5192_v40 = vadd.f32 %v4025_v53, %v8369_v62  ;;  %v4149_v33 = vmax.f32 %v5190_v43, 0.0 }
 0x3e0   :  { %v4150_v16 = vmax.f32 %v5191_v47, 0.0 }
 0x3e1   :  { %v4151_v39 = vmax.f32 %v5192_v40, 0.0 }
 0x3e2   :  { %v4202_v36 = vpack.c.bf16 %v4150_v16, %v4148_v52 }
 0x3e3   :  { %v4203_v15 = vpack.c.bf16 %v4151_v39, %v4149_v33  ;;  %v4029_v6 = vpop.f32.mrb[88].mxu0 }
 0x3e4   :  { %v5193_v48 = vadd.f32 %v4029_v6, %v8365_v49  ;;  %v4031_v57 = vpop.f32.mrb[89].mxu0 }
 0x3e5   :  { %v5194_v0 = vadd.f32 %v4031_v57, %v8369_v62  ;;  %v4033_v11 = vpop.f32.mrb[90].mxu0  ;;  %4431 = vmatprep.mubr.bf16.mxu1 %v4203_v15 }
 0x3e6   :  { %v5195_v4 = vadd.f32 %v4033_v11, %v8365_v49  ;;  %v4035_v5 = vpop.f32.mrb[91].mxu0  ;;  %4432 = vmatmul.mubr.bf16.gmra.mrb[116].mxu1 %v4202_v36  ;;  %v4152_v2 = vmax.f32 %v5193_v48, 0.0 }
 0x3e7   :  { %v5196_v30 = vadd.f32 %v4035_v5, %v8369_v62  ;;  %v4153_v17 = vmax.f32 %v5194_v0, 0.0 }
 0x3e8   :  { %v4154_v63 = vmax.f32 %v5195_v4, 0.0 }
 0x3e9   :  { %v4155_v14 = vmax.f32 %v5196_v30, 0.0 }
 0x3ea   :  { %v4204_v32 = vpack.c.bf16 %v4154_v63, %v4152_v2 }
 0x3eb   :  { %v4205_v56 = vpack.c.bf16 %v4155_v14, %v4153_v17  ;;  %v4039_v34 = vpop.f32.mrb[92].mxu0 }
 0x3ec   :  { %v5197_v12 = vadd.f32 %v4039_v34, %v8365_v49  ;;  %v4041_v44 = vpop.f32.mrb[93].mxu0 }
 0x3ed   :  { %v5198_v24 = vadd.f32 %v4041_v44, %v8369_v62  ;;  %v4043_v60 = vpop.f32.mrb[94].mxu0  ;;  %4439 = vmatprep.mubr.bf16.mxu1 %v4205_v56 }
 0x3ee   :  { %v5199_v55 = vadd.f32 %v4043_v60, %v8365_v49  ;;  %v4045_v20 = vpop.f32.mrb[95].mxu0  ;;  %4440 = vmatmul.mubr.bf16.gmra.mrb[120].mxu1 %v4204_v32  ;;  %v4156_v58 = vmax.f32 %v5197_v12, 0.0 }
 0x3ef   :  { %v5200_v8 = vadd.f32 %v4045_v20, %v8369_v62  ;;  %v4157_v29 = vmax.f32 %v5198_v24, 0.0 }
 0x3f0   :  { %v4158_v51 = vmax.f32 %v5199_v55, 0.0 }
 0x3f1   :  { %v4159_v26 = vmax.f32 %v5200_v8, 0.0 }
 0x3f2   :  { %v4206_v23 = vpack.c.bf16 %v4158_v51, %v4156_v58 }
 0x3f3   :  { %v4207_v18 = vpack.c.bf16 %v4159_v26, %v4157_v29  ;;  %v4049_v41 = vpop.f32.mrb[96].mxu0 }
 0x3f4   :  { %v5201_v10 = vadd.f32 %v4049_v41, %v8365_v49  ;;  %v4051_v35 = vpop.f32.mrb[97].mxu0 }
 0x3f5   :  { %v5202_v50 = vadd.f32 %v4051_v35, %v8369_v62  ;;  %v4053_v22 = vpop.f32.mrb[98].mxu0  ;;  %4447 = vmatprep.mubr.bf16.mxu1 %v4207_v18 }
 0x3f6   :  { %v5203_v9 = vadd.f32 %v4053_v22, %v8365_v49  ;;  %v4055_v25 = vpop.f32.mrb[99].mxu0  ;;  %4448 = vmatmul.mubr.bf16.gmra.mrb[124].mxu1 %v4206_v23  ;;  %v4160_v54 = vmax.f32 %v5201_v10, 0.0 }
 0x3f7   :  { %v5204_v46 = vadd.f32 %v4055_v25, %v8369_v62  ;;  %v4161_v61 = vmax.f32 %v5202_v50, 0.0 }
 0x3f8   :  { %v4162_v1 = vmax.f32 %v5203_v9, 0.0 }
 0x3f9   :  { %v4163_v59 = vmax.f32 %v5204_v46, 0.0 }
 0x3fa   :  { %v4208_v13 = vpack.c.bf16 %v4162_v1, %v4160_v54 }
 0x3fb   :  { %v4209_v28 = vpack.c.bf16 %v4163_v59, %v4161_v61  ;;  %v4059_v19 = vpop.f32.mrb[100].mxu0 }
 0x3fc   :  { %v5205_v21 = vadd.f32 %v4059_v19, %v8365_v49  ;;  %v4061_v45 = vpop.f32.mrb[101].mxu0 }
 0x3fd   :  { %v5206_v27 = vadd.f32 %v4061_v45, %v8369_v62  ;;  %v4063_v38 = vpop.f32.mrb[102].mxu0  ;;  %4455 = vmatprep.mubr.bf16.mxu1 %v4209_v28 }
 0x3fe   :  { %v5207_v42 = vadd.f32 %v4063_v38, %v8365_v49  ;;  %v4065_v3 = vpop.f32.mrb[103].mxu0  ;;  %4456 = vmatmul.mubr.bf16.gmra.mrb[128].mxu1 %v4208_v13  ;;  %v4164_v37 = vmax.f32 %v5205_v21, 0.0 }
 0x3ff   :  { %v5208_v7 = vadd.f32 %v4065_v3, %v8369_v62  ;;  %v4165_v31 = vmax.f32 %v5206_v27, 0.0 }
 0x400   :  { %v4166_v43 = vmax.f32 %v5207_v42, 0.0 }
 0x401   :  { %v4167_v47 = vmax.f32 %v5208_v7, 0.0 }
 0x402   :  { %v4210_v53 = vpack.c.bf16 %v4166_v43, %v4164_v37 }
 0x403   :  { %v4211_v40 = vpack.c.bf16 %v4167_v47, %v4165_v31  ;;  %v4069_v52 = vpop.f32.mrb[104].mxu0 }
 0x404   :  { %v5209_v16 = vadd.f32 %v4069_v52, %v8365_v49  ;;  %v4071_v33 = vpop.f32.mrb[105].mxu0 }
 0x405   :  { %v5210_v39 = vadd.f32 %v4071_v33, %v8369_v62  ;;  %v4073_v36 = vpop.f32.mrb[106].mxu0  ;;  %4463 = vmatprep.mubr.bf16.mxu1 %v4211_v40 }
 0x406   :  { %v5211_v15 = vadd.f32 %v4073_v36, %v8365_v49  ;;  %v4075_v6 = vpop.f32.mrb[107].mxu0  ;;  %4464 = vmatmul.mubr.bf16.gmra.mrb[132].mxu1 %v4210_v53  ;;  %v4168_v57 = vmax.f32 %v5209_v16, 0.0 }
 0x407   :  { %v5212_v48 = vadd.f32 %v4075_v6, %v8369_v62  ;;  %v4169_v11 = vmax.f32 %v5210_v39, 0.0 }
 0x408   :  { %v4170_v0 = vmax.f32 %v5211_v15, 0.0 }
 0x409   :  { %v4171_v4 = vmax.f32 %v5212_v48, 0.0 }
 0x40a   :  { %v4212_v5 = vpack.c.bf16 %v4170_v0, %v4168_v57 }
 0x40b   :  { %v4213_v30 = vpack.c.bf16 %v4171_v4, %v4169_v11  ;;  %v4079_v2 = vpop.f32.mrb[108].mxu0 }
 0x40c   :  { %v5213_v63 = vadd.f32 %v4079_v2, %v8365_v49  ;;  %v4081_v17 = vpop.f32.mrb[109].mxu0 }
 0x40d   :  { %v5214_v14 = vadd.f32 %v4081_v17, %v8369_v62  ;;  %v4083_v32 = vpop.f32.mrb[110].mxu0  ;;  %4471 = vmatprep.mubr.bf16.mxu1 %v4213_v30 }
 0x40e   :  { %v5215_v56 = vadd.f32 %v4083_v32, %v8365_v49  ;;  %v4085_v34 = vpop.f32.mrb[111].mxu0  ;;  %4472 = vmatmul.mubr.bf16.gmra.mrb[136].mxu1 %v4212_v5  ;;  %v4172_v44 = vmax.f32 %v5213_v63, 0.0 }
 0x40f   :  { %v5216_v12 = vadd.f32 %v4085_v34, %v8369_v62  ;;  %v4173_v60 = vmax.f32 %v5214_v14, 0.0 }
 0x410   :  { %v4174_v24 = vmax.f32 %v5215_v56, 0.0 }
 0x411   :  { %v4175_v55 = vmax.f32 %v5216_v12, 0.0 }
 0x412   :  { %v4214_v20 = vpack.c.bf16 %v4174_v24, %v4172_v44  ;;  %v8438_v24 = vld [vmem:[%s8574_s6] ss:$0 sm:$0xff] }
 0x413   :  { %v4215_v8 = vpack.c.bf16 %v4175_v55, %v4173_v60  ;;  %v4089_v58 = vpop.f32.mrb[112].mxu0 }
 0x414   :  { %v5217_v51 = vadd.f32 %v4089_v58, %v8365_v49  ;;  %v4091_v29 = vpop.f32.mrb[113].mxu0 }
 0x415   :  { %v5218_v26 = vadd.f32 %v4091_v29, %v8369_v62  ;;  %v4093_v23 = vpop.f32.mrb[114].mxu0  ;;  %4479 = vmatprep.mubr.bf16.mxu1 %v4215_v8 }
 0x416   :  { %v5219_v18 = vadd.f32 %v4093_v23, %v8365_v49  ;;  %v4095_v41 = vpop.f32.mrb[115].mxu0  ;;  %4480 = vmatmul.mubr.bf16.gmra.mrb[140].mxu1 %v4214_v20  ;;  %v4176_v35 = vmax.f32 %v5217_v51, 0.0 }
 0x417   :  { %v5220_v10 = vadd.f32 %v4095_v41, %v8369_v62  ;;  %v4177_v22 = vmax.f32 %v5218_v26, 0.0 }
 0x418   :  { %v4178_v50 = vmax.f32 %v5219_v18, 0.0 }
 0x419   :  { %v4179_v9 = vmax.f32 %v5220_v10, 0.0 }
 0x41a   :  { %v4216_v25 = vpack.c.bf16 %v4178_v50, %v4176_v35 }
 0x41b   :  { %v4217_v46 = vpack.c.bf16 %v4179_v9, %v4177_v22  ;;  %v4099_v54 = vpop.f32.mrb[116].mxu0 }
 0x41c   :  { %v5221_v1 = vadd.f32 %v4099_v54, %v8365_v49  ;;  %v4101_v61 = vpop.f32.mrb[117].mxu0 }
 0x41d   :  { %v5222_v59 = vadd.f32 %v4101_v61, %v8369_v62  ;;  %v4103_v13 = vpop.f32.mrb[118].mxu0  ;;  %4487 = vmatprep.mubr.bf16.mxu1 %v4217_v46 }
 0x41e   :  { %v5223_v28 = vadd.f32 %v4103_v13, %v8365_v49  ;;  %v4105_v19 = vpop.f32.mrb[119].mxu0  ;;  %4488 = vmatmul.mubr.bf16.gmra.mrb[144].mxu1 %v4216_v25  ;;  %v4180_v45 = vmax.f32 %v5221_v1, 0.0 }
 0x41f   :  { %v5224_v21 = vadd.f32 %v4105_v19, %v8369_v62  ;;  %v4181_v38 = vmax.f32 %v5222_v59, 0.0 }
 0x420   :  { %v4182_v27 = vmax.f32 %v5223_v28, 0.0 }
 0x421   :  { %v4183_v42 = vmax.f32 %v5224_v21, 0.0 }
 0x422   :  { %v4218_v3 = vpack.c.bf16 %v4182_v27, %v4180_v45 }
 0x423   :  { %v4219_v7 = vpack.c.bf16 %v4183_v42, %v4181_v38  ;;  %v4109_v37 = vpop.f32.mrb[120].mxu0 }
 0x424   :  { %v5225_v43 = vadd.f32 %v4109_v37, %v8365_v49  ;;  %v4111_v31 = vpop.f32.mrb[121].mxu0 }
 0x425   :  { %v5226_v47 = vadd.f32 %v4111_v31, %v8369_v62  ;;  %v4113_v53 = vpop.f32.mrb[122].mxu0  ;;  %4495 = vmatprep.mubr.bf16.mxu1 %v4219_v7 }
 0x426   :  { %v5227_v40 = vadd.f32 %v4113_v53, %v8365_v49  ;;  %v4115_v52 = vpop.f32.mrb[123].mxu0  ;;  %4496 = vmatmul.mubr.bf16.gmra.mrb[148].mxu1 %v4218_v3  ;;  %v4184_v33 = vmax.f32 %v5225_v43, 0.0 }
 0x427   :  { %v5228_v16 = vadd.f32 %v4115_v52, %v8369_v62  ;;  %v4185_v36 = vmax.f32 %v5226_v47, 0.0 }
 0x428   :  { %v4186_v39 = vmax.f32 %v5227_v40, 0.0 }
 0x429   :  { %v4187_v15 = vmax.f32 %v5228_v16, 0.0 }
 0x42a   :  { %v4220_v6 = vpack.c.bf16 %v4186_v39, %v4184_v33 }
 0x42b   :  { %v4221_v48 = vpack.c.bf16 %v4187_v15, %v4185_v36  ;;  %v4119_v57 = vpop.f32.mrb[124].mxu0 }
 0x42c   :  { %v5229_v0 = vadd.f32 %v4119_v57, %v8365_v49  ;;  %v4121_v11 = vpop.f32.mrb[125].mxu0 }
 0x42d   :  { %v5230_v4 = vadd.f32 %v4121_v11, %v8369_v62  ;;  %v4123_v5 = vpop.f32.mrb[126].mxu0  ;;  %4503 = vmatprep.mubr.bf16.mxu1 %v4221_v48 }
 0x42e   :  { %v5231_v30 = vadd.f32 %v4123_v5, %v8365_v49  ;;  %v4125_v2 = vpop.f32.mrb[127].mxu0  ;;  %4504 = vmatmul.mubr.bf16.gmra.mrb[152].mxu1 %v4220_v6  ;;  %v4188_v17 = vmax.f32 %v5229_v0, 0.0 }
 0x42f   :  { %v5232_v63 = vadd.f32 %v4125_v2, %v8369_v62  ;;  %v4189_v32 = vmax.f32 %v5230_v4, 0.0 }
 0x430   :  { %v4190_v14 = vmax.f32 %v5231_v30, 0.0 }
 0x431   :  { %v4191_v56 = vmax.f32 %v5232_v63, 0.0 }
 0x432   :  { %v4222_v34 = vpack.c.bf16 %v4190_v14, %v4188_v17 }
 0x433   :  { %v4223_v12 = vpack.c.bf16 %v4191_v56, %v4189_v32 }
 0x435   :  { %4511 = vmatprep.mubr.bf16.mxu1 %v4223_v12 }
 0x436   :  { %4512 = vmatmul.mubr.bf16.gmra.mrb[156].mxu1 %v4222_v34 }
 0x491   :  { %v4881_v44 = vpop.f32.mrb[96].mxu1 }
 0x492   :  { %v4882_v60 = vpop.f32.mrb[97].mxu1 }
 0x493   :  { %v4883_v49 = vadd.f32 %v4882_v60, %v4881_v44  ;;  %v4884_v55 = vpop.f32.mrb[98].mxu1 }
 0x494   :  { %v4885_v20 = vpop.f32.mrb[99].mxu1 }
 0x495   :  { %v4394_v62 = vadd.f32 %v4883_v49, %v8438_v24  ;;  %v4886_v8 = vadd.f32 %v4885_v20, %v4884_v55 }
 0x497   :  { %4520 = vst [vmem:[%s8575_s7] sm:$0xff] %v4394_v62  ;;  %v4397_v58 = vadd.f32 %v4886_v8, %v8438_v24 }
 0x499   :  { %4521 = vst [vmem:[%s8575_s7 + $0x8] sm:$0xff] %v4397_v58  ;;  %v4887_v51 = vpop.f32.mrb[100].mxu1 }
 0x49a   :  { %v4888_v29 = vpop.f32.mrb[101].mxu1 }
 0x49b   :  { %v4889_v26 = vadd.f32 %v4888_v29, %v4887_v51  ;;  %v4890_v23 = vpop.f32.mrb[102].mxu1 }
 0x49c   :  { %v4891_v18 = vpop.f32.mrb[103].mxu1 }
 0x49d   :  { %v4402_v41 = vadd.f32 %v4889_v26, %v8438_v24  ;;  %v4892_v10 = vadd.f32 %v4891_v18, %v4890_v23 }
 0x49f   :  { %4522 = vst [vmem:[%s8575_s7 + $0x10] sm:$0xff] %v4402_v41  ;;  %v4405_v35 = vadd.f32 %v4892_v10, %v8438_v24 }
 0x4a1   :  { %4523 = vst [vmem:[%s8575_s7 + $0x18] sm:$0xff] %v4405_v35  ;;  %v4893_v50 = vpop.f32.mrb[104].mxu1 }
 0x4a2   :  { %v4894_v22 = vpop.f32.mrb[105].mxu1 }
 0x4a3   :  { %v4895_v9 = vadd.f32 %v4894_v22, %v4893_v50  ;;  %v4896_v25 = vpop.f32.mrb[106].mxu1 }
 0x4a4   :  { %v4897_v46 = vpop.f32.mrb[107].mxu1 }
 0x4a5   :  { %v4410_v54 = vadd.f32 %v4895_v9, %v8438_v24  ;;  %v4898_v1 = vadd.f32 %v4897_v46, %v4896_v25 }
 0x4a7   :  { %4524 = vst [vmem:[%s8575_s7 + $0x20] sm:$0xff] %v4410_v54  ;;  %v4413_v61 = vadd.f32 %v4898_v1, %v8438_v24 }
 0x4a9   :  { %4525 = vst [vmem:[%s8575_s7 + $0x28] sm:$0xff] %v4413_v61  ;;  %v4899_v59 = vpop.f32.mrb[108].mxu1 }
 0x4aa   :  { %v4900_v13 = vpop.f32.mrb[109].mxu1 }
 0x4ab   :  { %v4901_v28 = vadd.f32 %v4900_v13, %v4899_v59  ;;  %v4902_v19 = vpop.f32.mrb[110].mxu1 }
 0x4ac   :  { %v4903_v21 = vpop.f32.mrb[111].mxu1 }
 0x4ad   :  { %v4418_v45 = vadd.f32 %v4901_v28, %v8438_v24  ;;  %v4904_v27 = vadd.f32 %v4903_v21, %v4902_v19 }
 0x4af   :  { %4526 = vst [vmem:[%s8575_s7 + $0x30] sm:$0xff] %v4418_v45  ;;  %v4421_v38 = vadd.f32 %v4904_v27, %v8438_v24 }
 0x4b1   :  { %4527 = vst [vmem:[%s8575_s7 + $0x38] sm:$0xff] %v4421_v38  ;;  %v4905_v42 = vpop.f32.mrb[112].mxu1 }
 0x4b2   :  { %v4906_v3 = vpop.f32.mrb[113].mxu1 }
 0x4b3   :  { %v4907_v7 = vadd.f32 %v4906_v3, %v4905_v42  ;;  %v4908_v37 = vpop.f32.mrb[114].mxu1 }
 0x4b4   :  { %v4909_v43 = vpop.f32.mrb[115].mxu1 }
 0x4b5   :  { %v4426_v31 = vadd.f32 %v4907_v7, %v8438_v24  ;;  %v4910_v47 = vadd.f32 %v4909_v43, %v4908_v37 }
 0x4b7   :  { %4528 = vst [vmem:[%s8575_s7 + $0x40] sm:$0xff] %v4426_v31  ;;  %v4429_v53 = vadd.f32 %v4910_v47, %v8438_v24 }
 0x4b9   :  { %4529 = vst [vmem:[%s8575_s7 + $0x48] sm:$0xff] %v4429_v53  ;;  %v4911_v40 = vpop.f32.mrb[116].mxu1 }
 0x4ba   :  { %v4912_v52 = vpop.f32.mrb[117].mxu1 }
 0x4bb   :  { %v4913_v16 = vadd.f32 %v4912_v52, %v4911_v40  ;;  %v4914_v33 = vpop.f32.mrb[118].mxu1 }
 0x4bc   :  { %v4915_v39 = vpop.f32.mrb[119].mxu1 }
 0x4bd   :  { %v4434_v36 = vadd.f32 %v4913_v16, %v8438_v24  ;;  %v4916_v15 = vadd.f32 %v4915_v39, %v4914_v33 }
 0x4bf   :  { %4530 = vst [vmem:[%s8575_s7 + $0x50] sm:$0xff] %v4434_v36  ;;  %v4437_v6 = vadd.f32 %v4916_v15, %v8438_v24 }
 0x4c1   :  { %4531 = vst [vmem:[%s8575_s7 + $0x58] sm:$0xff] %v4437_v6  ;;  %v4917_v48 = vpop.f32.mrb[120].mxu1 }
 0x4c2   :  { %v4918_v57 = vpop.f32.mrb[121].mxu1 }
 0x4c3   :  { %v4919_v0 = vadd.f32 %v4918_v57, %v4917_v48  ;;  %v4920_v11 = vpop.f32.mrb[122].mxu1 }
 0x4c4   :  { %v4921_v4 = vpop.f32.mrb[123].mxu1 }
 0x4c5   :  { %v4442_v5 = vadd.f32 %v4919_v0, %v8438_v24  ;;  %v4922_v30 = vadd.f32 %v4921_v4, %v4920_v11 }
 0x4c7   :  { %4532 = vst [vmem:[%s8575_s7 + $0x60] sm:$0xff] %v4442_v5  ;;  %v4445_v2 = vadd.f32 %v4922_v30, %v8438_v24 }
 0x4c9   :  { %4533 = vst [vmem:[%s8575_s7 + $0x68] sm:$0xff] %v4445_v2  ;;  %v4923_v63 = vpop.f32.mrb[124].mxu1 }
 0x4ca   :  { %v4924_v17 = vpop.f32.mrb[125].mxu1 }
 0x4cb   :  { %v4925_v14 = vadd.f32 %v4924_v17, %v4923_v63  ;;  %v4926_v32 = vpop.f32.mrb[126].mxu1 }
 0x4cc   :  { %v4927_v56 = vpop.f32.mrb[127].mxu1 }
 0x4cd   :  { %v4450_v34 = vadd.f32 %v4925_v14, %v8438_v24  ;;  %v4928_v12 = vadd.f32 %v4927_v56, %v4926_v32 }
 0x4cf   :  { %4534 = vst [vmem:[%s8575_s7 + $0x70] sm:$0xff] %v4450_v34  ;;  %v4453_v44 = vadd.f32 %v4928_v12, %v8438_v24 }
 0x4d1   :  { %4535 = vst [vmem:[%s8575_s7 + $0x78] sm:$0xff] %v4453_v44  ;;  %v4929_v60 = vpop.f32.mrb[128].mxu1 }
 0x4d2   :  { %v4930_v49 = vpop.f32.mrb[129].mxu1 }
 0x4d3   :  { %v4931_v55 = vadd.f32 %v4930_v49, %v4929_v60  ;;  %v4932_v20 = vpop.f32.mrb[130].mxu1 }
 0x4d4   :  { %v4933_v62 = vpop.f32.mrb[131].mxu1 }
 0x4d5   :  { %v4458_v8 = vadd.f32 %v4931_v55, %v8438_v24  ;;  %v4934_v58 = vadd.f32 %v4933_v62, %v4932_v20 }
 0x4d7   :  { %4536 = vst [vmem:[%s8575_s7 + $0x80] sm:$0xff] %v4458_v8  ;;  %v4461_v51 = vadd.f32 %v4934_v58, %v8438_v24 }
 0x4d9   :  { %4537 = vst [vmem:[%s8575_s7 + $0x88] sm:$0xff] %v4461_v51  ;;  %v4935_v29 = vpop.f32.mrb[132].mxu1 }
 0x4da   :  { %v4936_v26 = vpop.f32.mrb[133].mxu1 }
 0x4db   :  { %v4937_v23 = vadd.f32 %v4936_v26, %v4935_v29  ;;  %v4938_v18 = vpop.f32.mrb[134].mxu1 }
 0x4dc   :  { %v4939_v41 = vpop.f32.mrb[135].mxu1 }
 0x4dd   :  { %v4466_v10 = vadd.f32 %v4937_v23, %v8438_v24  ;;  %v4940_v35 = vadd.f32 %v4939_v41, %v4938_v18 }
 0x4df   :  { %4538 = vst [vmem:[%s8575_s7 + $0x90] sm:$0xff] %v4466_v10  ;;  %v4469_v50 = vadd.f32 %v4940_v35, %v8438_v24 }
 0x4e1   :  { %4539 = vst [vmem:[%s8575_s7 + $0x98] sm:$0xff] %v4469_v50  ;;  %v4941_v22 = vpop.f32.mrb[136].mxu1 }
 0x4e2   :  { %v4942_v9 = vpop.f32.mrb[137].mxu1 }
 0x4e3   :  { %v4943_v25 = vadd.f32 %v4942_v9, %v4941_v22  ;;  %v4944_v46 = vpop.f32.mrb[138].mxu1 }
 0x4e4   :  { %v4945_v54 = vpop.f32.mrb[139].mxu1 }
 0x4e5   :  { %v4474_v1 = vadd.f32 %v4943_v25, %v8438_v24  ;;  %v4946_v61 = vadd.f32 %v4945_v54, %v4944_v46 }
 0x4e7   :  { %4540 = vst [vmem:[%s8575_s7 + $0xa0] sm:$0xff] %v4474_v1  ;;  %v4477_v59 = vadd.f32 %v4946_v61, %v8438_v24 }
 0x4e9   :  { %4541 = vst [vmem:[%s8575_s7 + $0xa8] sm:$0xff] %v4477_v59  ;;  %v4947_v13 = vpop.f32.mrb[140].mxu1 }
 0x4ea   :  { %v4948_v28 = vpop.f32.mrb[141].mxu1 }
 0x4eb   :  { %v4949_v19 = vadd.f32 %v4948_v28, %v4947_v13  ;;  %v4950_v21 = vpop.f32.mrb[142].mxu1 }
 0x4ec   :  { %v4951_v45 = vpop.f32.mrb[143].mxu1 }
 0x4ed   :  { %v4482_v27 = vadd.f32 %v4949_v19, %v8438_v24  ;;  %v4952_v38 = vadd.f32 %v4951_v45, %v4950_v21 }
 0x4ef   :  { %4542 = vst [vmem:[%s8575_s7 + $0xb0] sm:$0xff] %v4482_v27  ;;  %v4485_v42 = vadd.f32 %v4952_v38, %v8438_v24 }
 0x4f1   :  { %4543 = vst [vmem:[%s8575_s7 + $0xb8] sm:$0xff] %v4485_v42  ;;  %v4953_v3 = vpop.f32.mrb[144].mxu1 }
 0x4f2   :  { %v4954_v7 = vpop.f32.mrb[145].mxu1 }
 0x4f3   :  { %v4955_v37 = vadd.f32 %v4954_v7, %v4953_v3  ;;  %v4956_v43 = vpop.f32.mrb[146].mxu1 }
 0x4f4   :  { %v4957_v31 = vpop.f32.mrb[147].mxu1 }
 0x4f5   :  { %v4490_v47 = vadd.f32 %v4955_v37, %v8438_v24  ;;  %v4958_v53 = vadd.f32 %v4957_v31, %v4956_v43 }
 0x4f7   :  { %4544 = vst [vmem:[%s8575_s7 + $0xc0] sm:$0xff] %v4490_v47  ;;  %v4493_v40 = vadd.f32 %v4958_v53, %v8438_v24 }
 0x4f9   :  { %4545 = vst [vmem:[%s8575_s7 + $0xc8] sm:$0xff] %v4493_v40  ;;  %v4959_v52 = vpop.f32.mrb[148].mxu1 }
 0x4fa   :  { %v4960_v16 = vpop.f32.mrb[149].mxu1 }
 0x4fb   :  { %v4961_v33 = vadd.f32 %v4960_v16, %v4959_v52  ;;  %v4962_v39 = vpop.f32.mrb[150].mxu1 }
 0x4fc   :  { %v4963_v36 = vpop.f32.mrb[151].mxu1 }
 0x4fd   :  { %v4498_v15 = vadd.f32 %v4961_v33, %v8438_v24  ;;  %v4964_v6 = vadd.f32 %v4963_v36, %v4962_v39 }
 0x4ff   :  { %4546 = vst [vmem:[%s8575_s7 + $0xd0] sm:$0xff] %v4498_v15  ;;  %v4501_v48 = vadd.f32 %v4964_v6, %v8438_v24 }
 0x501   :  { %4547 = vst [vmem:[%s8575_s7 + $0xd8] sm:$0xff] %v4501_v48  ;;  %v4965_v57 = vpop.f32.mrb[152].mxu1 }
 0x502   :  { %v4966_v0 = vpop.f32.mrb[153].mxu1 }
 0x503   :  { %v4967_v11 = vadd.f32 %v4966_v0, %v4965_v57  ;;  %v4968_v4 = vpop.f32.mrb[154].mxu1 }
 0x504   :  { %v4969_v5 = vpop.f32.mrb[155].mxu1 }
 0x505   :  { %v4506_v30 = vadd.f32 %v4967_v11, %v8438_v24  ;;  %v4970_v2 = vadd.f32 %v4969_v5, %v4968_v4 }
 0x507   :  { %4548 = vst [vmem:[%s8575_s7 + $0xe0] sm:$0xff] %v4506_v30  ;;  %v4509_v63 = vadd.f32 %v4970_v2, %v8438_v24 }
 0x509   :  { %4549 = vst [vmem:[%s8575_s7 + $0xe8] sm:$0xff] %v4509_v63  ;;  %v4971_v17 = vpop.f32.mrb[156].mxu1 }
 0x50a   :  { %v4972_v14 = vpop.f32.mrb[157].mxu1 }
 0x50b   :  { %v4973_v32 = vadd.f32 %v4972_v14, %v4971_v17  ;;  %v4974_v56 = vpop.f32.mrb[158].mxu1 }
 0x50c   :  { %v4975_v34 = vpop.f32.mrb[159].mxu1 }
 0x50d   :  { %v4514_v12 = vadd.f32 %v4973_v32, %v8438_v24  ;;  %v4976_v44 = vadd.f32 %v4975_v34, %v4974_v56 }
 0x50f   :  { %4550 = vst [vmem:[%s8575_s7 + $0xf0] sm:$0xff] %v4514_v12  ;;  %v4517_v60 = vadd.f32 %v4976_v44, %v8438_v24 }
 0x511   :  { %4551 = vst [vmem:[%s8575_s7 + $0xf8] sm:$0xff] %v4517_v60 }

</bundles_post_ra>
